<compile_context>
chip_gen: v7x
topology: tpu7x:2x2x1
jax: 0.10.0
libtpu: 0.0.40
codegen_flags: <defaults>
</compile_context>

<pallas_src>
import jax
import jax.numpy as jnp
from jax.experimental import pallas as pl
from jax.experimental.pallas import tpu as pltpu


def _round_up(x, m):
    return (x + m - 1) // m * m


# ----------------------------------------------------------------------------
# Fused kernel: 4 lane-dense GEMMs, all intermediates stay in vregs/VMEM.
#   x_ref : (BB, d_in_p)  f32   input block (NCHW-flattened states)
#   a1/a2 : dense conv matrices, wf1/wf2 : padded FC weights (all bf16)
#   out   : (BB, 128) f32 (columns >= n_actions are zero padding)
# ----------------------------------------------------------------------------
def _dqn_fused_kernel(x_ref, a1_ref, b1_ref, a2_ref, b2_ref,
                      wf1_ref, bf1_ref, wf2_ref, bf2_ref, out_ref):
    f32 = jnp.float32
    bf16 = jnp.bfloat16

    x = x_ref[...].astype(bf16)                                     # (BB, 1024)

    # conv1 + ReLU (dense-embedded conv, exact)
    y = jnp.dot(x, a1_ref[...], preferred_element_type=f32)         # (BB, 896)
    y = jnp.maximum(y + b1_ref[...], 0.0).astype(bf16)

    # conv2 + ReLU (dense-embedded conv, exact; output is NCHW-flattened y2)
    y = jnp.dot(y, a2_ref[...], preferred_element_type=f32)         # (BB, 896)
    y = jnp.maximum(y + b2_ref[...], 0.0).astype(bf16)

    # fc1 + ReLU (hidden padded to 128 lanes)
    y = jnp.dot(y, wf1_ref[...], preferred_element_type=f32)        # (BB, 128)
    y = jnp.maximum(y + bf1_ref[...], 0.0).astype(bf16)

    # fc2 (n_actions padded to 128 lanes -> unmasked full-lane store)
    q = jnp.dot(y, wf2_ref[...], preferred_element_type=f32) + bf2_ref[...]
    out_ref[...] = q.astype(out_ref.dtype)                          # (BB, 128)


# ----------------------------------------------------------------------------
# One-time parameter preparation: fold both convs into dense matrices over the
# NCHW-flattened activations (exactly - via the identity-basis trick), pad all
# GEMM dims to multiples of 128 lanes, cast weights to bf16.
# ----------------------------------------------------------------------------
def prepare_params(params, in_c=4, h=16, w=16):
    f32, bf16 = jnp.float32, jnp.bfloat16
    c1, _, kh1, _ = params["conv1_w"].shape
    c2, _, kh2, _ = params["conv2_w"].shape
    hidden = params["fc1_w"].shape[1]
    n_actions = params["fc2_w"].shape[1]
    oh1, ow1 = (h - kh1) // 2 + 1, (w - kh1) // 2 + 1
    oh2, ow2 = oh1 - kh2 + 1, ow1 - kh2 + 1
    d_in, d1, d2 = in_c * h * w, c1 * oh1 * ow1, c2 * oh2 * ow2
    assert params["fc1_w"].shape[0] == d2

    dn = ("NCHW", "OIHW", "NCHW")

    # conv1 as a dense (d_in, d1) matrix: flatten_nchw(conv1(x)) == x_flat @ a1
    eye1 = jnp.eye(d_in, dtype=f32).reshape(d_in, in_c, h, w)
    a1 = jax.lax.conv_general_dilated(eye1, params["conv1_w"].astype(f32),
                                      (2, 2), "VALID", dimension_numbers=dn)
    a1 = a1.reshape(d_in, d1)
    b1 = jnp.broadcast_to(params["conv1_b"][:, None], (c1, oh1 * ow1)).reshape(1, d1)

    # conv2 as a dense (d1, d2) matrix (NCHW flatten in and out, so the
    # PyTorch flatten->fc1 convention is satisfied with fc1_w used as-is).
    eye2 = jnp.eye(d1, dtype=f32).reshape(d1, c1, oh1, ow1)
    a2 = jax.lax.conv_general_dilated(eye2, params["conv2_w"].astype(f32),
                                      (1, 1), "VALID", dimension_numbers=dn)
    a2 = a2.reshape(d1, d2)
    b2 = jnp.broadcast_to(params["conv2_b"][:, None], (c2, oh2 * ow2)).reshape(1, d2)

    # Pad every GEMM dim up to a multiple of 128 lanes (zero padding is exact:
    # ReLU(0)=0 and the corresponding rows of the next matrix are zero).
    d_inp = _round_up(d_in, 128)
    d1p, d2p = _round_up(d1, 128), _round_up(d2, 128)
    hp, ap = _round_up(hidden, 128), _round_up(n_actions, 128)

    def pad2(m, rows, cols):
        return jnp.pad(m, ((0, rows - m.shape[0]), (0, cols - m.shape[1])))

    a1 = pad2(a1, d_inp, d1p)
    a2 = pad2(a2, d1p, d2p)
    wf1 = pad2(params["fc1_w"], d2p, hp)
    wf2 = pad2(params["fc2_w"], hp, ap)
    b1 = pad2(b1, 1, d1p)
    b2 = pad2(b2, 1, d2p)
    bf1 = pad2(params["fc1_b"].reshape(1, hidden), 1, hp)
    bf2 = pad2(params["fc2_b"].reshape(1, n_actions), 1, ap)

    return {
        "a1": a1.astype(bf16), "b1": b1.astype(f32),
        "a2": a2.astype(bf16), "b2": b2.astype(f32),
        "wf1": wf1.astype(bf16), "bf1": bf1.astype(f32),
        "wf2": wf2.astype(bf16), "bf2": bf2.astype(f32),
    }


# ----------------------------------------------------------------------------
# Public forward: qvalues = q_network(state_t), state_t is NCHW float32.
# ----------------------------------------------------------------------------
def dqn_agent_forward(state_t_nchw, prepared, *, n_actions=6):
    B = state_t_nchw.shape[0]
    d_in = int(state_t_nchw.shape[1] * state_t_nchw.shape[2] * state_t_nchw.shape[3])
    d_inp = prepared["a1"].shape[0]
    ap = prepared["wf2"].shape[1]

    # NCHW flatten is a free reshape (no transpose / space-to-depth needed:
    # the conv->dense folding consumed the NCHW order directly).
    x2d = state_t_nchw.reshape(B, d_in).astype(jnp.float32)

    # Batch blocking: BB samples per grid step (multiple of 8, up to 128).
    BB = min(128, _round_up(B, 8))
    Bp = _round_up(B, BB)
    if Bp != B or d_inp != d_in:
        x2d = jnp.pad(x2d, ((0, Bp - B), (0, d_inp - d_in)))

    a1, b1 = prepared["a1"], prepared["b1"]
    a2, b2 = prepared["a2"], prepared["b2"]
    wf1, bf1 = prepared["wf1"], prepared["bf1"]
    wf2, bf2 = prepared["wf2"], prepared["bf2"]

    out = pl.pallas_call(
        _dqn_fused_kernel,
        out_shape=jax.ShapeDtypeStruct((Bp, ap), jnp.float32),
        grid=(Bp // BB,),
        in_specs=[
            pl.BlockSpec((BB, d_inp), lambda b: (b, 0)),     # per-step input block
            pl.BlockSpec(a1.shape, lambda b: (0, 0)),        # weights: constant index
            pl.BlockSpec(b1.shape, lambda b: (0, 0)),        #  -> stay resident in VMEM
            pl.BlockSpec(a2.shape, lambda b: (0, 0)),
            pl.BlockSpec(b2.shape, lambda b: (0, 0)),
            pl.BlockSpec(wf1.shape, lambda b: (0, 0)),
            pl.BlockSpec(bf1.shape, lambda b: (0, 0)),
            pl.BlockSpec(wf2.shape, lambda b: (0, 0)),
            pl.BlockSpec(bf2.shape, lambda b: (0, 0)),
        ],
        out_specs=pl.BlockSpec((BB, ap), lambda b: (b, 0)),
        compiler_params=pltpu.CompilerParams(
            dimension_semantics=("parallel",),               # batch axis -> megacore
            vmem_limit_bytes=32 * 1024 * 1024),
    )(x2d, a1, b1, a2, b2, wf1, bf1, wf2, bf2)

    return out[:B, :n_actions]


# ----------------------------------------------------------------------------
# Pure-JAX f32 reference (PyTorch NCHW semantics) for correctness checking.
# ----------------------------------------------------------------------------
def dqn_forward_reference(state_t_nchw, params):
    dn = ("NCHW", "OIHW", "NCHW")
    x = state_t_nchw.astype(jnp.float32)
    y1 = jax.lax.conv_general_dilated(x, params["conv1_w"], (2, 2), "VALID",
                                      dimension_numbers=dn)
    y1 = jnp.maximum(y1 + params["conv1_b"][None, :, None, None], 0.0)
    y2 = jax.lax.conv_general_dilated(y1, params["conv2_w"], (1, 1), "VALID",
                                      dimension_numbers=dn)
    y2 = jnp.maximum(y2 + params["conv2_b"][None, :, None, None], 0.0)
    flat = y2.reshape(y2.shape[0], -1)                      # NCHW flatten
    h = jnp.maximum(flat @ params["fc1_w"] + params["fc1_b"], 0.0)
    return h @ params["fc2_w"] + params["fc2_b"]


def init_params(key, in_c=4, h=16, w=16, n_actions=6):
    """Deterministic synthetic parameter init (no checkpoint loading)."""
    ks = jax.random.split(key, 8)
    c1, c2, hidden = 16, 32, 64
    oh1, ow1 = (h - 4) // 2 + 1, (w - 4) // 2 + 1
    oh2, ow2 = oh1 - 3 + 1, ow1 - 3 + 1
    flat_dim = c2 * oh2 * ow2

    def n(k, shape, scale):
        return jax.random.normal(k, shape, jnp.float32) * scale

    return {
        "conv1_w": n(ks[0], (c1, in_c, 4, 4), 0.05),
        "conv1_b": n(ks[1], (c1,), 0.01),
        "conv2_w": n(ks[2], (c2, c1, 3, 3), 0.05),
        "conv2_b": n(ks[3], (c2,), 0.01),
        "fc1_w":   n(ks[4], (flat_dim, hidden), 0.02),
        "fc1_b":   n(ks[5], (hidden,), 0.01),
        "fc2_w":   n(ks[6], (hidden, n_actions), 0.02),
        "fc2_b":   n(ks[7], (n_actions,), 0.01),
    }


if __name__ == "__main__":
    key = jax.random.PRNGKey(0)
    k_x, k_p = jax.random.split(key)

    batch, in_c, h, w = 2, 4, 16, 16          # [batch_size, 4, h, w]
    n_actions = 6

    state_t = jax.random.uniform(k_x, (batch, in_c, h, w), jnp.float32)
    params = init_params(k_p, in_c=in_c, h=h, w=w, n_actions=n_actions)
    prepared = prepare_params(params, in_c=in_c, h=h, w=w)   # one-time prep

    fwd = jax.jit(dqn_agent_forward, static_argnames=("n_actions",))
    qvalues = fwd(state_t, prepared, n_actions=n_actions)
    qvalues = jax.block_until_ready(qvalues)
    assert qvalues.shape == (batch, n_actions), qvalues.shape
    assert qvalues.dtype == jnp.float32

    q_ref = dqn_forward_reference(state_t, params)
    err = float(jnp.max(jnp.abs(qvalues - q_ref)))
    assert err < 5e-2, f"max abs error vs f32 reference: {err}"

    print("KERNEL_OK")
</pallas_src>

<mosaic_0001>
module attributes {stable_mosaic.version = 11 : i64} {
  func.func @_dqn_fused_kernel(%arg0: i32, %arg1: memref<8x1024xf32, #tpu.memory_space<vmem>>, %arg2: memref<1024x896xbf16, #tpu.memory_space<vmem>>, %arg3: memref<1x896xf32, #tpu.memory_space<vmem>>, %arg4: memref<896x896xbf16, #tpu.memory_space<vmem>>, %arg5: memref<1x896xf32, #tpu.memory_space<vmem>>, %arg6: memref<896x128xbf16, #tpu.memory_space<vmem>>, %arg7: memref<1x128xf32, #tpu.memory_space<vmem>>, %arg8: memref<128x128xbf16, #tpu.memory_space<vmem>>, %arg9: memref<1x128xf32, #tpu.memory_space<vmem>>, %arg10: memref<8x128xf32, #tpu.memory_space<vmem>>) attributes {dimension_semantics = [#tpu.dimension_semantics<parallel>], iteration_bounds = array<i64: 1>, scalar_prefetch = 0 : i64, scratch_operands = 0 : i64, tpu.core_type = #tpu.core_type<tc>, window_params = [{transform_indices = @transform_0, window_bounds = array<i64: 8, 1024>}, {pipeline_mode = #tpu.pipeline_mode<synchronous>, transform_indices = @transform_1, window_bounds = array<i64: 1024, 896>}, {pipeline_mode = #tpu.pipeline_mode<synchronous>, transform_indices = @transform_2, window_bounds = array<i64: 1, 896>}, {pipeline_mode = #tpu.pipeline_mode<synchronous>, transform_indices = @transform_3, window_bounds = array<i64: 896, 896>}, {pipeline_mode = #tpu.pipeline_mode<synchronous>, transform_indices = @transform_4, window_bounds = array<i64: 1, 896>}, {pipeline_mode = #tpu.pipeline_mode<synchronous>, transform_indices = @transform_5, window_bounds = array<i64: 896, 128>}, {pipeline_mode = #tpu.pipeline_mode<synchronous>, transform_indices = @transform_6, window_bounds = array<i64: 1, 128>}, {pipeline_mode = #tpu.pipeline_mode<synchronous>, transform_indices = @transform_7, window_bounds = array<i64: 128, 128>}, {pipeline_mode = #tpu.pipeline_mode<synchronous>, transform_indices = @transform_8, window_bounds = array<i64: 1, 128>}, {transform_indices = @transform_9, window_bounds = array<i64: 8, 128>}]} {
    %c0 = arith.constant 0 : index
    %c0_0 = arith.constant 0 : index
    %0 = vector.load %arg1[%c0, %c0_0] : memref<8x1024xf32, #tpu.memory_space<vmem>>, vector<8x1024xf32>
    %1 = arith.truncf %0 : vector<8x1024xf32> to vector<8x1024xbf16>
    %c0_1 = arith.constant 0 : index
    %c0_2 = arith.constant 0 : index
    %2 = vector.load %arg2[%c0_1, %c0_2] : memref<1024x896xbf16, #tpu.memory_space<vmem>>, vector<1024x896xbf16>
    %cst = arith.constant dense<0.000000e+00> : vector<8x896xf32>
    %3 = tpu.matmul %1, %2, %cst {dimension_numbers = #tpu.dot_dimension_numbers<[1], [0], [0], [1], [0, 0, 1, 1], [], []>} : vector<8x1024xbf16>, vector<1024x896xbf16>, vector<8x896xf32> -> vector<8x896xf32>
    %c0_3 = arith.constant 0 : index
    %c0_4 = arith.constant 0 : index
    %4 = vector.load %arg3[%c0_3, %c0_4] : memref<1x896xf32, #tpu.memory_space<vmem>>, vector<1x896xf32>
    %5 = vector.broadcast %4 : vector<1x896xf32> to vector<8x896xf32>
    %6 = arith.addf %3, %5 : vector<8x896xf32>
    %cst_5 = arith.constant 0.000000e+00 : f32
    %7 = vector.broadcast %cst_5 : f32 to vector<8x896xf32>
    %8 = arith.maximumf %6, %7 : vector<8x896xf32>
    %9 = arith.truncf %8 : vector<8x896xf32> to vector<8x896xbf16>
    %c0_6 = arith.constant 0 : index
    %c0_7 = arith.constant 0 : index
    %10 = vector.load %arg4[%c0_6, %c0_7] : memref<896x896xbf16, #tpu.memory_space<vmem>>, vector<896x896xbf16>
    %cst_8 = arith.constant dense<0.000000e+00> : vector<8x896xf32>
    %11 = tpu.matmul %9, %10, %cst_8 {dimension_numbers = #tpu.dot_dimension_numbers<[1], [0], [0], [1], [0, 0, 1, 1], [], []>} : vector<8x896xbf16>, vector<896x896xbf16>, vector<8x896xf32> -> vector<8x896xf32>
    %c0_9 = arith.constant 0 : index
    %c0_10 = arith.constant 0 : index
    %12 = vector.load %arg5[%c0_9, %c0_10] : memref<1x896xf32, #tpu.memory_space<vmem>>, vector<1x896xf32>
    %13 = vector.broadcast %12 : vector<1x896xf32> to vector<8x896xf32>
    %14 = arith.addf %11, %13 : vector<8x896xf32>
    %cst_11 = arith.constant 0.000000e+00 : f32
    %15 = vector.broadcast %cst_11 : f32 to vector<8x896xf32>
    %16 = arith.maximumf %14, %15 : vector<8x896xf32>
    %17 = arith.truncf %16 : vector<8x896xf32> to vector<8x896xbf16>
    %c0_12 = arith.constant 0 : index
    %c0_13 = arith.constant 0 : index
    %18 = vector.load %arg6[%c0_12, %c0_13] : memref<896x128xbf16, #tpu.memory_space<vmem>>, vector<896x128xbf16>
    %cst_14 = arith.constant dense<0.000000e+00> : vector<8x128xf32>
    %19 = tpu.matmul %17, %18, %cst_14 {dimension_numbers = #tpu.dot_dimension_numbers<[1], [0], [0], [1], [0, 0, 1, 1], [], []>} : vector<8x896xbf16>, vector<896x128xbf16>, vector<8x128xf32> -> vector<8x128xf32>
    %c0_15 = arith.constant 0 : index
    %c0_16 = arith.constant 0 : index
    %20 = vector.load %arg7[%c0_15, %c0_16] : memref<1x128xf32, #tpu.memory_space<vmem>>, vector<1x128xf32>
    %21 = vector.broadcast %20 : vector<1x128xf32> to vector<8x128xf32>
    %22 = arith.addf %19, %21 : vector<8x128xf32>
    %cst_17 = arith.constant 0.000000e+00 : f32
    %23 = vector.broadcast %cst_17 : f32 to vector<8x128xf32>
    %24 = arith.maximumf %22, %23 : vector<8x128xf32>
    %25 = arith.truncf %24 : vector<8x128xf32> to vector<8x128xbf16>
    %c0_18 = arith.constant 0 : index
    %c0_19 = arith.constant 0 : index
    %26 = vector.load %arg8[%c0_18, %c0_19] : memref<128x128xbf16, #tpu.memory_space<vmem>>, vector<128x128xbf16>
    %cst_20 = arith.constant dense<0.000000e+00> : vector<8x128xf32>
    %27 = tpu.matmul %25, %26, %cst_20 {dimension_numbers = #tpu.dot_dimension_numbers<[1], [0], [0], [1], [0, 0, 1, 1], [], []>} : vector<8x128xbf16>, vector<128x128xbf16>, vector<8x128xf32> -> vector<8x128xf32>
    %c0_21 = arith.constant 0 : index
    %c0_22 = arith.constant 0 : index
    %28 = vector.load %arg9[%c0_21, %c0_22] : memref<1x128xf32, #tpu.memory_space<vmem>>, vector<1x128xf32>
    %29 = vector.broadcast %28 : vector<1x128xf32> to vector<8x128xf32>
    %30 = arith.addf %27, %29 : vector<8x128xf32>
    %c0_23 = arith.constant 0 : index
    %c0_24 = arith.constant 0 : index
    %31 = vector.load %arg10[%c0_23, %c0_24] : memref<8x128xf32, #tpu.memory_space<vmem>>, vector<8x128xf32>
    tpu.vector_store %arg10[%c0_23, %c0_24], %30 {strides = array<i32>} : memref<8x128xf32, #tpu.memory_space<vmem>>, vector<8x128xf32>,
    return
  }
  func.func @transform_0(%arg0: i32) -> (i32, i32) {
    %c0_i32 = arith.constant 0 : i32
    %c0_i32_0 = arith.constant 0 : i32
    return %arg0, %c0_i32 : i32, i32
  }
  func.func @transform_1(%arg0: i32) -> (i32, i32) {
    %c0_i32 = arith.constant 0 : i32
    %c0_i32_0 = arith.constant 0 : i32
    %c0_i32_1 = arith.constant 0 : i32
    return %c0_i32, %c0_i32_0 : i32, i32
  }
  func.func @transform_2(%arg0: i32) -> (i32, i32) {
    %c0_i32 = arith.constant 0 : i32
    %c0_i32_0 = arith.constant 0 : i32
    %c0_i32_1 = arith.constant 0 : i32
    return %c0_i32, %c0_i32_0 : i32, i32
  }
  func.func @transform_3(%arg0: i32) -> (i32, i32) {
    %c0_i32 = arith.constant 0 : i32
    %c0_i32_0 = arith.constant 0 : i32
    %c0_i32_1 = arith.constant 0 : i32
    return %c0_i32, %c0_i32_0 : i32, i32
  }
  func.func @transform_4(%arg0: i32) -> (i32, i32) {
    %c0_i32 = arith.constant 0 : i32
    %c0_i32_0 = arith.constant 0 : i32
    %c0_i32_1 = arith.constant 0 : i32
    return %c0_i32, %c0_i32_0 : i32, i32
  }
  func.func @transform_5(%arg0: i32) -> (i32, i32) {
    %c0_i32 = arith.constant 0 : i32
    %c0_i32_0 = arith.constant 0 : i32
    %c0_i32_1 = arith.constant 0 : i32
    return %c0_i32, %c0_i32_0 : i32, i32
  }
  func.func @transform_6(%arg0: i32) -> (i32, i32) {
    %c0_i32 = arith.constant 0 : i32
    %c0_i32_0 = arith.constant 0 : i32
    %c0_i32_1 = arith.constant 0 : i32
    return %c0_i32, %c0_i32_0 : i32, i32
  }
  func.func @transform_7(%arg0: i32) -> (i32, i32) {
    %c0_i32 = arith.constant 0 : i32
    %c0_i32_0 = arith.constant 0 : i32
    %c0_i32_1 = arith.constant 0 : i32
    return %c0_i32, %c0_i32_0 : i32, i32
  }
  func.func @transform_8(%arg0: i32) -> (i32, i32) {
    %c0_i32 = arith.constant 0 : i32
    %c0_i32_0 = arith.constant 0 : i32
    %c0_i32_1 = arith.constant 0 : i32
    return %c0_i32, %c0_i32_0 : i32, i32
  }
  func.func @transform_9(%arg0: i32) -> (i32, i32) {
    %c0_i32 = arith.constant 0 : i32
    %c0_i32_0 = arith.constant 0 : i32
    return %arg0, %c0_i32 : i32, i32
  }
}

</mosaic_0001>

<bundles_post_ra>
// kernel: dqn_agent_forward.1
= control target key start
LH: loop header
LB: loop body
LE: loop exit
PB: predicated region body
PF: predicated region fallthrough
CT: control target
= control target key end

     0   :  { %14 = vsyncpa [#allocation3], 0  ;;  %s10730_s0 = inlined_call_operand.vmem [shape: f32[8,1024], index: 0, kind: input, shape index: {}]   ;;  %s10731_s1 = inlined_call_operand.hbm [shape: bf16[1024,896], index: 1, kind: input, shape index: {}]   ;;  %s10732_s2 = inlined_call_operand.hbm [shape: f32[1,896], index: 2, kind: input, shape index: {}]   ;;  %s10733_s3 = inlined_call_operand.hbm [shape: bf16[896,896], index: 3, kind: input, shape index: {}]   ;;  %s10734_s4 = inlined_call_operand.hbm [shape: f32[1,896], index: 4, kind: input, shape index: {}]   ;;  %s10735_s5 = inlined_call_operand.hbm [shape: bf16[896,128], index: 5, kind: input, shape index: {}]   ;;  %s10736_s6 = inlined_call_operand.hbm [shape: f32[1,128], index: 6, kind: input, shape index: {}]   ;;  %s10737_s7 = inlined_call_operand.hbm [shape: bf16[128,128], index: 7, kind: input, shape index: {}]   ;;  %s10738_s8 = inlined_call_operand.hbm [shape: f32[1,128], index: 8, kind: input, shape index: {}]   ;;  %s10739_s9 = inlined_call_operand.vmem [shape: f32[8,128], index: 9, kind: output, shape index: {}]  }
   0x1   :  { %15 = vsyncpa [#allocation5], 0 }
   0x2   :  { %16 = vsyncpa [#allocation8], 0 }
   0x3   :  { %17 = vsyncpa [#allocation11], 0 }
   0x4   :  { %18 = vsyncpa [#allocation14], 0  ;;  %s10337_s30 = smov [#allocation4]   ;;  %s10338_s11 = smov [#allocation7]  }
   0x5   :  { %s39_s10 = sshll.u32 %s10337_s30, 4  ;;  %s61_s12 = sshll.u32 %s10338_s11, 4  ;;  %s40_s10 = int_to_ptr.vmem [resolvable:$true] %s39_s10  ;;  %s62_s12 = int_to_ptr.vmem [resolvable:$true] %s61_s12 }
   0x6   :  { %s10151_s15 = scalar_lea.hbm %s10732_s2, 112 }
   0x7   :  { %p10152_p0 = scmp.ne.s32.totalorder %s10732_s2, %s10151_s15  ;;  %p10155_p1 = scmp.lt.u32.totalorder %s10151_s15, %s10732_s2 }
   0x9   :  { %p10157_p2 = pnand %p10155_p1, %p10152_p0 }
   0xb   :  { %10160 = shalt.err (!%p10157_p2)
}
   0xc   :  { %s10161_s20 = scalar_lea.vmem %s40_s10, 112  ;;  %s10165_s21 = scalar_lea.vmem %s40_s10, 128 }
   0xd   :  { %p10162_p3 = scmp.ne.s32.totalorder %s40_s10, %s10161_s20  ;;  %p10166_p4 = scmp.lt.s32.totalorder %s40_s10, %s40_s10 }
   0xe   :  { %p10167_p5 = scmp.lt.s32.totalorder %s10165_s21, %s10161_s20 }
  0x10   :  { %p10168_p6 = por %p10167_p5, %p10166_p4 }
  0x12   :  { %p10169_p7 = pnand %p10168_p6, %p10162_p3 }
  0x14   :  { %10172 = shalt.err (!%p10169_p7)
}
  0x15   :  { %42 = dma.hbm_to_vmem [thread:$0]  %s10732_s2, 112, %s40_s10, [#allocation5]  }
  0x16   :  { %s10173_s26 = scalar_lea.hbm %s10734_s4, 112 }
  0x17   :  { %p10174_p8 = scmp.ne.s32.totalorder %s10734_s4, %s10173_s26  ;;  %p10177_p9 = scmp.lt.u32.totalorder %s10173_s26, %s10734_s4 }
  0x19   :  { %p10179_p10 = pnand %p10177_p9, %p10174_p8 }
  0x1b   :  { %10182 = shalt.err (!%p10179_p10)
}
  0x1c   :  { %s10183_s11 = scalar_lea.vmem %s62_s12, 112  ;;  %s10187_s13 = scalar_lea.vmem %s62_s12, 128 }
  0x1d   :  { %p10184_p11 = scmp.ne.s32.totalorder %s62_s12, %s10183_s11  ;;  %p10188_p12 = scmp.lt.s32.totalorder %s62_s12, %s62_s12 }
  0x1e   :  { %p10189_p13 = scmp.lt.s32.totalorder %s10187_s13, %s10183_s11 }
  0x20   :  { %p10190_p0 = por %p10189_p13, %p10188_p12 }
  0x22   :  { %p10191_p1 = pnand %p10190_p0, %p10184_p11 }
  0x24   :  { %10194 = shalt.err (!%p10191_p1)
}
  0x25   :  { %64 = dma.hbm_to_vmem [thread:$0]  %s10734_s4, 112, %s62_s12, [#allocation8]  }
  0x26   :  { %s10339_s14 = smov [#allocation10]   ;;  %s10340_s16 = smov [#allocation2]  }
  0x27   :  { %s83_s15 = sshll.u32 %s10339_s14, 4  ;;  %s26_s17 = sshll.u32 %s10340_s16, 4  ;;  %s84_s15 = int_to_ptr.vmem [resolvable:$true] %s83_s15  ;;  %s10426_s17 = int_to_ptr.vmem [resolvable:$true] %s26_s17 }
  0x28   :  { %s10195_s20 = scalar_lea.hbm %s10736_s6, 16 }
  0x29   :  { %p10196_p2 = scmp.ne.s32.totalorder %s10736_s6, %s10195_s20  ;;  %p10199_p3 = scmp.lt.u32.totalorder %s10195_s20, %s10736_s6 }
  0x2b   :  { %p10201_p4 = pnand %p10199_p3, %p10196_p2 }
  0x2d   :  { %10204 = shalt.err (!%p10201_p4)
}
  0x2e   :  { %s10205_s4 = scalar_lea.vmem %s84_s15, 16  ;;  %s10209_s12 = scalar_lea.vmem %s84_s15, 32 }
  0x2f   :  { %p10206_p5 = scmp.ne.s32.totalorder %s84_s15, %s10205_s4  ;;  %p10210_p6 = scmp.lt.s32.totalorder %s84_s15, %s84_s15 }
  0x30   :  { %p10211_p7 = scmp.lt.s32.totalorder %s10209_s12, %s10205_s4 }
  0x32   :  { %p10212_p8 = por %p10211_p7, %p10210_p6 }
  0x34   :  { %p10213_p9 = pnand %p10212_p8, %p10206_p5 }
  0x36   :  { %10216 = shalt.err (!%p10213_p9)
}
  0x37   :  { %86 = dma.hbm_to_vmem [thread:$0]  %s10736_s6, 16, %s84_s15, [#allocation11]  }
  0x38   :  { %s10217_s29 = scalar_lea.hbm %s10731_s1, 57344 }
  0x39   :  { %p10218_p10 = scmp.ne.s32.totalorder %s10731_s1, %s10217_s29  ;;  %p10221_p11 = scmp.lt.u32.totalorder %s10217_s29, %s10731_s1 }
  0x3b   :  { %p10223_p12 = pnand %p10221_p11, %p10218_p10 }
  0x3d   :  { %10226 = shalt.err (!%p10223_p12)
}
  0x3e   :  { %s10227_s10 = scalar_lea.vmem %s10426_s17, 57344  ;;  %p10232_p0 = scmp.lt.s32.totalorder %s10426_s17, %s10426_s17 }
  0x3f   :  { %p10228_p13 = scmp.ne.s32.totalorder %s10426_s17, %s10227_s10  ;;  %p10233_p1 = scmp.lt.s32.totalorder %s10227_s10, %s10227_s10 }
  0x41   :  { %p10234_p2 = por %p10233_p1, %p10232_p0 }
  0x43   :  { %p10235_p3 = pnand %p10234_p2, %p10228_p13 }
  0x45   :  { %10238 = shalt.err (!%p10235_p3)
}
  0x46   :  { %s10341_s6 = smov 448   ;;  %s10342_s14 = smov 28  }
  0x47   :  { %32 = dma.hbm_to_vmem [thread:$0]  %s10731_s1, 57344, %s10426_s17, [#allocation3], %s10341_s6, %s10341_s6, %s10342_s14  }
  0x48   :  { %s10343_s18 = smov [#allocation6]   ;;  %s10344_s20 = smov [#allocation9]  }
  0x49   :  { %s48_s19 = sshll.u32 %s10343_s18, 4  ;;  %s70_s21 = sshll.u32 %s10344_s20, 4  ;;  %s49_s19 = int_to_ptr.vmem [resolvable:$true] %s48_s19  ;;  %s10457_s21 = int_to_ptr.vmem [resolvable:$true] %s70_s21 }
  0x4a   :  { %s10239_s24 = scalar_lea.hbm %s10733_s3, 50176 }
  0x4b   :  { %p10240_p4 = scmp.ne.s32.totalorder %s10733_s3, %s10239_s24  ;;  %p10243_p5 = scmp.lt.u32.totalorder %s10239_s24, %s10733_s3 }
  0x4d   :  { %p10245_p6 = pnand %p10243_p5, %p10240_p4 }
  0x4f   :  { %10248 = shalt.err (!%p10245_p6)
}
  0x50   :  { %s10249_s1 = scalar_lea.vmem %s49_s19, 50176  ;;  %p10254_p8 = scmp.lt.s32.totalorder %s49_s19, %s49_s19 }
  0x51   :  { %p10250_p7 = scmp.ne.s32.totalorder %s49_s19, %s10249_s1  ;;  %p10255_p9 = scmp.lt.s32.totalorder %s10249_s1, %s10249_s1 }
  0x53   :  { %p10256_p10 = por %p10255_p9, %p10254_p8 }
  0x55   :  { %p10257_p11 = pnand %p10256_p10, %p10250_p7 }
  0x57   :  { %10260 = shalt.err (!%p10257_p11)
}
  0x58   :  { %54 = dma.hbm_to_vmem [thread:$0]  %s10733_s3, 50176, %s49_s19, [#allocation5], %s10341_s6, %s10341_s6, %s10342_s14  }
  0x59   :  { %s10261_s30 = scalar_lea.hbm %s10735_s5, 7168 }
  0x5a   :  { %p10262_p12 = scmp.ne.s32.totalorder %s10735_s5, %s10261_s30  ;;  %p10265_p13 = scmp.lt.u32.totalorder %s10261_s30, %s10735_s5 }
  0x5c   :  { %p10267_p0 = pnand %p10265_p13, %p10262_p12 }
  0x5e   :  { %10270 = shalt.err (!%p10267_p0)
}
  0x5f   :  { %s10271_s15 = scalar_lea.vmem %s10457_s21, 7168  ;;  %p10276_p2 = scmp.lt.s32.totalorder %s10457_s21, %s10457_s21 }
  0x60   :  { %p10272_p1 = scmp.ne.s32.totalorder %s10457_s21, %s10271_s15  ;;  %p10277_p3 = scmp.lt.s32.totalorder %s10271_s15, %s10271_s15 }
  0x62   :  { %p10278_p4 = por %p10277_p3, %p10276_p2 }
  0x64   :  { %p10279_p5 = pnand %p10278_p4, %p10272_p1 }
  0x66   :  { %10282 = shalt.err (!%p10279_p5)
}
  0x67   :  { %s10345_s3 = smov 64   ;;  %s10346_s6 = smov 4  }
  0x68   :  { %76 = dma.hbm_to_vmem [thread:$0]  %s10735_s5, 7168, %s10457_s21, [#allocation8], %s10345_s3, %s10345_s3, %s10346_s6  }
  0x69   :  { %s10347_s18 = smov [#allocation12]   ;;  %s10348_s20 = smov [#allocation13]  }
  0x6a   :  { %s92_s19 = sshll.u32 %s10347_s18, 4  ;;  %s105_s22 = sshll.u32 %s10348_s20, 4  ;;  %s93_s19 = int_to_ptr.vmem [resolvable:$true] %s92_s19  ;;  %s106_s22 = int_to_ptr.vmem [resolvable:$true] %s105_s22 }
  0x6b   :  { %s10283_s4 = scalar_lea.hbm %s10737_s7, 1024 }
  0x6c   :  { %p10284_p6 = scmp.ne.s32.totalorder %s10737_s7, %s10283_s4  ;;  %p10287_p7 = scmp.lt.u32.totalorder %s10283_s4, %s10737_s7 }
  0x6e   :  { %p10289_p8 = pnand %p10287_p7, %p10284_p6 }
  0x70   :  { %10292 = shalt.err (!%p10289_p8)
}
  0x71   :  { %s10293_s5 = scalar_lea.vmem %s93_s19, 1024  ;;  %p10298_p10 = scmp.lt.s32.totalorder %s93_s19, %s93_s19 }
  0x72   :  { %p10294_p9 = scmp.ne.s32.totalorder %s93_s19, %s10293_s5  ;;  %p10299_p11 = scmp.lt.s32.totalorder %s10293_s5, %s10293_s5 }
  0x74   :  { %p10300_p12 = por %p10299_p11, %p10298_p10 }
  0x76   :  { %p10301_p13 = pnand %p10300_p12, %p10294_p9 }
  0x78   :  { %10304 = shalt.err (!%p10301_p13)
}
  0x79   :  { %98 = dma.hbm_to_vmem [thread:$0]  %s10737_s7, 1024, %s93_s19, [#allocation11], %s10345_s3, %s10345_s3, %s10346_s6  }
  0x7a   :  { %s10305_s29 = scalar_lea.hbm %s10738_s8, 16 }
  0x7b   :  { %p10306_p0 = scmp.ne.s32.totalorder %s10738_s8, %s10305_s29  ;;  %p10309_p1 = scmp.lt.u32.totalorder %s10305_s29, %s10738_s8 }
  0x7d   :  { %p10311_p2 = pnand %p10309_p1, %p10306_p0 }
  0x7f   :  { %10314 = shalt.err (!%p10311_p2)
}
  0x80   :  { %s10315_s10 = scalar_lea.vmem %s106_s22, 16  ;;  %s10319_s15 = scalar_lea.vmem %s106_s22, 32 }
  0x81   :  { %p10316_p3 = scmp.ne.s32.totalorder %s106_s22, %s10315_s10  ;;  %p10320_p4 = scmp.lt.s32.totalorder %s106_s22, %s106_s22 }
  0x82   :  { %p10321_p5 = scmp.lt.s32.totalorder %s10319_s15, %s10315_s10 }
  0x84   :  { %p10322_p6 = por %p10321_p5, %p10320_p4 }
  0x86   :  { %p10323_p7 = pnand %p10322_p6, %p10316_p3 }
  0x88   :  { %10326 = shalt.err (!%p10323_p7)
}
  0x89   :  { %108 = dma.hbm_to_vmem [thread:$0]  %s10738_s8, 16, %s106_s22, [#allocation14]  }
  0x8a   :  { %10327 = dma.done.wait [#allocation3], 57344  }
  0x8b   :  { %10328 = vsyncadd [#allocation3], 4294909952 }
  0x8c   :  { %10329 = dma.done.wait [#allocation5], 50288  }
  0x8d   :  { %10330 = vsyncadd [#allocation5], 4294917008 }
  0x8e   :  { %10331 = dma.done.wait [#allocation8], 7280  }
  0x8f   :  { %10332 = vsyncadd [#allocation8], 4294960016 }
  0x90   :  { %10333 = dma.done.wait [#allocation11], 1040  }
  0x91   :  { %10334 = vsyncadd [#allocation11], 4294966256 }
  0x92   :  { %10335 = dma.done.wait [#allocation14], 16  }
  0x93   :  { %10336 = vsyncadd [#allocation14], 4294967280  ;;  %v8886_v0 = vld [vmem:[#allocation2 + $0x4] ss:$28 sps:$4 sm:$0xff]   ;;  %v8888_v1 = vld [vmem:[#allocation2 + $0xc] ss:$28 sps:$4 sm:$0xff]  }
  0x94   :  { %3003 = vmatprep.subr.bf16.mxu0 %v8886_v0  ;;  %v8890_v2 = vld [vmem:[#allocation2] ss:$28 sps:$4 sm:$0xff]   ;;  %v8891_v3 = vld [vmem:[#allocation2 + $0x8] ss:$28 sps:$4 sm:$0xff]   ;;  %3167 = vmatprep.subr.bf16.mxu1 %v8888_v1  ;;  %v8896_v6 = vld [vmem:[#allocation2 + $0x38] ss:$28 sps:$4 sm:$0xff]  }
  0x95   :  { %v8892_v4 = vld [vmem:[#allocation2 + $0x3c] ss:$28 sps:$4 sm:$0xff]   ;;  %3004 = vmatpush1.bf16.msra.mxu0 %v8890_v2  ;;  %3168 = vmatpush1.bf16.msra.mxu1 %v8891_v3  ;;  %v8894_v5 = vld [vmem:[#allocation2 + $0x44] ss:$28 sps:$4 sm:$0xff]   ;;  %v8898_v8 = vld [vmem:[#allocation2 + $0x74] ss:$28 sps:$4 sm:$0xff]  }
  0x96   :  { %3005 = vmatprep.subr.bf16.mxu0 %v8892_v4  ;;  %v8897_v7 = vld [vmem:[#allocation2 + $0x40] ss:$28 sps:$4 sm:$0xff]   ;;  %3169 = vmatprep.subr.bf16.mxu1 %v8894_v5  ;;  %v8902_v10 = vld [vmem:[#allocation2 + $0x70] ss:$28 sps:$4 sm:$0xff]   ;;  %v8903_v11 = vld [vmem:[#allocation2 + $0x78] ss:$28 sps:$4 sm:$0xff]  }
  0x97   :  { %v8900_v9 = vld [vmem:[#allocation2 + $0x7c] ss:$28 sps:$4 sm:$0xff]   ;;  %v8904_v12 = vld [vmem:[#allocation2 + $0xac] ss:$28 sps:$4 sm:$0xff]   ;;  %v8906_v13 = vld [vmem:[#allocation2 + $0xb4] ss:$28 sps:$4 sm:$0xff]  }
  0x98   :  { %v8908_v14 = vld [vmem:[#allocation2 + $0xa8] ss:$28 sps:$4 sm:$0xff]   ;;  %v8909_v15 = vld [vmem:[#allocation2 + $0xb0] ss:$28 sps:$4 sm:$0xff]   ;;  %v8914_v18 = vld [vmem:[#allocation2 + $0xe0] ss:$28 sps:$4 sm:$0xff]  }
  0x99   :  { %3006 = vmatpush1.bf16.msra.mxu0 %v8896_v6  ;;  %3170 = vmatpush1.bf16.msra.mxu1 %v8897_v7  ;;  %v8910_v16 = vld [vmem:[#allocation2 + $0xe4] ss:$28 sps:$4 sm:$0xff]   ;;  %v8912_v17 = vld [vmem:[#allocation2 + $0xec] ss:$28 sps:$4 sm:$0xff]   ;;  %v8916_v20 = vld [vmem:[#allocation2 + $0x11c] ss:$28 sps:$4 sm:$0xff]  }
  0x9a   :  { %3007 = vmatprep.subr.bf16.mxu0 %v8898_v8  ;;  %3171 = vmatprep.subr.bf16.mxu1 %v8900_v9  ;;  %v8915_v19 = vld [vmem:[#allocation2 + $0xe8] ss:$28 sps:$4 sm:$0xff]   ;;  %v8920_v22 = vld [vmem:[#allocation2 + $0x118] ss:$28 sps:$4 sm:$0xff]   ;;  %v8921_v23 = vld [vmem:[#allocation2 + $0x120] ss:$28 sps:$4 sm:$0xff]  }
  0x9b   :  { %v8918_v21 = vld [vmem:[#allocation2 + $0x124] ss:$28 sps:$4 sm:$0xff]   ;;  %v8922_v24 = vld [vmem:[#allocation2 + $0x154] ss:$28 sps:$4 sm:$0xff]   ;;  %v8924_v25 = vld [vmem:[#allocation2 + $0x15c] ss:$28 sps:$4 sm:$0xff]  }
  0x9c   :  { %v8926_v26 = vld [vmem:[#allocation2 + $0x150] ss:$28 sps:$4 sm:$0xff]   ;;  %v8927_v27 = vld [vmem:[#allocation2 + $0x158] ss:$28 sps:$4 sm:$0xff]   ;;  %v8932_v30 = vld [vmem:[#allocation2 + $0x188] ss:$28 sps:$4 sm:$0xff]  }
  0x9d   :  { %3008 = vmatpush1.bf16.msra.mxu0 %v8902_v10  ;;  %3172 = vmatpush1.bf16.msra.mxu1 %v8903_v11  ;;  %v8928_v28 = vld [vmem:[#allocation2 + $0x18c] ss:$28 sps:$4 sm:$0xff]   ;;  %v8930_v29 = vld [vmem:[#allocation2 + $0x194] ss:$28 sps:$4 sm:$0xff]   ;;  %v8934_v32 = vld [vmem:[#allocation2 + $0x1c4] ss:$28 sps:$4 sm:$0xff]  }
  0x9e   :  { %3009 = vmatprep.subr.bf16.mxu0 %v8904_v12  ;;  %3173 = vmatprep.subr.bf16.mxu1 %v8906_v13  ;;  %v8933_v31 = vld [vmem:[#allocation2 + $0x190] ss:$28 sps:$4 sm:$0xff]   ;;  %v8938_v34 = vld [vmem:[#allocation2 + $0x1c0] ss:$28 sps:$4 sm:$0xff]   ;;  %v8939_v35 = vld [vmem:[#allocation2 + $0x1c8] ss:$28 sps:$4 sm:$0xff]  }
  0x9f   :  { %v8936_v33 = vld [vmem:[#allocation2 + $0x1cc] ss:$28 sps:$4 sm:$0xff]   ;;  %v8940_v36 = vld [vmem:[#allocation2 + $0x1fc] ss:$28 sps:$4 sm:$0xff]   ;;  %v8942_v37 = vld [vmem:[#allocation2 + $0x204] ss:$28 sps:$4 sm:$0xff]  }
  0xa0   :  { %v8944_v38 = vld [vmem:[#allocation2 + $0x1f8] ss:$28 sps:$4 sm:$0xff]   ;;  %v8945_v39 = vld [vmem:[#allocation2 + $0x200] ss:$28 sps:$4 sm:$0xff]   ;;  %v8950_v42 = vld [vmem:[#allocation2 + $0x230] ss:$28 sps:$4 sm:$0xff]  }
  0xa1   :  { %3010 = vmatpush1.bf16.msra.mxu0 %v8908_v14  ;;  %3174 = vmatpush1.bf16.msra.mxu1 %v8909_v15  ;;  %v8946_v40 = vld [vmem:[#allocation2 + $0x234] ss:$28 sps:$4 sm:$0xff]   ;;  %v8948_v41 = vld [vmem:[#allocation2 + $0x23c] ss:$28 sps:$4 sm:$0xff]   ;;  %v8952_v44 = vld [vmem:[#allocation2 + $0x26c] ss:$28 sps:$4 sm:$0xff]  }
  0xa2   :  { %3011 = vmatprep.subr.bf16.mxu0 %v8910_v16  ;;  %3175 = vmatprep.subr.bf16.mxu1 %v8912_v17  ;;  %v8951_v43 = vld [vmem:[#allocation2 + $0x238] ss:$28 sps:$4 sm:$0xff]   ;;  %v135_v46 = vld [vmem:[%s10730_s0 + $0x8] sm:$0xff]  ;;  %v8958_v50 = vld [vmem:[#allocation2 + $0x2a4] ss:$28 sps:$4 sm:$0xff]   ;;  %vm10351_vm0 = vmmov 0  }
  0xa3   :  { %v8954_v45 = vld [vmem:[#allocation2 + $0x274] ss:$28 sps:$4 sm:$0xff]   ;;  %v8956_v47 = vld [vmem:[#allocation2 + $0x268] ss:$28 sps:$4 sm:$0xff]   ;;  %v10515_v48 = vpack.c.bf16 %v135_v46, %v135_v46  ;;  %v8962_v52 = vld [vmem:[#allocation2 + $0x2a0] ss:$28 sps:$4 sm:$0xff]  }
  0xa4   :  { %v8957_v49 = vld [vmem:[#allocation2 + $0x270] ss:$28 sps:$4 sm:$0xff]   ;;  %v8963_v53 = vld [vmem:[#allocation2 + $0x2a8] ss:$28 sps:$4 sm:$0xff]   ;;  %v8964_v54 = vld [vmem:[#allocation2 + $0x2dc] ss:$28 sps:$4 sm:$0xff]  }
  0xa5   :  { %3012 = vmatpush1.bf16.msra.mxu0 %v8914_v18  ;;  %3176 = vmatpush1.bf16.msra.mxu1 %v8915_v19  ;;  %v8960_v51 = vld [vmem:[#allocation2 + $0x2ac] ss:$28 sps:$4 sm:$0xff]   ;;  %v8966_v55 = vld [vmem:[#allocation2 + $0x2e4] ss:$28 sps:$4 sm:$0xff]   ;;  %v8968_v56 = vld [vmem:[#allocation2 + $0x2d8] ss:$28 sps:$4 sm:$0xff]  }
  0xa6   :  { %3013 = vmatprep.subr.bf16.mxu0 %v8916_v20  ;;  %3177 = vmatprep.subr.bf16.mxu1 %v8918_v21  ;;  %v8969_v57 = vld [vmem:[#allocation2 + $0x2e0] ss:$28 sps:$4 sm:$0xff]   ;;  %v8970_v58 = vld [vmem:[#allocation2 + $0x314] ss:$28 sps:$4 sm:$0xff]   ;;  %v8976_v62 = vld [vmem:[#allocation2 + $0x34c] ss:$28 sps:$4 sm:$0xff]  }
  0xa7   :  { %3035 = vmatprep.mubr.bf16.mxu0 %v10515_v48  ;;  %3199 = vmatprep.mubr.bf16.mxu1 %v10515_v48  ;;  %v8972_v59 = vld [vmem:[#allocation2 + $0x31c] ss:$28 sps:$4 sm:$0xff]   ;;  %v8974_v60 = vld [vmem:[#allocation2 + $0x310] ss:$28 sps:$4 sm:$0xff]   ;;  %v8980_v0 = vld [vmem:[#allocation2 + $0x348] ss:$28 sps:$4 sm:$0xff]  }
  0xa8   :  { %v8975_v61 = vld [vmem:[#allocation2 + $0x318] ss:$28 sps:$4 sm:$0xff]   ;;  %v8981_v1 = vld [vmem:[#allocation2 + $0x350] ss:$28 sps:$4 sm:$0xff]   ;;  %v134_v2 = vld [vmem:[%s10730_s0] sm:$0xff] }
  0xa9   :  { %3014 = vmatpush1.bf16.msra.mxu0 %v8920_v22  ;;  %3178 = vmatpush1.bf16.msra.mxu1 %v8921_v23  ;;  %v8978_v63 = vld [vmem:[#allocation2 + $0x354] ss:$28 sps:$4 sm:$0xff]   ;;  %v8984_v3 = vld [vmem:[#allocation2 + $0x384] ss:$28 sps:$4 sm:$0xff]   ;;  %v8987_v4 = vld [vmem:[#allocation2 + $0x38c] ss:$28 sps:$4 sm:$0xff]   ;;  %v10522_v5 = vpack.c.bf16 %v134_v2, %v134_v2 }
  0xaa   :  { %3015 = vmatprep.subr.bf16.mxu0 %v8922_v24  ;;  %3179 = vmatprep.subr.bf16.mxu1 %v8924_v25  ;;  %v8982_v6 = vld [vmem:[#allocation2 + $0x380] ss:$28 sps:$4 sm:$0xff]   ;;  %v8985_v7 = vld [vmem:[#allocation2 + $0x388] ss:$28 sps:$4 sm:$0xff]   ;;  %v8988_v10 = vld [vmem:[#allocation2 + $0x3b8] ss:$28 sps:$4 sm:$0xff]  }
  0xab   :  { %v8990_v8 = vld [vmem:[#allocation2 + $0x3bc] ss:$28 sps:$4 sm:$0xff]   ;;  %v8993_v9 = vld [vmem:[#allocation2 + $0x3c4] ss:$28 sps:$4 sm:$0xff]   ;;  %v8996_v12 = vld [vmem:[#allocation2 + $0x3f4] ss:$28 sps:$4 sm:$0xff]  }
  0xac   :  { %v8991_v11 = vld [vmem:[#allocation2 + $0x3c0] ss:$28 sps:$4 sm:$0xff]   ;;  %v8994_v14 = vld [vmem:[#allocation2 + $0x3f0] ss:$28 sps:$4 sm:$0xff]   ;;  %v8997_v15 = vld [vmem:[#allocation2 + $0x3f8] ss:$28 sps:$4 sm:$0xff]  }
  0xad   :  { %3016 = vmatpush1.bf16.msra.mxu0 %v8926_v26  ;;  %3180 = vmatpush1.bf16.msra.mxu1 %v8927_v27  ;;  %v8999_v13 = vld [vmem:[#allocation2 + $0x3fc] ss:$28 sps:$4 sm:$0xff]   ;;  %v9002_v16 = vld [vmem:[#allocation2 + $0x42c] ss:$28 sps:$4 sm:$0xff]   ;;  %v9005_v17 = vld [vmem:[#allocation2 + $0x434] ss:$28 sps:$4 sm:$0xff]  }
  0xae   :  { %3017 = vmatprep.subr.bf16.mxu0 %v8928_v28  ;;  %3181 = vmatprep.subr.bf16.mxu1 %v8930_v29  ;;  %v9000_v18 = vld [vmem:[#allocation2 + $0x428] ss:$28 sps:$4 sm:$0xff]   ;;  %v9003_v19 = vld [vmem:[#allocation2 + $0x430] ss:$28 sps:$4 sm:$0xff]   ;;  %v9006_v22 = vld [vmem:[#allocation2 + $0x460] ss:$28 sps:$4 sm:$0xff]  }
  0xaf   :  { %v9008_v20 = vld [vmem:[#allocation2 + $0x464] ss:$28 sps:$4 sm:$0xff]   ;;  %v9011_v21 = vld [vmem:[#allocation2 + $0x46c] ss:$28 sps:$4 sm:$0xff]   ;;  %v9014_v24 = vld [vmem:[#allocation2 + $0x49c] ss:$28 sps:$4 sm:$0xff]  }
  0xb0   :  { %v9009_v23 = vld [vmem:[#allocation2 + $0x468] ss:$28 sps:$4 sm:$0xff]   ;;  %v9012_v26 = vld [vmem:[#allocation2 + $0x498] ss:$28 sps:$4 sm:$0xff]   ;;  %v9015_v27 = vld [vmem:[#allocation2 + $0x4a0] ss:$28 sps:$4 sm:$0xff]  }
  0xb1   :  { %3018 = vmatpush1.bf16.msra.mxu0 %v8932_v30  ;;  %3182 = vmatpush1.bf16.msra.mxu1 %v8933_v31  ;;  %v9017_v25 = vld [vmem:[#allocation2 + $0x4a4] ss:$28 sps:$4 sm:$0xff]   ;;  %v9020_v28 = vld [vmem:[#allocation2 + $0x4d4] ss:$28 sps:$4 sm:$0xff]   ;;  %v9023_v29 = vld [vmem:[#allocation2 + $0x4dc] ss:$28 sps:$4 sm:$0xff]  }
  0xb2   :  { %3019 = vmatprep.subr.bf16.mxu0 %v8934_v32  ;;  %3183 = vmatprep.subr.bf16.mxu1 %v8936_v33  ;;  %v137_v30 = vld [vmem:[%s10730_s0 + $0x18] sm:$0xff]  ;;  %v9018_v31 = vld [vmem:[#allocation2 + $0x4d0] ss:$28 sps:$4 sm:$0xff]  }
  0xb3   :  { %v10529_v32 = vpack.c.bf16 %v137_v30, %v137_v30  ;;  %v9021_v33 = vld [vmem:[#allocation2 + $0x4d8] ss:$28 sps:$4 sm:$0xff]   ;;  %v9102_v30 = vld [vmem:[#allocation2 + $0x7e0] ss:$28 sps:$4 sm:$0xff]  }
  0xb4   :  { %v9044_v46 = vld [vmem:[#allocation2 + $0x5b4] ss:$28 sps:$4 sm:$0xff]  }
  0xb5   :  { %3020 = vmatpush1.bf16.msra.mxu0 %v8938_v34  ;;  %3184 = vmatpush1.bf16.msra.mxu1 %v8939_v35  ;;  %v9026_v34 = vld [vmem:[#allocation2 + $0x50c] ss:$28 sps:$4 sm:$0xff]   ;;  %v9029_v35 = vld [vmem:[#allocation2 + $0x514] ss:$28 sps:$4 sm:$0xff]  }
  0xb6   :  { %3021 = vmatprep.subr.bf16.mxu0 %v8940_v36  ;;  %3185 = vmatprep.subr.bf16.mxu1 %v8942_v37  ;;  %v9024_v36 = vld [vmem:[#allocation2 + $0x508] ss:$28 sps:$4 sm:$0xff]   ;;  %v9027_v37 = vld [vmem:[#allocation2 + $0x510] ss:$28 sps:$4 sm:$0xff]   ;;  %v9069_v2 = vld [vmem:[#allocation2 + $0x698] ss:$28 sps:$4 sm:$0xff]  }
  0xb9   :  { %3022 = vmatpush1.bf16.msra.mxu0 %v8944_v38  ;;  %3186 = vmatpush1.bf16.msra.mxu1 %v8945_v39  ;;  %v9032_v38 = vld [vmem:[#allocation2 + $0x544] ss:$28 sps:$4 sm:$0xff]   ;;  %v9035_v39 = vld [vmem:[#allocation2 + $0x54c] ss:$28 sps:$4 sm:$0xff]  }
  0xba   :  { %3023 = vmatprep.subr.bf16.mxu0 %v8946_v40  ;;  %3187 = vmatprep.subr.bf16.mxu1 %v8948_v41  ;;  %v9030_v40 = vld [vmem:[#allocation2 + $0x540] ss:$28 sps:$4 sm:$0xff]   ;;  %v9033_v41 = vld [vmem:[#allocation2 + $0x548] ss:$28 sps:$4 sm:$0xff]  }
  0xbd   :  { %3024 = vmatpush1.bf16.msra.mxu0 %v8950_v42  ;;  %3188 = vmatpush1.bf16.msra.mxu1 %v8951_v43  ;;  %v9038_v42 = vld [vmem:[#allocation2 + $0x57c] ss:$28 sps:$4 sm:$0xff]   ;;  %v9041_v43 = vld [vmem:[#allocation2 + $0x584] ss:$28 sps:$4 sm:$0xff]  }
  0xbe   :  { %3025 = vmatprep.subr.bf16.mxu0 %v8952_v44  ;;  %3189 = vmatprep.subr.bf16.mxu1 %v8954_v45  ;;  %v9036_v44 = vld [vmem:[#allocation2 + $0x578] ss:$28 sps:$4 sm:$0xff]   ;;  %v9039_v45 = vld [vmem:[#allocation2 + $0x580] ss:$28 sps:$4 sm:$0xff]  }
  0xc1   :  { %3026 = vmatpush1.bf16.msra.mxu0 %v8956_v47  ;;  %3190 = vmatpush1.bf16.msra.mxu1 %v8957_v49  ;;  %v9047_v47 = vld [vmem:[#allocation2 + $0x5bc] ss:$28 sps:$4 sm:$0xff]   ;;  %v9042_v49 = vld [vmem:[#allocation2 + $0x5b0] ss:$28 sps:$4 sm:$0xff]  }
  0xc2   :  { %3027 = vmatprep.subr.bf16.mxu0 %v8958_v50  ;;  %3191 = vmatprep.subr.bf16.mxu1 %v8960_v51  ;;  %v9045_v50 = vld [vmem:[#allocation2 + $0x5b8] ss:$28 sps:$4 sm:$0xff]   ;;  %v9050_v51 = vld [vmem:[#allocation2 + $0x5ec] ss:$28 sps:$4 sm:$0xff]  }
  0xc5   :  { %3028 = vmatpush1.bf16.msra.mxu0 %v8962_v52  ;;  %3192 = vmatpush1.bf16.msra.mxu1 %v8963_v53  ;;  %v9053_v52 = vld [vmem:[#allocation2 + $0x5f4] ss:$28 sps:$4 sm:$0xff]   ;;  %v9048_v53 = vld [vmem:[#allocation2 + $0x5e8] ss:$28 sps:$4 sm:$0xff]  }
  0xc6   :  { %3029 = vmatprep.subr.bf16.mxu0 %v8964_v54  ;;  %3193 = vmatprep.subr.bf16.mxu1 %v8966_v55  ;;  %v9051_v54 = vld [vmem:[#allocation2 + $0x5f0] ss:$28 sps:$4 sm:$0xff]   ;;  %v9056_v55 = vld [vmem:[#allocation2 + $0x624] ss:$28 sps:$4 sm:$0xff]  }
  0xc9   :  { %3030 = vmatpush1.bf16.msra.mxu0 %v8968_v56  ;;  %3194 = vmatpush1.bf16.msra.mxu1 %v8969_v57  ;;  %v9059_v56 = vld [vmem:[#allocation2 + $0x62c] ss:$28 sps:$4 sm:$0xff]   ;;  %v9054_v57 = vld [vmem:[#allocation2 + $0x620] ss:$28 sps:$4 sm:$0xff]  }
  0xca   :  { %3031 = vmatprep.subr.bf16.mxu0 %v8970_v58  ;;  %3195 = vmatprep.subr.bf16.mxu1 %v8972_v59  ;;  %v9057_v58 = vld [vmem:[#allocation2 + $0x628] ss:$28 sps:$4 sm:$0xff]   ;;  %v9062_v59 = vld [vmem:[#allocation2 + $0x65c] ss:$28 sps:$4 sm:$0xff]  }
  0xcd   :  { %3032 = vmatpush1.bf16.msra.mxu0 %v8974_v60  ;;  %3196 = vmatpush1.bf16.msra.mxu1 %v8975_v61  ;;  %v9065_v60 = vld [vmem:[#allocation2 + $0x664] ss:$28 sps:$4 sm:$0xff]   ;;  %v9060_v61 = vld [vmem:[#allocation2 + $0x658] ss:$28 sps:$4 sm:$0xff]  }
  0xce   :  { %3033 = vmatprep.subr.bf16.mxu0 %v8976_v62  ;;  %3197 = vmatprep.subr.bf16.mxu1 %v8978_v63  ;;  %v9063_v62 = vld [vmem:[#allocation2 + $0x660] ss:$28 sps:$4 sm:$0xff]   ;;  %v9068_v63 = vld [vmem:[#allocation2 + $0x694] ss:$28 sps:$4 sm:$0xff]  }
  0xd1   :  { %3034 = vmatpush1.bf16.msra.mxu0 %v8980_v0  ;;  %3198 = vmatpush1.bf16.msra.mxu1 %v8981_v1  ;;  %v9071_v0 = vld [vmem:[#allocation2 + $0x69c] ss:$28 sps:$4 sm:$0xff]   ;;  %v9066_v1 = vld [vmem:[#allocation2 + $0x690] ss:$28 sps:$4 sm:$0xff]  }
  0xd2   :  { %3044 = vmatprep.subr.bf16.mxu0 %v8984_v3  ;;  %3208 = vmatprep.subr.bf16.mxu1 %v8987_v4  ;;  %v9074_v3 = vld [vmem:[#allocation2 + $0x6cc] ss:$28 sps:$4 sm:$0xff]   ;;  %v9077_v4 = vld [vmem:[#allocation2 + $0x6d4] ss:$28 sps:$4 sm:$0xff]  }
  0xd4   :  { %3036 = vmatmul.mubr.bf16.vlgmr.msra.gmra.mrb[0].mxu0 %v10522_v5  ;;  %3200 = vmatmul.mubr.bf16.vlgmr.msra.gmra.mrb[0].mxu1 %v10522_v5 }
  0xd5   :  { %3045 = vmatpush1.bf16.msra.mxu0 %v8982_v6  ;;  %3209 = vmatpush1.bf16.msra.mxu1 %v8985_v7  ;;  %v9072_v6 = vld [vmem:[#allocation2 + $0x6c8] ss:$28 sps:$4 sm:$0xff]   ;;  %v9075_v7 = vld [vmem:[#allocation2 + $0x6d0] ss:$28 sps:$4 sm:$0xff]  }
  0xd6   :  { %3046 = vmatprep.subr.bf16.mxu0 %v8990_v8  ;;  %3210 = vmatprep.subr.bf16.mxu1 %v8993_v9  ;;  %v9080_v8 = vld [vmem:[#allocation2 + $0x704] ss:$28 sps:$4 sm:$0xff]   ;;  %v136_v9 = vld [vmem:[%s10730_s0 + $0x10] sm:$0xff] }
  0xd7   :  { %3076 = vmatprep.mubr.bf16.mxu0 %v10529_v32  ;;  %3240 = vmatprep.mubr.bf16.mxu1 %v10529_v32 }
  0xd9   :  { %3047 = vmatpush1.bf16.msra.mxu0 %v8988_v10  ;;  %3211 = vmatpush1.bf16.msra.mxu1 %v8991_v11  ;;  %v9083_v10 = vld [vmem:[#allocation2 + $0x70c] ss:$28 sps:$4 sm:$0xff]   ;;  %v9078_v11 = vld [vmem:[#allocation2 + $0x700] ss:$28 sps:$4 sm:$0xff]  }
  0xda   :  { %3048 = vmatprep.subr.bf16.mxu0 %v8996_v12  ;;  %3212 = vmatprep.subr.bf16.mxu1 %v8999_v13  ;;  %v9081_v12 = vld [vmem:[#allocation2 + $0x708] ss:$28 sps:$4 sm:$0xff]   ;;  %v10536_v13 = vpack.c.bf16 %v136_v9, %v136_v9  ;;  %v9162_v9 = vld [vmem:[#allocation2 + $0xa10] ss:$28 sps:$4 sm:$0xff]  }
  0xdd   :  { %3049 = vmatpush1.bf16.msra.mxu0 %v8994_v14  ;;  %3213 = vmatpush1.bf16.msra.mxu1 %v8997_v15  ;;  %v9086_v14 = vld [vmem:[#allocation2 + $0x73c] ss:$28 sps:$4 sm:$0xff]   ;;  %v9089_v15 = vld [vmem:[#allocation2 + $0x744] ss:$28 sps:$4 sm:$0xff]  }
  0xde   :  { %3050 = vmatprep.subr.bf16.mxu0 %v9002_v16  ;;  %3214 = vmatprep.subr.bf16.mxu1 %v9005_v17  ;;  %v139_v16 = vld [vmem:[%s10730_s0 + $0x28] sm:$0xff] }
  0xdf   :  { %v10541_v17 = vpack.c.bf16 %v139_v16, %v139_v16  ;;  %v9176_v16 = vld [vmem:[#allocation2 + $0xa84] ss:$28 sps:$4 sm:$0xff]  }
  0xe1   :  { %3051 = vmatpush1.bf16.msra.mxu0 %v9000_v18  ;;  %3215 = vmatpush1.bf16.msra.mxu1 %v9003_v19  ;;  %v9084_v18 = vld [vmem:[#allocation2 + $0x738] ss:$28 sps:$4 sm:$0xff]   ;;  %v9087_v19 = vld [vmem:[#allocation2 + $0x740] ss:$28 sps:$4 sm:$0xff]  }
  0xe2   :  { %3052 = vmatprep.subr.bf16.mxu0 %v9008_v20  ;;  %3216 = vmatprep.subr.bf16.mxu1 %v9011_v21  ;;  %v9092_v20 = vld [vmem:[#allocation2 + $0x774] ss:$28 sps:$4 sm:$0xff]   ;;  %v9095_v21 = vld [vmem:[#allocation2 + $0x77c] ss:$28 sps:$4 sm:$0xff]  }
  0xe5   :  { %3053 = vmatpush1.bf16.msra.mxu0 %v9006_v22  ;;  %3217 = vmatpush1.bf16.msra.mxu1 %v9009_v23  ;;  %v9090_v22 = vld [vmem:[#allocation2 + $0x770] ss:$28 sps:$4 sm:$0xff]   ;;  %v9093_v23 = vld [vmem:[#allocation2 + $0x778] ss:$28 sps:$4 sm:$0xff]  }
  0xe6   :  { %3054 = vmatprep.subr.bf16.mxu0 %v9014_v24  ;;  %3218 = vmatprep.subr.bf16.mxu1 %v9017_v25  ;;  %v9098_v24 = vld [vmem:[#allocation2 + $0x7ac] ss:$28 sps:$4 sm:$0xff]   ;;  %v9101_v25 = vld [vmem:[#allocation2 + $0x7b4] ss:$28 sps:$4 sm:$0xff]  }
  0xe9   :  { %3055 = vmatpush1.bf16.msra.mxu0 %v9012_v26  ;;  %3219 = vmatpush1.bf16.msra.mxu1 %v9015_v27  ;;  %v9096_v26 = vld [vmem:[#allocation2 + $0x7a8] ss:$28 sps:$4 sm:$0xff]   ;;  %v9099_v27 = vld [vmem:[#allocation2 + $0x7b0] ss:$28 sps:$4 sm:$0xff]  }
  0xea   :  { %3056 = vmatprep.subr.bf16.mxu0 %v9020_v28  ;;  %3220 = vmatprep.subr.bf16.mxu1 %v9023_v29  ;;  %v9104_v28 = vld [vmem:[#allocation2 + $0x7e4] ss:$28 sps:$4 sm:$0xff]   ;;  %v9107_v29 = vld [vmem:[#allocation2 + $0x7ec] ss:$28 sps:$4 sm:$0xff]  }
  0xed   :  { %3057 = vmatpush1.bf16.msra.mxu0 %v9018_v31  ;;  %3221 = vmatpush1.bf16.msra.mxu1 %v9021_v33  ;;  %v9105_v31 = vld [vmem:[#allocation2 + $0x7e8] ss:$28 sps:$4 sm:$0xff]   ;;  %v9110_v33 = vld [vmem:[#allocation2 + $0x81c] ss:$28 sps:$4 sm:$0xff]  }
  0xee   :  { %3058 = vmatprep.subr.bf16.mxu0 %v9026_v34  ;;  %3222 = vmatprep.subr.bf16.mxu1 %v9029_v35  ;;  %v9113_v34 = vld [vmem:[#allocation2 + $0x824] ss:$28 sps:$4 sm:$0xff]   ;;  %v9108_v35 = vld [vmem:[#allocation2 + $0x818] ss:$28 sps:$4 sm:$0xff]  }
  0xf1   :  { %3059 = vmatpush1.bf16.msra.mxu0 %v9024_v36  ;;  %3223 = vmatpush1.bf16.msra.mxu1 %v9027_v37  ;;  %v9111_v36 = vld [vmem:[#allocation2 + $0x820] ss:$28 sps:$4 sm:$0xff]   ;;  %v9116_v37 = vld [vmem:[#allocation2 + $0x854] ss:$28 sps:$4 sm:$0xff]  }
  0xf2   :  { %3060 = vmatprep.subr.bf16.mxu0 %v9032_v38  ;;  %3224 = vmatprep.subr.bf16.mxu1 %v9035_v39  ;;  %v9119_v38 = vld [vmem:[#allocation2 + $0x85c] ss:$28 sps:$4 sm:$0xff]   ;;  %v9114_v39 = vld [vmem:[#allocation2 + $0x850] ss:$28 sps:$4 sm:$0xff]  }
  0xf5   :  { %3061 = vmatpush1.bf16.msra.mxu0 %v9030_v40  ;;  %3225 = vmatpush1.bf16.msra.mxu1 %v9033_v41  ;;  %v9117_v40 = vld [vmem:[#allocation2 + $0x858] ss:$28 sps:$4 sm:$0xff]   ;;  %v9122_v41 = vld [vmem:[#allocation2 + $0x88c] ss:$28 sps:$4 sm:$0xff]  }
  0xf6   :  { %3062 = vmatprep.subr.bf16.mxu0 %v9038_v42  ;;  %3226 = vmatprep.subr.bf16.mxu1 %v9041_v43  ;;  %v9125_v42 = vld [vmem:[#allocation2 + $0x894] ss:$28 sps:$4 sm:$0xff]   ;;  %v9120_v43 = vld [vmem:[#allocation2 + $0x888] ss:$28 sps:$4 sm:$0xff]  }
  0xf9   :  { %3063 = vmatpush1.bf16.msra.mxu0 %v9036_v44  ;;  %3227 = vmatpush1.bf16.msra.mxu1 %v9039_v45  ;;  %v9123_v44 = vld [vmem:[#allocation2 + $0x890] ss:$28 sps:$4 sm:$0xff]   ;;  %v9128_v45 = vld [vmem:[#allocation2 + $0x8c4] ss:$28 sps:$4 sm:$0xff]  }
  0xfa   :  { %3064 = vmatprep.subr.bf16.mxu0 %v9044_v46  ;;  %3228 = vmatprep.subr.bf16.mxu1 %v9047_v47  ;;  %v9131_v46 = vld [vmem:[#allocation2 + $0x8cc] ss:$28 sps:$4 sm:$0xff]   ;;  %v9126_v47 = vld [vmem:[#allocation2 + $0x8c0] ss:$28 sps:$4 sm:$0xff]  }
  0xfd   :  { %3065 = vmatpush1.bf16.msra.mxu0 %v9042_v49  ;;  %3229 = vmatpush1.bf16.msra.mxu1 %v9045_v50  ;;  %v9129_v49 = vld [vmem:[#allocation2 + $0x8c8] ss:$28 sps:$4 sm:$0xff]   ;;  %v9134_v50 = vld [vmem:[#allocation2 + $0x8fc] ss:$28 sps:$4 sm:$0xff]  }
  0xfe   :  { %3066 = vmatprep.subr.bf16.mxu0 %v9050_v51  ;;  %3230 = vmatprep.subr.bf16.mxu1 %v9053_v52  ;;  %v9137_v51 = vld [vmem:[#allocation2 + $0x904] ss:$28 sps:$4 sm:$0xff]   ;;  %v9132_v52 = vld [vmem:[#allocation2 + $0x8f8] ss:$28 sps:$4 sm:$0xff]  }
 0x101   :  { %3067 = vmatpush1.bf16.msra.mxu0 %v9048_v53  ;;  %3231 = vmatpush1.bf16.msra.mxu1 %v9051_v54  ;;  %v9135_v53 = vld [vmem:[#allocation2 + $0x900] ss:$28 sps:$4 sm:$0xff]   ;;  %v9140_v54 = vld [vmem:[#allocation2 + $0x934] ss:$28 sps:$4 sm:$0xff]  }
 0x102   :  { %3068 = vmatprep.subr.bf16.mxu0 %v9056_v55  ;;  %3232 = vmatprep.subr.bf16.mxu1 %v9059_v56  ;;  %v9143_v55 = vld [vmem:[#allocation2 + $0x93c] ss:$28 sps:$4 sm:$0xff]   ;;  %v9138_v56 = vld [vmem:[#allocation2 + $0x930] ss:$28 sps:$4 sm:$0xff]  }
 0x105   :  { %3069 = vmatpush1.bf16.msra.mxu0 %v9054_v57  ;;  %3233 = vmatpush1.bf16.msra.mxu1 %v9057_v58  ;;  %v9141_v57 = vld [vmem:[#allocation2 + $0x938] ss:$28 sps:$4 sm:$0xff]   ;;  %v9146_v58 = vld [vmem:[#allocation2 + $0x96c] ss:$28 sps:$4 sm:$0xff]  }
 0x106   :  { %3070 = vmatprep.subr.bf16.mxu0 %v9062_v59  ;;  %3234 = vmatprep.subr.bf16.mxu1 %v9065_v60  ;;  %v9149_v59 = vld [vmem:[#allocation2 + $0x974] ss:$28 sps:$4 sm:$0xff]   ;;  %v9144_v60 = vld [vmem:[#allocation2 + $0x968] ss:$28 sps:$4 sm:$0xff]  }
 0x109   :  { %3071 = vmatpush1.bf16.msra.mxu0 %v9060_v61  ;;  %3235 = vmatpush1.bf16.msra.mxu1 %v9063_v62  ;;  %v9147_v61 = vld [vmem:[#allocation2 + $0x970] ss:$28 sps:$4 sm:$0xff]   ;;  %v9152_v62 = vld [vmem:[#allocation2 + $0x9a4] ss:$28 sps:$4 sm:$0xff]  }
 0x10a   :  { %3072 = vmatprep.subr.bf16.mxu0 %v9068_v63  ;;  %3236 = vmatprep.subr.bf16.mxu1 %v9071_v0  ;;  %v9155_v63 = vld [vmem:[#allocation2 + $0x9ac] ss:$28 sps:$4 sm:$0xff]   ;;  %v9150_v0 = vld [vmem:[#allocation2 + $0x9a0] ss:$28 sps:$4 sm:$0xff]  }
 0x10d   :  { %3073 = vmatpush1.bf16.msra.mxu0 %v9066_v1  ;;  %3237 = vmatpush1.bf16.msra.mxu1 %v9069_v2  ;;  %v9153_v1 = vld [vmem:[#allocation2 + $0x9a8] ss:$28 sps:$4 sm:$0xff]   ;;  %v9158_v2 = vld [vmem:[#allocation2 + $0x9dc] ss:$28 sps:$4 sm:$0xff]  }
 0x10e   :  { %3074 = vmatprep.subr.bf16.mxu0 %v9074_v3  ;;  %3238 = vmatprep.subr.bf16.mxu1 %v9077_v4  ;;  %v9161_v3 = vld [vmem:[#allocation2 + $0x9e4] ss:$28 sps:$4 sm:$0xff]   ;;  %v9156_v4 = vld [vmem:[#allocation2 + $0x9d8] ss:$28 sps:$4 sm:$0xff]  }
 0x111   :  { %3075 = vmatpush1.bf16.msra.mxu0 %v9072_v6  ;;  %3239 = vmatpush1.bf16.msra.mxu1 %v9075_v7  ;;  %v9159_v6 = vld [vmem:[#allocation2 + $0x9e0] ss:$28 sps:$4 sm:$0xff]   ;;  %v9164_v7 = vld [vmem:[#allocation2 + $0xa14] ss:$28 sps:$4 sm:$0xff]  }
 0x112   :  { %3085 = vmatprep.subr.bf16.mxu0 %v9080_v8  ;;  %3249 = vmatprep.subr.bf16.mxu1 %v9083_v10  ;;  %v9167_v8 = vld [vmem:[#allocation2 + $0xa1c] ss:$28 sps:$4 sm:$0xff]  }
 0x113   :  { %v9165_v10 = vld [vmem:[#allocation2 + $0xa18] ss:$28 sps:$4 sm:$0xff]  }
 0x114   :  { %3077 = vmatmul.mubr.bf16.vlgmr.msra.gmra.mrb[0].mxu0 %v10536_v13  ;;  %3241 = vmatmul.mubr.bf16.vlgmr.msra.gmra.mrb[0].mxu1 %v10536_v13 }
 0x115   :  { %3086 = vmatpush1.bf16.msra.mxu0 %v9078_v11  ;;  %3250 = vmatpush1.bf16.msra.mxu1 %v9081_v12  ;;  %v9170_v11 = vld [vmem:[#allocation2 + $0xa4c] ss:$28 sps:$4 sm:$0xff]   ;;  %v9173_v12 = vld [vmem:[#allocation2 + $0xa54] ss:$28 sps:$4 sm:$0xff]  }
 0x116   :  { %3087 = vmatprep.subr.bf16.mxu0 %v9086_v14  ;;  %3251 = vmatprep.subr.bf16.mxu1 %v9089_v15  ;;  %v9168_v14 = vld [vmem:[#allocation2 + $0xa48] ss:$28 sps:$4 sm:$0xff]   ;;  %v9171_v15 = vld [vmem:[#allocation2 + $0xa50] ss:$28 sps:$4 sm:$0xff]  }
 0x117   :  { %3117 = vmatprep.mubr.bf16.mxu0 %v10541_v17  ;;  %3281 = vmatprep.mubr.bf16.mxu1 %v10541_v17 }
 0x119   :  { %3088 = vmatpush1.bf16.msra.mxu0 %v9084_v18  ;;  %3252 = vmatpush1.bf16.msra.mxu1 %v9087_v19  ;;  %v138_v18 = vld [vmem:[%s10730_s0 + $0x20] sm:$0xff]  ;;  %v9179_v19 = vld [vmem:[#allocation2 + $0xa8c] ss:$28 sps:$4 sm:$0xff]  }
 0x11a   :  { %3089 = vmatprep.subr.bf16.mxu0 %v9092_v20  ;;  %3253 = vmatprep.subr.bf16.mxu1 %v9095_v21  ;;  %v9174_v20 = vld [vmem:[#allocation2 + $0xa80] ss:$28 sps:$4 sm:$0xff]   ;;  %v9177_v21 = vld [vmem:[#allocation2 + $0xa88] ss:$28 sps:$4 sm:$0xff]  }
 0x11d   :  { %3090 = vmatpush1.bf16.msra.mxu0 %v9090_v22  ;;  %3254 = vmatpush1.bf16.msra.mxu1 %v9093_v23  ;;  %v10550_v22 = vpack.c.bf16 %v138_v18, %v138_v18  ;;  %v141_v23 = vld [vmem:[%s10730_s0 + $0x38] sm:$0xff]  ;;  %v9260_v18 = vld [vmem:[#allocation2 + $0xd94] ss:$28 sps:$4 sm:$0xff]  }
 0x11e   :  { %3091 = vmatprep.subr.bf16.mxu0 %v9098_v24  ;;  %3255 = vmatprep.subr.bf16.mxu1 %v9101_v25  ;;  %v9182_v24 = vld [vmem:[#allocation2 + $0xabc] ss:$28 sps:$4 sm:$0xff]   ;;  %v9185_v25 = vld [vmem:[#allocation2 + $0xac4] ss:$28 sps:$4 sm:$0xff]  }
 0x121   :  { %3092 = vmatpush1.bf16.msra.mxu0 %v9096_v26  ;;  %3256 = vmatpush1.bf16.msra.mxu1 %v9099_v27  ;;  %v9180_v26 = vld [vmem:[#allocation2 + $0xab8] ss:$28 sps:$4 sm:$0xff]   ;;  %v10555_v27 = vpack.c.bf16 %v141_v23, %v141_v23  ;;  %v9266_v23 = vld [vmem:[#allocation2 + $0xdcc] ss:$28 sps:$4 sm:$0xff]  }
 0x122   :  { %3093 = vmatprep.subr.bf16.mxu0 %v9104_v28  ;;  %3257 = vmatprep.subr.bf16.mxu1 %v9107_v29  ;;  %v9183_v28 = vld [vmem:[#allocation2 + $0xac0] ss:$28 sps:$4 sm:$0xff]   ;;  %v9188_v29 = vld [vmem:[#allocation2 + $0xaf4] ss:$28 sps:$4 sm:$0xff]  }
 0x125   :  { %3094 = vmatpush1.bf16.msra.mxu0 %v9102_v30  ;;  %3258 = vmatpush1.bf16.msra.mxu1 %v9105_v31  ;;  %v9191_v30 = vld [vmem:[#allocation2 + $0xafc] ss:$28 sps:$4 sm:$0xff]   ;;  %v9186_v31 = vld [vmem:[#allocation2 + $0xaf0] ss:$28 sps:$4 sm:$0xff]  }
 0x126   :  { %3095 = vmatprep.subr.bf16.mxu0 %v9110_v33  ;;  %3259 = vmatprep.subr.bf16.mxu1 %v9113_v34  ;;  %v9189_v33 = vld [vmem:[#allocation2 + $0xaf8] ss:$28 sps:$4 sm:$0xff]   ;;  %v9194_v34 = vld [vmem:[#allocation2 + $0xb2c] ss:$28 sps:$4 sm:$0xff]  }
 0x129   :  { %3096 = vmatpush1.bf16.msra.mxu0 %v9108_v35  ;;  %3260 = vmatpush1.bf16.msra.mxu1 %v9111_v36  ;;  %v9197_v35 = vld [vmem:[#allocation2 + $0xb34] ss:$28 sps:$4 sm:$0xff]   ;;  %v9192_v36 = vld [vmem:[#allocation2 + $0xb28] ss:$28 sps:$4 sm:$0xff]  }
 0x12a   :  { %3097 = vmatprep.subr.bf16.mxu0 %v9116_v37  ;;  %3261 = vmatprep.subr.bf16.mxu1 %v9119_v38  ;;  %v9195_v37 = vld [vmem:[#allocation2 + $0xb30] ss:$28 sps:$4 sm:$0xff]   ;;  %v9200_v38 = vld [vmem:[#allocation2 + $0xb64] ss:$28 sps:$4 sm:$0xff]  }
 0x12d   :  { %3098 = vmatpush1.bf16.msra.mxu0 %v9114_v39  ;;  %3262 = vmatpush1.bf16.msra.mxu1 %v9117_v40  ;;  %v9203_v39 = vld [vmem:[#allocation2 + $0xb6c] ss:$28 sps:$4 sm:$0xff]   ;;  %v9198_v40 = vld [vmem:[#allocation2 + $0xb60] ss:$28 sps:$4 sm:$0xff]  }
 0x12e   :  { %3099 = vmatprep.subr.bf16.mxu0 %v9122_v41  ;;  %3263 = vmatprep.subr.bf16.mxu1 %v9125_v42  ;;  %v9201_v41 = vld [vmem:[#allocation2 + $0xb68] ss:$28 sps:$4 sm:$0xff]   ;;  %v9206_v42 = vld [vmem:[#allocation2 + $0xb9c] ss:$28 sps:$4 sm:$0xff]  }
 0x131   :  { %3100 = vmatpush1.bf16.msra.mxu0 %v9120_v43  ;;  %3264 = vmatpush1.bf16.msra.mxu1 %v9123_v44  ;;  %v9209_v43 = vld [vmem:[#allocation2 + $0xba4] ss:$28 sps:$4 sm:$0xff]   ;;  %v9204_v44 = vld [vmem:[#allocation2 + $0xb98] ss:$28 sps:$4 sm:$0xff]  }
 0x132   :  { %3101 = vmatprep.subr.bf16.mxu0 %v9128_v45  ;;  %3265 = vmatprep.subr.bf16.mxu1 %v9131_v46  ;;  %v9207_v45 = vld [vmem:[#allocation2 + $0xba0] ss:$28 sps:$4 sm:$0xff]   ;;  %v9212_v46 = vld [vmem:[#allocation2 + $0xbd4] ss:$28 sps:$4 sm:$0xff]  }
 0x135   :  { %3102 = vmatpush1.bf16.msra.mxu0 %v9126_v47  ;;  %3266 = vmatpush1.bf16.msra.mxu1 %v9129_v49  ;;  %v9215_v47 = vld [vmem:[#allocation2 + $0xbdc] ss:$28 sps:$4 sm:$0xff]   ;;  %v9210_v49 = vld [vmem:[#allocation2 + $0xbd0] ss:$28 sps:$4 sm:$0xff]  }
 0x136   :  { %3103 = vmatprep.subr.bf16.mxu0 %v9134_v50  ;;  %3267 = vmatprep.subr.bf16.mxu1 %v9137_v51  ;;  %v9213_v50 = vld [vmem:[#allocation2 + $0xbd8] ss:$28 sps:$4 sm:$0xff]   ;;  %v9218_v51 = vld [vmem:[#allocation2 + $0xc0c] ss:$28 sps:$4 sm:$0xff]  }
 0x139   :  { %3104 = vmatpush1.bf16.msra.mxu0 %v9132_v52  ;;  %3268 = vmatpush1.bf16.msra.mxu1 %v9135_v53  ;;  %v9221_v52 = vld [vmem:[#allocation2 + $0xc14] ss:$28 sps:$4 sm:$0xff]   ;;  %v9216_v53 = vld [vmem:[#allocation2 + $0xc08] ss:$28 sps:$4 sm:$0xff]  }
 0x13a   :  { %3105 = vmatprep.subr.bf16.mxu0 %v9140_v54  ;;  %3269 = vmatprep.subr.bf16.mxu1 %v9143_v55  ;;  %v9219_v54 = vld [vmem:[#allocation2 + $0xc10] ss:$28 sps:$4 sm:$0xff]   ;;  %v9224_v55 = vld [vmem:[#allocation2 + $0xc44] ss:$28 sps:$4 sm:$0xff]  }
 0x13d   :  { %3106 = vmatpush1.bf16.msra.mxu0 %v9138_v56  ;;  %3270 = vmatpush1.bf16.msra.mxu1 %v9141_v57  ;;  %v9227_v56 = vld [vmem:[#allocation2 + $0xc4c] ss:$28 sps:$4 sm:$0xff]   ;;  %v9222_v57 = vld [vmem:[#allocation2 + $0xc40] ss:$28 sps:$4 sm:$0xff]  }
 0x13e   :  { %3107 = vmatprep.subr.bf16.mxu0 %v9146_v58  ;;  %3271 = vmatprep.subr.bf16.mxu1 %v9149_v59  ;;  %v9225_v58 = vld [vmem:[#allocation2 + $0xc48] ss:$28 sps:$4 sm:$0xff]   ;;  %v9230_v59 = vld [vmem:[#allocation2 + $0xc7c] ss:$28 sps:$4 sm:$0xff]  }
 0x141   :  { %3108 = vmatpush1.bf16.msra.mxu0 %v9144_v60  ;;  %3272 = vmatpush1.bf16.msra.mxu1 %v9147_v61  ;;  %v9233_v60 = vld [vmem:[#allocation2 + $0xc84] ss:$28 sps:$4 sm:$0xff]   ;;  %v9228_v61 = vld [vmem:[#allocation2 + $0xc78] ss:$28 sps:$4 sm:$0xff]  }
 0x142   :  { %3109 = vmatprep.subr.bf16.mxu0 %v9152_v62  ;;  %3273 = vmatprep.subr.bf16.mxu1 %v9155_v63  ;;  %v9231_v62 = vld [vmem:[#allocation2 + $0xc80] ss:$28 sps:$4 sm:$0xff]   ;;  %v9236_v63 = vld [vmem:[#allocation2 + $0xcb4] ss:$28 sps:$4 sm:$0xff]  }
 0x145   :  { %3110 = vmatpush1.bf16.msra.mxu0 %v9150_v0  ;;  %3274 = vmatpush1.bf16.msra.mxu1 %v9153_v1  ;;  %v9239_v0 = vld [vmem:[#allocation2 + $0xcbc] ss:$28 sps:$4 sm:$0xff]   ;;  %v9234_v1 = vld [vmem:[#allocation2 + $0xcb0] ss:$28 sps:$4 sm:$0xff]  }
 0x146   :  { %3111 = vmatprep.subr.bf16.mxu0 %v9158_v2  ;;  %3275 = vmatprep.subr.bf16.mxu1 %v9161_v3  ;;  %v9237_v2 = vld [vmem:[#allocation2 + $0xcb8] ss:$28 sps:$4 sm:$0xff]   ;;  %v9242_v3 = vld [vmem:[#allocation2 + $0xcec] ss:$28 sps:$4 sm:$0xff]  }
 0x149   :  { %3112 = vmatpush1.bf16.msra.mxu0 %v9156_v4  ;;  %3276 = vmatpush1.bf16.msra.mxu1 %v9159_v6  ;;  %v9245_v4 = vld [vmem:[#allocation2 + $0xcf4] ss:$28 sps:$4 sm:$0xff]   ;;  %v9240_v6 = vld [vmem:[#allocation2 + $0xce8] ss:$28 sps:$4 sm:$0xff]  }
 0x14a   :  { %3113 = vmatprep.subr.bf16.mxu0 %v9164_v7  ;;  %3277 = vmatprep.subr.bf16.mxu1 %v9167_v8  ;;  %v9243_v7 = vld [vmem:[#allocation2 + $0xcf0] ss:$28 sps:$4 sm:$0xff]   ;;  %v9248_v8 = vld [vmem:[#allocation2 + $0xd24] ss:$28 sps:$4 sm:$0xff]  }
 0x14d   :  { %3114 = vmatpush1.bf16.msra.mxu0 %v9162_v9  ;;  %3278 = vmatpush1.bf16.msra.mxu1 %v9165_v10  ;;  %v9251_v9 = vld [vmem:[#allocation2 + $0xd2c] ss:$28 sps:$4 sm:$0xff]   ;;  %v9246_v10 = vld [vmem:[#allocation2 + $0xd20] ss:$28 sps:$4 sm:$0xff]  }
 0x14e   :  { %3115 = vmatprep.subr.bf16.mxu0 %v9170_v11  ;;  %3279 = vmatprep.subr.bf16.mxu1 %v9173_v12  ;;  %v9249_v11 = vld [vmem:[#allocation2 + $0xd28] ss:$28 sps:$4 sm:$0xff]   ;;  %v9254_v12 = vld [vmem:[#allocation2 + $0xd5c] ss:$28 sps:$4 sm:$0xff]  }
 0x151   :  { %3116 = vmatpush1.bf16.msra.mxu0 %v9168_v14  ;;  %3280 = vmatpush1.bf16.msra.mxu1 %v9171_v15  ;;  %v9257_v14 = vld [vmem:[#allocation2 + $0xd64] ss:$28 sps:$4 sm:$0xff]   ;;  %v9252_v15 = vld [vmem:[#allocation2 + $0xd58] ss:$28 sps:$4 sm:$0xff]  }
 0x152   :  { %3126 = vmatprep.subr.bf16.mxu0 %v9176_v16  ;;  %3290 = vmatprep.subr.bf16.mxu1 %v9179_v19  ;;  %v9255_v16 = vld [vmem:[#allocation2 + $0xd60] ss:$28 sps:$4 sm:$0xff]  }
 0x153   :  { %v9263_v19 = vld [vmem:[#allocation2 + $0xd9c] ss:$28 sps:$4 sm:$0xff]  }
 0x154   :  { %3118 = vmatmul.mubr.bf16.vlgmr.msra.gmra.mrb[0].mxu0 %v10550_v22  ;;  %3282 = vmatmul.mubr.bf16.vlgmr.msra.gmra.mrb[0].mxu1 %v10550_v22 }
 0x155   :  { %3127 = vmatpush1.bf16.msra.mxu0 %v9174_v20  ;;  %3291 = vmatpush1.bf16.msra.mxu1 %v9177_v21  ;;  %v9258_v20 = vld [vmem:[#allocation2 + $0xd90] ss:$28 sps:$4 sm:$0xff]   ;;  %v9261_v21 = vld [vmem:[#allocation2 + $0xd98] ss:$28 sps:$4 sm:$0xff]  }
 0x156   :  { %3128 = vmatprep.subr.bf16.mxu0 %v9182_v24  ;;  %3292 = vmatprep.subr.bf16.mxu1 %v9185_v25  ;;  %v9269_v24 = vld [vmem:[#allocation2 + $0xdd4] ss:$28 sps:$4 sm:$0xff]   ;;  %v9264_v25 = vld [vmem:[#allocation2 + $0xdc8] ss:$28 sps:$4 sm:$0xff]  }
 0x157   :  { %3158 = vmatprep.mubr.bf16.mxu0 %v10555_v27  ;;  %3322 = vmatprep.mubr.bf16.mxu1 %v10555_v27 }
 0x159   :  { %3129 = vmatpush1.bf16.msra.mxu0 %v9180_v26  ;;  %3293 = vmatpush1.bf16.msra.mxu1 %v9183_v28  ;;  %v9267_v26 = vld [vmem:[#allocation2 + $0xdd0] ss:$28 sps:$4 sm:$0xff]  }
 0x15a   :  { %3130 = vmatprep.subr.bf16.mxu0 %v9188_v29  ;;  %3294 = vmatprep.subr.bf16.mxu1 %v9191_v30  ;;  %v140_v28 = vld [vmem:[%s10730_s0 + $0x30] sm:$0xff] }
 0x15b   :  { %v9272_v29 = vld [vmem:[#allocation2 + $0x14] ss:$28 sps:$4 sm:$0xff]  }
 0x15c   :  { %v9291_v30 = vld [vmem:[#allocation2 + $0x1d8] ss:$28 sps:$4 sm:$0xff]  }
 0x15d   :  { %3131 = vmatpush1.bf16.msra.mxu0 %v9186_v31  ;;  %3295 = vmatpush1.bf16.msra.mxu1 %v9189_v33  ;;  %v9270_v31 = vld [vmem:[#allocation2 + $0x10] ss:$28 sps:$4 sm:$0xff]   ;;  %v10564_v33 = vpack.c.bf16 %v140_v28, %v140_v28 }
 0x15e   :  { %3132 = vmatprep.subr.bf16.mxu0 %v9194_v34  ;;  %3296 = vmatprep.subr.bf16.mxu1 %v9197_v35  ;;  %v9275_v34 = vld [vmem:[#allocation2 + $0x4c] ss:$28 sps:$4 sm:$0xff]   ;;  %v9295_v35 = vld [vmem:[#allocation2 + $0x18] ss:$28 sps:$4 sm:$0xff]  }
 0x15f   :  { %v9360_v28 = vld [vmem:[#allocation2 + $0x4b0] ss:$28 sps:$4 sm:$0xff]  }
 0x161   :  { %3133 = vmatpush1.bf16.msra.mxu0 %v9192_v36  ;;  %3297 = vmatpush1.bf16.msra.mxu1 %v9195_v37  ;;  %v9296_v36 = vld [vmem:[#allocation2 + $0x210] ss:$28 sps:$4 sm:$0xff]   ;;  %v9273_v37 = vld [vmem:[#allocation2 + $0x48] ss:$28 sps:$4 sm:$0xff]  }
 0x162   :  { %3134 = vmatprep.subr.bf16.mxu0 %v9200_v38  ;;  %3298 = vmatprep.subr.bf16.mxu1 %v9203_v39  ;;  %v9300_v38 = vld [vmem:[#allocation2 + $0x50] ss:$28 sps:$4 sm:$0xff]   ;;  %v9278_v39 = vld [vmem:[#allocation2 + $0x84] ss:$28 sps:$4 sm:$0xff]  }
 0x165   :  { %3135 = vmatpush1.bf16.msra.mxu0 %v9198_v40  ;;  %3299 = vmatpush1.bf16.msra.mxu1 %v9201_v41  ;;  %v9301_v40 = vld [vmem:[#allocation2 + $0x248] ss:$28 sps:$4 sm:$0xff]   ;;  %v9276_v41 = vld [vmem:[#allocation2 + $0x80] ss:$28 sps:$4 sm:$0xff]  }
 0x166   :  { %3136 = vmatprep.subr.bf16.mxu0 %v9206_v42  ;;  %3300 = vmatprep.subr.bf16.mxu1 %v9209_v43  ;;  %v9281_v42 = vld [vmem:[#allocation2 + $0xbc] ss:$28 sps:$4 sm:$0xff]   ;;  %v9305_v43 = vld [vmem:[#allocation2 + $0x88] ss:$28 sps:$4 sm:$0xff]  }
 0x169   :  { %3137 = vmatpush1.bf16.msra.mxu0 %v9204_v44  ;;  %3301 = vmatpush1.bf16.msra.mxu1 %v9207_v45  ;;  %v9306_v44 = vld [vmem:[#allocation2 + $0x280] ss:$28 sps:$4 sm:$0xff]   ;;  %v9279_v45 = vld [vmem:[#allocation2 + $0xb8] ss:$28 sps:$4 sm:$0xff]  }
 0x16a   :  { %3138 = vmatprep.subr.bf16.mxu0 %v9212_v46  ;;  %3302 = vmatprep.subr.bf16.mxu1 %v9215_v47  ;;  %v9284_v46 = vld [vmem:[#allocation2 + $0xf4] ss:$28 sps:$4 sm:$0xff]   ;;  %v9310_v47 = vld [vmem:[#allocation2 + $0xc0] ss:$28 sps:$4 sm:$0xff]  }
 0x16d   :  { %3139 = vmatpush1.bf16.msra.mxu0 %v9210_v49  ;;  %3303 = vmatpush1.bf16.msra.mxu1 %v9213_v50  ;;  %v9311_v49 = vld [vmem:[#allocation2 + $0x2b8] ss:$28 sps:$4 sm:$0xff]   ;;  %v9282_v50 = vld [vmem:[#allocation2 + $0xf0] ss:$28 sps:$4 sm:$0xff]  }
 0x16e   :  { %3140 = vmatprep.subr.bf16.mxu0 %v9218_v51  ;;  %3304 = vmatprep.subr.bf16.mxu1 %v9221_v52  ;;  %v9287_v51 = vld [vmem:[#allocation2 + $0x12c] ss:$28 sps:$4 sm:$0xff]  }
 0x16f   :  { %v9316_v52 = vld [vmem:[#allocation2 + $0x2f0] ss:$28 sps:$4 sm:$0xff]  }
 0x171   :  { %3141 = vmatpush1.bf16.msra.mxu0 %v9216_v53  ;;  %3305 = vmatpush1.bf16.msra.mxu1 %v9219_v54  ;;  %v9285_v53 = vld [vmem:[#allocation2 + $0x128] ss:$28 sps:$4 sm:$0xff]  }
 0x172   :  { %3142 = vmatprep.subr.bf16.mxu0 %v9224_v55  ;;  %3306 = vmatprep.subr.bf16.mxu1 %v9227_v56  ;;  %v9290_v54 = vld [vmem:[#allocation2 + $0x164] ss:$28 sps:$4 sm:$0xff]   ;;  %v9320_v55 = vld [vmem:[#allocation2 + $0x130] ss:$28 sps:$4 sm:$0xff]  }
 0x173   :  { %v9321_v56 = vld [vmem:[#allocation2 + $0x328] ss:$28 sps:$4 sm:$0xff]  }
 0x175   :  { %3143 = vmatpush1.bf16.msra.mxu0 %v9222_v57  ;;  %3307 = vmatpush1.bf16.msra.mxu1 %v9225_v58  ;;  %v9288_v57 = vld [vmem:[#allocation2 + $0x160] ss:$28 sps:$4 sm:$0xff]   ;;  %v9325_v58 = vld [vmem:[#allocation2 + $0x168] ss:$28 sps:$4 sm:$0xff]  }
 0x176   :  { %3144 = vmatprep.subr.bf16.mxu0 %v9230_v59  ;;  %3308 = vmatprep.subr.bf16.mxu1 %v9233_v60  ;;  %v9294_v59 = vld [vmem:[#allocation2 + $0x19c] ss:$28 sps:$4 sm:$0xff]  }
 0x177   :  { %v9326_v60 = vld [vmem:[#allocation2 + $0x360] ss:$28 sps:$4 sm:$0xff]  }
 0x179   :  { %3145 = vmatpush1.bf16.msra.mxu0 %v9228_v61  ;;  %3309 = vmatpush1.bf16.msra.mxu1 %v9231_v62  ;;  %v9292_v61 = vld [vmem:[#allocation2 + $0x198] ss:$28 sps:$4 sm:$0xff]  }
 0x17a   :  { %3146 = vmatprep.subr.bf16.mxu0 %v9236_v63  ;;  %3310 = vmatprep.subr.bf16.mxu1 %v9239_v0  ;;  %v9299_v62 = vld [vmem:[#allocation2 + $0x1d4] ss:$28 sps:$4 sm:$0xff]   ;;  %v9330_v63 = vld [vmem:[#allocation2 + $0x1a0] ss:$28 sps:$4 sm:$0xff]  }
 0x17b   :  { %v9331_v0 = vld [vmem:[#allocation2 + $0x558] ss:$28 sps:$4 sm:$0xff]  }
 0x17d   :  { %3147 = vmatpush1.bf16.msra.mxu0 %v9234_v1  ;;  %3311 = vmatpush1.bf16.msra.mxu1 %v9237_v2  ;;  %v9297_v1 = vld [vmem:[#allocation2 + $0x1d0] ss:$28 sps:$4 sm:$0xff]  }
 0x17e   :  { %3148 = vmatprep.subr.bf16.mxu0 %v9242_v3  ;;  %3312 = vmatprep.subr.bf16.mxu1 %v9245_v4  ;;  %v9304_v2 = vld [vmem:[#allocation2 + $0x20c] ss:$28 sps:$4 sm:$0xff]   ;;  %v9335_v3 = vld [vmem:[#allocation2 + $0x398] ss:$28 sps:$4 sm:$0xff]  }
 0x17f   :  { %v9336_v4 = vld [vmem:[#allocation2 + $0x590] ss:$28 sps:$4 sm:$0xff]  }
 0x181   :  { %3149 = vmatpush1.bf16.msra.mxu0 %v9240_v6  ;;  %3313 = vmatpush1.bf16.msra.mxu1 %v9243_v7  ;;  %v9302_v6 = vld [vmem:[#allocation2 + $0x208] ss:$28 sps:$4 sm:$0xff]  }
 0x182   :  { %3150 = vmatprep.subr.bf16.mxu0 %v9248_v8  ;;  %3314 = vmatprep.subr.bf16.mxu1 %v9251_v9  ;;  %v9309_v7 = vld [vmem:[#allocation2 + $0x244] ss:$28 sps:$4 sm:$0xff]   ;;  %v9340_v8 = vld [vmem:[#allocation2 + $0x3d0] ss:$28 sps:$4 sm:$0xff]  }
 0x183   :  { %v9341_v9 = vld [vmem:[#allocation2 + $0x5c8] ss:$28 sps:$4 sm:$0xff]  }
 0x185   :  { %3151 = vmatpush1.bf16.msra.mxu0 %v9246_v10  ;;  %3315 = vmatpush1.bf16.msra.mxu1 %v9249_v11  ;;  %v9307_v10 = vld [vmem:[#allocation2 + $0x240] ss:$28 sps:$4 sm:$0xff]  }
 0x186   :  { %3152 = vmatprep.subr.bf16.mxu0 %v9254_v12  ;;  %3316 = vmatprep.subr.bf16.mxu1 %v9257_v14  ;;  %v9314_v11 = vld [vmem:[#allocation2 + $0x27c] ss:$28 sps:$4 sm:$0xff]   ;;  %v9345_v12 = vld [vmem:[#allocation2 + $0x408] ss:$28 sps:$4 sm:$0xff]  }
 0x187   :  { %v9346_v14 = vld [vmem:[#allocation2 + $0x600] ss:$28 sps:$4 sm:$0xff]  }
 0x189   :  { %3153 = vmatpush1.bf16.msra.mxu0 %v9252_v15  ;;  %3317 = vmatpush1.bf16.msra.mxu1 %v9255_v16  ;;  %v9312_v15 = vld [vmem:[#allocation2 + $0x278] ss:$28 sps:$4 sm:$0xff]  }
 0x18a   :  { %3154 = vmatprep.subr.bf16.mxu0 %v9260_v18  ;;  %3318 = vmatprep.subr.bf16.mxu1 %v9263_v19  ;;  %v9319_v16 = vld [vmem:[#allocation2 + $0x2b4] ss:$28 sps:$4 sm:$0xff]   ;;  %v9350_v18 = vld [vmem:[#allocation2 + $0x440] ss:$28 sps:$4 sm:$0xff]  }
 0x18b   :  { %v9351_v19 = vld [vmem:[#allocation2 + $0x638] ss:$28 sps:$4 sm:$0xff]  }
 0x18d   :  { %3155 = vmatpush1.bf16.msra.mxu0 %v9258_v20  ;;  %3319 = vmatpush1.bf16.msra.mxu1 %v9261_v21  ;;  %v9317_v20 = vld [vmem:[#allocation2 + $0x2b0] ss:$28 sps:$4 sm:$0xff]  }
 0x18e   :  { %3156 = vmatprep.subr.bf16.mxu0 %v9266_v23  ;;  %3320 = vmatprep.subr.bf16.mxu1 %v9269_v24  ;;  %v9324_v21 = vld [vmem:[#allocation2 + $0x2ec] ss:$28 sps:$4 sm:$0xff]   ;;  %v9355_v23 = vld [vmem:[#allocation2 + $0x478] ss:$28 sps:$4 sm:$0xff]  }
 0x18f   :  { %v9356_v24 = vld [vmem:[#allocation2 + $0x670] ss:$28 sps:$4 sm:$0xff]  }
 0x191   :  { %3157 = vmatpush1.bf16.msra.mxu0 %v9264_v25  ;;  %3321 = vmatpush1.bf16.msra.mxu1 %v9267_v26  ;;  %v9322_v25 = vld [vmem:[#allocation2 + $0x2e8] ss:$28 sps:$4 sm:$0xff]  }
 0x192   :  { %3331 = vmatprep.subr.bf16.mxu0 %v9272_v29  ;;  %8480 = vmatprep.subr.bf16.mxu1 %v9291_v30  ;;  %v9329_v26 = vld [vmem:[#allocation2 + $0x324] ss:$28 sps:$4 sm:$0xff]  }
 0x193   :  { %v9361_v29 = vld [vmem:[#allocation2 + $0x6a8] ss:$28 sps:$4 sm:$0xff]   ;;  %v9327_v30 = vld [vmem:[#allocation2 + $0x320] ss:$28 sps:$4 sm:$0xff]  }
 0x194   :  { %3159 = vmatmul.mubr.bf16.vlgmr.msra.gmra.mrb[0].mxu0 %v10564_v33  ;;  %3323 = vmatmul.mubr.bf16.vlgmr.msra.gmra.mrb[0].mxu1 %v10564_v33 }
 0x195   :  { %3332 = vmatpush1.bf16.msra.mxu0 %v9270_v31  ;;  %8481 = vmatpush3.bf16.msra.mxu1 %v9295_v35  ;;  %v9334_v31 = vld [vmem:[#allocation2 + $0x35c] ss:$28 sps:$4 sm:$0xff]  }
 0x196   :  { %3333 = vmatprep.subr.bf16.mxu0 %v9275_v34  ;;  %8482 = vmatprep.subr.bf16.mxu1 %v9296_v36  ;;  %v9365_v34 = vld [vmem:[#allocation2 + $0x4e8] ss:$28 sps:$4 sm:$0xff]   ;;  %v9366_v35 = vld [vmem:[#allocation2 + $0x6e0] ss:$28 sps:$4 sm:$0xff]   ;;  %v9332_v36 = vld [vmem:[#allocation2 + $0x358] ss:$28 sps:$4 sm:$0xff]  }
 0x197   :  { %3527 = vmatprep.mubr.bf16.mxu1 %v10515_v48  ;;  %3363 = vmatprep.mubr.bf16.mxu0 %v10515_v48  ;;  %v9315_v48 = vld [vmem:[#allocation2 + $0xf8] ss:$28 sps:$4 sm:$0xff]  }
 0x199   :  { %3334 = vmatpush1.bf16.msra.mxu0 %v9273_v37  ;;  %8483 = vmatpush3.bf16.msra.mxu1 %v9300_v38  ;;  %v9339_v37 = vld [vmem:[#allocation2 + $0x394] ss:$28 sps:$4 sm:$0xff]   ;;  %v9370_v38 = vld [vmem:[#allocation2 + $0x520] ss:$28 sps:$4 sm:$0xff]  }
 0x19a   :  { %3335 = vmatprep.subr.bf16.mxu0 %v9278_v39  ;;  %8484 = vmatprep.subr.bf16.mxu1 %v9301_v40  ;;  %v9371_v39 = vld [vmem:[#allocation2 + $0x8d8] ss:$28 sps:$4 sm:$0xff]   ;;  %v9337_v40 = vld [vmem:[#allocation2 + $0x390] ss:$28 sps:$4 sm:$0xff]  }
 0x19d   :  { %3336 = vmatpush1.bf16.msra.mxu0 %v9276_v41  ;;  %8485 = vmatpush3.bf16.msra.mxu1 %v9305_v43  ;;  %v9344_v41 = vld [vmem:[#allocation2 + $0x3cc] ss:$28 sps:$4 sm:$0xff]  }
 0x19e   :  { %3337 = vmatprep.subr.bf16.mxu0 %v9281_v42  ;;  %8486 = vmatprep.subr.bf16.mxu1 %v9306_v44  ;;  %v9375_v42 = vld [vmem:[#allocation2 + $0x718] ss:$28 sps:$4 sm:$0xff]   ;;  %v9376_v43 = vld [vmem:[#allocation2 + $0x910] ss:$28 sps:$4 sm:$0xff]   ;;  %v9342_v44 = vld [vmem:[#allocation2 + $0x3c8] ss:$28 sps:$4 sm:$0xff]  }
 0x1a1   :  { %3338 = vmatpush1.bf16.msra.mxu0 %v9279_v45  ;;  %8487 = vmatpush3.bf16.msra.mxu1 %v9310_v47  ;;  %v9349_v45 = vld [vmem:[#allocation2 + $0x404] ss:$28 sps:$4 sm:$0xff]  }
 0x1a2   :  { %3339 = vmatprep.subr.bf16.mxu0 %v9284_v46  ;;  %8488 = vmatprep.subr.bf16.mxu1 %v9311_v49  ;;  %v9380_v46 = vld [vmem:[#allocation2 + $0x750] ss:$28 sps:$4 sm:$0xff]   ;;  %v9381_v47 = vld [vmem:[#allocation2 + $0x948] ss:$28 sps:$4 sm:$0xff]   ;;  %v9347_v49 = vld [vmem:[#allocation2 + $0x400] ss:$28 sps:$4 sm:$0xff]  }
 0x1a5   :  { %3340 = vmatpush1.bf16.msra.mxu0 %v9282_v50  ;;  %8489 = vmatpush3.bf16.msra.mxu1 %v9315_v48  ;;  %v9354_v50 = vld [vmem:[#allocation2 + $0x43c] ss:$28 sps:$4 sm:$0xff]  }
 0x1a6   :  { %3341 = vmatprep.subr.bf16.mxu0 %v9287_v51  ;;  %8490 = vmatprep.subr.bf16.mxu1 %v9316_v52  ;;  %v9385_v51 = vld [vmem:[#allocation2 + $0x788] ss:$28 sps:$4 sm:$0xff]   ;;  %v9352_v48 = vld [vmem:[#allocation2 + $0x438] ss:$28 sps:$4 sm:$0xff]  }
 0x1a7   :  { %v9359_v52 = vld [vmem:[#allocation2 + $0x474] ss:$28 sps:$4 sm:$0xff]  }
 0x1a9   :  { %3342 = vmatpush1.bf16.msra.mxu0 %v9285_v53  ;;  %8491 = vmatpush3.bf16.msra.mxu1 %v9320_v55  ;;  %v9390_v53 = vld [vmem:[#allocation2 + $0x7c0] ss:$28 sps:$4 sm:$0xff]   ;;  %v9357_v55 = vld [vmem:[#allocation2 + $0x470] ss:$28 sps:$4 sm:$0xff]  }
 0x1aa   :  { %3343 = vmatprep.subr.bf16.mxu0 %v9290_v54  ;;  %8492 = vmatprep.subr.bf16.mxu1 %v9321_v56  ;;  %v9391_v54 = vld [vmem:[#allocation2 + $0x9b8] ss:$28 sps:$4 sm:$0xff]   ;;  %v9364_v56 = vld [vmem:[#allocation2 + $0x4ac] ss:$28 sps:$4 sm:$0xff]  }
 0x1ad   :  { %3344 = vmatpush1.bf16.msra.mxu0 %v9288_v57  ;;  %8493 = vmatpush3.bf16.msra.mxu1 %v9325_v58  ;;  %v9396_v57 = vld [vmem:[#allocation2 + $0x9f0] ss:$28 sps:$4 sm:$0xff]   ;;  %v9362_v58 = vld [vmem:[#allocation2 + $0x4a8] ss:$28 sps:$4 sm:$0xff]  }
 0x1ae   :  { %3345 = vmatprep.subr.bf16.mxu0 %v9294_v59  ;;  %8494 = vmatprep.subr.bf16.mxu1 %v9326_v60  ;;  %v9400_v59 = vld [vmem:[#allocation2 + $0x830] ss:$28 sps:$4 sm:$0xff]   ;;  %v9369_v60 = vld [vmem:[#allocation2 + $0x4e4] ss:$28 sps:$4 sm:$0xff]  }
 0x1b1   :  { %3346 = vmatpush1.bf16.msra.mxu0 %v9292_v61  ;;  %8495 = vmatpush3.bf16.msra.mxu1 %v9330_v63  ;;  %v9401_v61 = vld [vmem:[#allocation2 + $0xa28] ss:$28 sps:$4 sm:$0xff]  }
 0x1b2   :  { %3347 = vmatprep.subr.bf16.mxu0 %v9299_v62  ;;  %8502 = vmatprep.subr.bf16.mxu1 %v9331_v0  ;;  %v9367_v62 = vld [vmem:[#allocation2 + $0x4e0] ss:$28 sps:$4 sm:$0xff]   ;;  %v9405_v63 = vld [vmem:[#allocation2 + $0x868] ss:$28 sps:$4 sm:$0xff]  }
 0x1b3   :  { %v9374_v0 = vld [vmem:[#allocation2 + $0x51c] ss:$28 sps:$4 sm:$0xff]  }
 0x1b4   :  { %3528 = vmatmul.mubr.bf16.vlgmr.msra.gmra.mrb[4].mxu1 %v10522_v5 }
 0x1b5   :  { %3348 = vmatpush1.bf16.msra.mxu0 %v9297_v1  ;;  %8503 = vmatpush3.bf16.msra.mxu1 %v9335_v3  ;;  %v9406_v1 = vld [vmem:[#allocation2 + $0xa60] ss:$28 sps:$4 sm:$0xff]  }
 0x1b6   :  { %3349 = vmatprep.subr.bf16.mxu0 %v9304_v2  ;;  %8504 = vmatprep.subr.bf16.mxu1 %v9336_v4  ;;  %v9372_v2 = vld [vmem:[#allocation2 + $0x518] ss:$28 sps:$4 sm:$0xff]   ;;  %v9410_v3 = vld [vmem:[#allocation2 + $0x8a0] ss:$28 sps:$4 sm:$0xff]  }
 0x1b7   :  { %3567 = vmatprep.mubr.bf16.mxu1 %v10529_v32  ;;  %v9379_v4 = vld [vmem:[#allocation2 + $0x554] ss:$28 sps:$4 sm:$0xff]  }
 0x1b9   :  { %3350 = vmatpush1.bf16.msra.mxu0 %v9302_v6  ;;  %8505 = vmatpush3.bf16.msra.mxu1 %v9340_v8  ;;  %v9411_v6 = vld [vmem:[#allocation2 + $0xc58] ss:$28 sps:$4 sm:$0xff]  }
 0x1ba   :  { %3351 = vmatprep.subr.bf16.mxu0 %v9309_v7  ;;  %8506 = vmatprep.subr.bf16.mxu1 %v9341_v9  ;;  %v9377_v7 = vld [vmem:[#allocation2 + $0x550] ss:$28 sps:$4 sm:$0xff]   ;;  %v9415_v8 = vld [vmem:[#allocation2 + $0xa98] ss:$28 sps:$4 sm:$0xff]  }
 0x1bb   :  { %v9384_v9 = vld [vmem:[#allocation2 + $0x58c] ss:$28 sps:$4 sm:$0xff]  }
 0x1bd   :  { %3352 = vmatpush1.bf16.msra.mxu0 %v9307_v10  ;;  %8507 = vmatpush3.bf16.msra.mxu1 %v9345_v12  ;;  %v9416_v10 = vld [vmem:[#allocation2 + $0xc90] ss:$28 sps:$4 sm:$0xff]  }
 0x1be   :  { %3353 = vmatprep.subr.bf16.mxu0 %v9314_v11  ;;  %8508 = vmatprep.subr.bf16.mxu1 %v9346_v14  ;;  %v9382_v11 = vld [vmem:[#allocation2 + $0x588] ss:$28 sps:$4 sm:$0xff]   ;;  %v9420_v12 = vld [vmem:[#allocation2 + $0xad0] ss:$28 sps:$4 sm:$0xff]  }
 0x1bf   :  { %v9389_v14 = vld [vmem:[#allocation2 + $0x5c4] ss:$28 sps:$4 sm:$0xff]  }
 0x1c1   :  { %3354 = vmatpush1.bf16.msra.mxu0 %v9312_v15  ;;  %8509 = vmatpush3.bf16.msra.mxu1 %v9350_v18  ;;  %v9421_v15 = vld [vmem:[#allocation2 + $0xcc8] ss:$28 sps:$4 sm:$0xff]  }
 0x1c2   :  { %3355 = vmatprep.subr.bf16.mxu0 %v9319_v16  ;;  %8510 = vmatprep.subr.bf16.mxu1 %v9351_v19  ;;  %v9387_v16 = vld [vmem:[#allocation2 + $0x5c0] ss:$28 sps:$4 sm:$0xff]   ;;  %v9425_v18 = vld [vmem:[#allocation2 + $0xb08] ss:$28 sps:$4 sm:$0xff]  }
 0x1c3   :  { %v9394_v19 = vld [vmem:[#allocation2 + $0x5fc] ss:$28 sps:$4 sm:$0xff]  }
 0x1c5   :  { %3356 = vmatpush1.bf16.msra.mxu0 %v9317_v20  ;;  %8511 = vmatpush3.bf16.msra.mxu1 %v9355_v23  ;;  %v9426_v20 = vld [vmem:[#allocation2 + $0xd00] ss:$28 sps:$4 sm:$0xff]  }
 0x1c6   :  { %3357 = vmatprep.subr.bf16.mxu0 %v9324_v21  ;;  %8512 = vmatprep.subr.bf16.mxu1 %v9356_v24  ;;  %v9392_v21 = vld [vmem:[#allocation2 + $0x5f8] ss:$28 sps:$4 sm:$0xff]   ;;  %v9430_v23 = vld [vmem:[#allocation2 + $0xb40] ss:$28 sps:$4 sm:$0xff]  }
 0x1c7   :  { %v9399_v24 = vld [vmem:[#allocation2 + $0x634] ss:$28 sps:$4 sm:$0xff]  }
 0x1c9   :  { %3358 = vmatpush1.bf16.msra.mxu0 %v9322_v25  ;;  %8513 = vmatpush3.bf16.msra.mxu1 %v9360_v28  ;;  %v9431_v25 = vld [vmem:[#allocation2 + $0xd38] ss:$28 sps:$4 sm:$0xff]  }
 0x1ca   :  { %3359 = vmatprep.subr.bf16.mxu0 %v9329_v26  ;;  %8514 = vmatprep.subr.bf16.mxu1 %v9361_v29  ;;  %v9397_v26 = vld [vmem:[#allocation2 + $0x630] ss:$28 sps:$4 sm:$0xff]   ;;  %v9435_v28 = vld [vmem:[#allocation2 + $0xb78] ss:$28 sps:$4 sm:$0xff]  }
 0x1cb   :  { %v9404_v29 = vld [vmem:[#allocation2 + $0x66c] ss:$28 sps:$4 sm:$0xff]  }
 0x1cd   :  { %3360 = vmatpush1.bf16.msra.mxu0 %v9327_v30  ;;  %8515 = vmatpush3.bf16.msra.mxu1 %v9365_v34  ;;  %v9436_v30 = vld [vmem:[#allocation2 + $0xd70] ss:$28 sps:$4 sm:$0xff]  }
 0x1ce   :  { %3361 = vmatprep.subr.bf16.mxu0 %v9334_v31  ;;  %8516 = vmatprep.subr.bf16.mxu1 %v9366_v35  ;;  %v9402_v31 = vld [vmem:[#allocation2 + $0x668] ss:$28 sps:$4 sm:$0xff]   ;;  %v9440_v34 = vld [vmem:[#allocation2 + $0xbb0] ss:$28 sps:$4 sm:$0xff]  }
 0x1cf   :  { %v9409_v35 = vld [vmem:[#allocation2 + $0x6a4] ss:$28 sps:$4 sm:$0xff]  }
 0x1d1   :  { %3362 = vmatpush1.bf16.msra.mxu0 %v9332_v36  ;;  %8517 = vmatpush3.bf16.msra.mxu1 %v9370_v38  ;;  %v9441_v36 = vld [vmem:[#allocation2 + $0xda8] ss:$28 sps:$4 sm:$0xff]  }
 0x1d2   :  { %3372 = vmatprep.subr.bf16.mxu0 %v9339_v37  ;;  %8524 = vmatprep.subr.bf16.mxu1 %v9371_v39  ;;  %v9407_v37 = vld [vmem:[#allocation2 + $0x6a0] ss:$28 sps:$4 sm:$0xff]   ;;  %v9445_v38 = vld [vmem:[#allocation2 + $0xbe8] ss:$28 sps:$4 sm:$0xff]  }
 0x1d3   :  { %v9414_v39 = vld [vmem:[#allocation2 + $0x6dc] ss:$28 sps:$4 sm:$0xff]  }
 0x1d4   :  { %3364 = vmatmul.mubr.bf16.vlgmr.msra.gmra.mrb[4].mxu0 %v10522_v5  ;;  %3568 = vmatmul.mubr.bf16.vlgmr.msra.gmra.mrb[8].mxu1 %v10536_v13  ;;  %v9386_v5 = vld [vmem:[#allocation2 + $0x980] ss:$28 sps:$4 sm:$0xff]  }
 0x1d5   :  { %3373 = vmatpush1.bf16.msra.mxu0 %v9337_v40  ;;  %8525 = vmatpush3.bf16.msra.mxu1 %v9375_v42  ;;  %v9446_v40 = vld [vmem:[#allocation2 + $0xde0] ss:$28 sps:$4 sm:$0xff]  }
 0x1d6   :  { %3374 = vmatprep.subr.bf16.mxu0 %v9344_v41  ;;  %8526 = vmatprep.subr.bf16.mxu1 %v9376_v43  ;;  %v9412_v41 = vld [vmem:[#allocation2 + $0x6d8] ss:$28 sps:$4 sm:$0xff]   ;;  %v9450_v42 = vld [vmem:[#allocation2 + $0xc20] ss:$28 sps:$4 sm:$0xff]  }
 0x1d7   :  { %3607 = vmatprep.mubr.bf16.mxu1 %v10541_v17  ;;  %3404 = vmatprep.mubr.bf16.mxu0 %v10529_v32  ;;  %v9395_v32 = vld [vmem:[#allocation2 + $0x7f8] ss:$28 sps:$4 sm:$0xff]  }
 0x1d8   :  { %v9419_v43 = vld [vmem:[#allocation2 + $0x714] ss:$28 sps:$4 sm:$0xff]  }
 0x1d9   :  { %3375 = vmatpush1.bf16.msra.mxu0 %v9342_v44  ;;  %8527 = vmatpush3.bf16.msra.mxu1 %v9380_v46  ;;  %v9453_v44 = vld [vmem:[#allocation6 + $0x4] ss:$28 sps:$4 sm:$0xff]  }
 0x1da   :  { %3376 = vmatprep.subr.bf16.mxu0 %v9349_v45  ;;  %8528 = vmatprep.subr.bf16.mxu1 %v9381_v47  ;;  %v9417_v45 = vld [vmem:[#allocation2 + $0x710] ss:$28 sps:$4 sm:$0xff]   ;;  %v9451_v47 = vld [vmem:[#allocation6] ss:$28 sps:$4 sm:$0xff]  }
 0x1db   :  { %v9424_v46 = vld [vmem:[#allocation2 + $0x74c] ss:$28 sps:$4 sm:$0xff]  }
 0x1dd   :  { %3377 = vmatpush1.bf16.msra.mxu0 %v9347_v49  ;;  %8529 = vmatpush3.bf16.msra.mxu1 %v9385_v51  ;;  %v9459_v49 = vld [vmem:[#allocation6 + $0x3c] ss:$28 sps:$4 sm:$0xff]  }
 0x1de   :  { %3378 = vmatprep.subr.bf16.mxu0 %v9354_v50  ;;  %8530 = vmatprep.subr.bf16.mxu1 %v9386_v5  ;;  %v9422_v50 = vld [vmem:[#allocation2 + $0x748] ss:$28 sps:$4 sm:$0xff]   ;;  %v9457_v51 = vld [vmem:[#allocation6 + $0x38] ss:$28 sps:$4 sm:$0xff]  }
 0x1df   :  { %v9429_v5 = vld [vmem:[#allocation2 + $0x784] ss:$28 sps:$4 sm:$0xff]  }
 0x1e1   :  { %3379 = vmatpush1.bf16.msra.mxu0 %v9352_v48  ;;  %8531 = vmatpush3.bf16.msra.mxu1 %v9390_v53  ;;  %v9465_v48 = vld [vmem:[#allocation6 + $0x74] ss:$28 sps:$4 sm:$0xff]  }
 0x1e2   :  { %3380 = vmatprep.subr.bf16.mxu0 %v9359_v52  ;;  %8532 = vmatprep.subr.bf16.mxu1 %v9391_v54  ;;  %v9427_v52 = vld [vmem:[#allocation2 + $0x780] ss:$28 sps:$4 sm:$0xff]   ;;  %v9463_v54 = vld [vmem:[#allocation6 + $0x70] ss:$28 sps:$4 sm:$0xff]  }
 0x1e3   :  { %v9434_v53 = vld [vmem:[#allocation2 + $0x7bc] ss:$28 sps:$4 sm:$0xff]  }
 0x1e5   :  { %3381 = vmatpush1.bf16.msra.mxu0 %v9357_v55  ;;  %8533 = vmatpush3.bf16.msra.mxu1 %v9395_v32  ;;  %v9471_v55 = vld [vmem:[#allocation6 + $0xac] ss:$28 sps:$4 sm:$0xff]  }
 0x1e6   :  { %3382 = vmatprep.subr.bf16.mxu0 %v9364_v56  ;;  %8534 = vmatprep.subr.bf16.mxu1 %v9396_v57  ;;  %v9439_v56 = vld [vmem:[#allocation2 + $0x7f4] ss:$28 sps:$4 sm:$0xff]   ;;  %v9477_v57 = vld [vmem:[#allocation6 + $0xe4] ss:$28 sps:$4 sm:$0xff]  }
 0x1e7   :  { %v9469_v32 = vld [vmem:[#allocation6 + $0xa8] ss:$28 sps:$4 sm:$0xff]  }
 0x1e9   :  { %3383 = vmatpush1.bf16.msra.mxu0 %v9362_v58  ;;  %8535 = vmatpush3.bf16.msra.mxu1 %v9400_v59  ;;  %v9437_v58 = vld [vmem:[#allocation2 + $0x7f0] ss:$28 sps:$4 sm:$0xff]  }
 0x1ea   :  { %3384 = vmatprep.subr.bf16.mxu0 %v9369_v60  ;;  %8536 = vmatprep.subr.bf16.mxu1 %v9401_v61  ;;  %v9444_v59 = vld [vmem:[#allocation2 + $0x82c] ss:$28 sps:$4 sm:$0xff]   ;;  %v9483_v60 = vld [vmem:[#allocation6 + $0x11c] ss:$28 sps:$4 sm:$0xff]  }
 0x1eb   :  { %v9442_v61 = vld [vmem:[#allocation2 + $0x828] ss:$28 sps:$4 sm:$0xff]  }
 0x1ed   :  { %3385 = vmatpush1.bf16.msra.mxu0 %v9367_v62  ;;  %8537 = vmatpush3.bf16.msra.mxu1 %v9405_v63  ;;  %v9449_v62 = vld [vmem:[#allocation2 + $0x864] ss:$28 sps:$4 sm:$0xff]  }
 0x1ee   :  { %3386 = vmatprep.subr.bf16.mxu0 %v9374_v0  ;;  %8538 = vmatprep.subr.bf16.mxu1 %v9406_v1  ;;  %v9481_v63 = vld [vmem:[#allocation6 + $0x118] ss:$28 sps:$4 sm:$0xff]  }
 0x1ef   :  { %v9489_v0 = vld [vmem:[#allocation6 + $0x154] ss:$28 sps:$4 sm:$0xff]  }
 0x1f0   :  { %v9447_v1 = vld [vmem:[#allocation2 + $0x860] ss:$28 sps:$4 sm:$0xff]  }
 0x1f1   :  { %3387 = vmatpush1.bf16.msra.mxu0 %v9372_v2  ;;  %8539 = vmatpush3.bf16.msra.mxu1 %v9410_v3  ;;  %v9456_v2 = vld [vmem:[#allocation2 + $0x89c] ss:$28 sps:$4 sm:$0xff]  }
 0x1f2   :  { %3388 = vmatprep.subr.bf16.mxu0 %v9379_v4  ;;  %8546 = vmatprep.subr.bf16.mxu1 %v9411_v6  ;;  %v9487_v3 = vld [vmem:[#allocation6 + $0x150] ss:$28 sps:$4 sm:$0xff]  }
 0x1f3   :  { %v9495_v4 = vld [vmem:[#allocation6 + $0x18c] ss:$28 sps:$4 sm:$0xff]  }
 0x1f4   :  { %3608 = vmatmul.mubr.bf16.vlgmr.msra.gmra.mrb[12].mxu1 %v10550_v22  ;;  %v9454_v6 = vld [vmem:[#allocation2 + $0x898] ss:$28 sps:$4 sm:$0xff]  }
 0x1f5   :  { %3389 = vmatpush1.bf16.msra.mxu0 %v9377_v7  ;;  %8547 = vmatpush3.bf16.msra.mxu1 %v9415_v8  ;;  %v9493_v7 = vld [vmem:[#allocation6 + $0x188] ss:$28 sps:$4 sm:$0xff]  }
 0x1f6   :  { %3390 = vmatprep.subr.bf16.mxu0 %v9384_v9  ;;  %8548 = vmatprep.subr.bf16.mxu1 %v9416_v10  ;;  %v9462_v8 = vld [vmem:[#allocation2 + $0x8d4] ss:$28 sps:$4 sm:$0xff]   ;;  %v9501_v9 = vld [vmem:[#allocation6 + $0x1c4] ss:$28 sps:$4 sm:$0xff]  }
 0x1f7   :  { %3647 = vmatprep.mubr.bf16.mxu1 %v10555_v27  ;;  %v9460_v10 = vld [vmem:[#allocation2 + $0x8d0] ss:$28 sps:$4 sm:$0xff]  }
 0x1f9   :  { %3391 = vmatpush1.bf16.msra.mxu0 %v9382_v11  ;;  %8549 = vmatpush3.bf16.msra.mxu1 %v9420_v12  ;;  %v9468_v11 = vld [vmem:[#allocation2 + $0x90c] ss:$28 sps:$4 sm:$0xff]  }
 0x1fa   :  { %3392 = vmatprep.subr.bf16.mxu0 %v9389_v14  ;;  %8550 = vmatprep.subr.bf16.mxu1 %v9421_v15  ;;  %v9499_v12 = vld [vmem:[#allocation6 + $0x1c0] ss:$28 sps:$4 sm:$0xff]  }
 0x1fb   :  { %v9507_v14 = vld [vmem:[#allocation6 + $0x1fc] ss:$28 sps:$4 sm:$0xff]  }
 0x1fc   :  { %v9466_v15 = vld [vmem:[#allocation2 + $0x908] ss:$28 sps:$4 sm:$0xff]  }
 0x1fd   :  { %3393 = vmatpush1.bf16.msra.mxu0 %v9387_v16  ;;  %8551 = vmatpush3.bf16.msra.mxu1 %v9425_v18  ;;  %v9474_v16 = vld [vmem:[#allocation2 + $0x944] ss:$28 sps:$4 sm:$0xff]  }
 0x1fe   :  { %3394 = vmatprep.subr.bf16.mxu0 %v9394_v19  ;;  %8552 = vmatprep.subr.bf16.mxu1 %v9426_v20  ;;  %v9505_v18 = vld [vmem:[#allocation6 + $0x1f8] ss:$28 sps:$4 sm:$0xff]  }
 0x1ff   :  { %v9513_v19 = vld [vmem:[#allocation6 + $0x234] ss:$28 sps:$4 sm:$0xff]  }
 0x200   :  { %v9472_v20 = vld [vmem:[#allocation2 + $0x940] ss:$28 sps:$4 sm:$0xff]  }
 0x201   :  { %3395 = vmatpush1.bf16.msra.mxu0 %v9392_v21  ;;  %8553 = vmatpush3.bf16.msra.mxu1 %v9430_v23  ;;  %v9480_v21 = vld [vmem:[#allocation2 + $0x97c] ss:$28 sps:$4 sm:$0xff]  }
 0x202   :  { %3396 = vmatprep.subr.bf16.mxu0 %v9399_v24  ;;  %8554 = vmatprep.subr.bf16.mxu1 %v9431_v25  ;;  %v9511_v23 = vld [vmem:[#allocation6 + $0x230] ss:$28 sps:$4 sm:$0xff]  }
 0x203   :  { %v9519_v24 = vld [vmem:[#allocation6 + $0x26c] ss:$28 sps:$4 sm:$0xff]  }
 0x204   :  { %v9478_v25 = vld [vmem:[#allocation2 + $0x978] ss:$28 sps:$4 sm:$0xff]  }
 0x205   :  { %3397 = vmatpush1.bf16.msra.mxu0 %v9397_v26  ;;  %8555 = vmatpush3.bf16.msra.mxu1 %v9435_v28  ;;  %v9486_v26 = vld [vmem:[#allocation2 + $0x9b4] ss:$28 sps:$4 sm:$0xff]  }
 0x206   :  { %3398 = vmatprep.subr.bf16.mxu0 %v9404_v29  ;;  %8556 = vmatprep.subr.bf16.mxu1 %v9436_v30  ;;  %v9517_v28 = vld [vmem:[#allocation6 + $0x268] ss:$28 sps:$4 sm:$0xff]  }
 0x207   :  { %v9525_v29 = vld [vmem:[#allocation6 + $0x2a4] ss:$28 sps:$4 sm:$0xff]  }
 0x208   :  { %v9484_v30 = vld [vmem:[#allocation2 + $0x9b0] ss:$28 sps:$4 sm:$0xff]  }
 0x209   :  { %3399 = vmatpush1.bf16.msra.mxu0 %v9402_v31  ;;  %8557 = vmatpush3.bf16.msra.mxu1 %v9440_v34  ;;  %v9492_v31 = vld [vmem:[#allocation2 + $0x9ec] ss:$28 sps:$4 sm:$0xff]  }
 0x20a   :  { %3400 = vmatprep.subr.bf16.mxu0 %v9409_v35  ;;  %8558 = vmatprep.subr.bf16.mxu1 %v9441_v36  ;;  %v9523_v34 = vld [vmem:[#allocation6 + $0x2a0] ss:$28 sps:$4 sm:$0xff]  }
 0x20b   :  { %v9531_v35 = vld [vmem:[#allocation6 + $0x2dc] ss:$28 sps:$4 sm:$0xff]  }
 0x20c   :  { %v9490_v36 = vld [vmem:[#allocation2 + $0x9e8] ss:$28 sps:$4 sm:$0xff]  }
 0x20d   :  { %3401 = vmatpush1.bf16.msra.mxu0 %v9407_v37  ;;  %8559 = vmatpush3.bf16.msra.mxu1 %v9445_v38  ;;  %v9498_v37 = vld [vmem:[#allocation2 + $0xa24] ss:$28 sps:$4 sm:$0xff]  }
 0x20e   :  { %3402 = vmatprep.subr.bf16.mxu0 %v9414_v39  ;;  %8560 = vmatprep.subr.bf16.mxu1 %v9446_v40  ;;  %v9529_v38 = vld [vmem:[#allocation6 + $0x2d8] ss:$28 sps:$4 sm:$0xff]  }
 0x20f   :  { %v9537_v39 = vld [vmem:[#allocation6 + $0x314] ss:$28 sps:$4 sm:$0xff]  }
 0x210   :  { %v9496_v40 = vld [vmem:[#allocation2 + $0xa20] ss:$28 sps:$4 sm:$0xff]  }
 0x211   :  { %3403 = vmatpush1.bf16.msra.mxu0 %v9412_v41  ;;  %8561 = vmatpush3.bf16.msra.mxu1 %v9450_v42  ;;  %v9504_v41 = vld [vmem:[#allocation2 + $0xa5c] ss:$28 sps:$4 sm:$0xff]  }
 0x212   :  { %3413 = vmatprep.subr.bf16.mxu0 %v9419_v43  ;;  %6170 = vmatprep.subr.bf16.mxu1 %v9453_v44  ;;  %v9535_v42 = vld [vmem:[#allocation6 + $0x310] ss:$28 sps:$4 sm:$0xff]  }
 0x213   :  { %v9543_v43 = vld [vmem:[#allocation6 + $0x34c] ss:$28 sps:$4 sm:$0xff]  }
 0x214   :  { %3405 = vmatmul.mubr.bf16.vlgmr.msra.gmra.mrb[4].mxu0 %v10536_v13  ;;  %3648 = vmatmul.mubr.bf16.vlgmr.msra.gmra.mrb[16].mxu1 %v10564_v33  ;;  %v9432_v13 = vld [vmem:[#allocation2 + $0x7b8] ss:$28 sps:$4 sm:$0xff]  }
 0x215   :  { %3414 = vmatpush1.bf16.msra.mxu0 %v9417_v45  ;;  %6171 = vmatpush1.bf16.msra.mxu1 %v9451_v47  ;;  %v9502_v44 = vld [vmem:[#allocation2 + $0xa58] ss:$28 sps:$4 sm:$0xff]   ;;  %v9549_v47 = vld [vmem:[#allocation6 + $0x384] ss:$28 sps:$4 sm:$0xff]  }
 0x216   :  { %3415 = vmatprep.subr.bf16.mxu0 %v9424_v46  ;;  %6172 = vmatprep.subr.bf16.mxu1 %v9459_v49  ;;  %v9510_v45 = vld [vmem:[#allocation2 + $0xa94] ss:$28 sps:$4 sm:$0xff]  }
 0x217   :  { %3445 = vmatprep.mubr.bf16.mxu0 %v10541_v17  ;;  %v9475_v17 = vld [vmem:[#allocation6 + $0xe0] ss:$28 sps:$4 sm:$0xff]   ;;  %v9541_v46 = vld [vmem:[#allocation6 + $0x348] ss:$28 sps:$4 sm:$0xff]  }
 0x218   :  { %v9508_v49 = vld [vmem:[#allocation2 + $0xa90] ss:$28 sps:$4 sm:$0xff]  }
 0x219   :  { %3416 = vmatpush1.bf16.msra.mxu0 %v9422_v50  ;;  %6173 = vmatpush1.bf16.msra.mxu1 %v9457_v51  ;;  %v9516_v50 = vld [vmem:[#allocation2 + $0xacc] ss:$28 sps:$4 sm:$0xff]  }
 0x21a   :  { %3417 = vmatprep.subr.bf16.mxu0 %v9429_v5  ;;  %6174 = vmatprep.subr.bf16.mxu1 %v9465_v48  ;;  %v9514_v51 = vld [vmem:[#allocation2 + $0xac8] ss:$28 sps:$4 sm:$0xff]   ;;  %v664_v48 = vlaneseq }
 0x21b   :  { %v9522_v5 = vld [vmem:[#allocation2 + $0xb04] ss:$28 sps:$4 sm:$0xff]  }
 0x21d   :  { %3418 = vmatpush1.bf16.msra.mxu0 %v9427_v52  ;;  %6175 = vmatpush1.bf16.msra.mxu1 %v9463_v54  ;;  %v9520_v52 = vld [vmem:[#allocation2 + $0xb00] ss:$28 sps:$4 sm:$0xff]   ;;  %v10583_v54 = vshrl.u32 %v664_v48, 7 }
 0x21e   :  { %3419 = vmatprep.subr.bf16.mxu0 %v9434_v53  ;;  %6176 = vmatprep.subr.bf16.mxu1 %v9471_v55  ;;  %v9528_v53 = vld [vmem:[#allocation2 + $0xb3c] ss:$28 sps:$4 sm:$0xff]   ;;  %v9594_v48 = vld [vmem:[#allocation2 + $0xda4] ss:$28 sps:$4 sm:$0xff]  }
 0x21f   :  { %v9526_v55 = vld [vmem:[#allocation2 + $0xb38] ss:$28 sps:$4 sm:$0xff]  }
 0x221   :  { %3420 = vmatpush1.bf16.msra.mxu0 %v9432_v13  ;;  %6177 = vmatpush1.bf16.msra.mxu1 %v9469_v32  ;;  %v9534_v13 = vld [vmem:[#allocation2 + $0xb74] ss:$28 sps:$4 sm:$0xff]   ;;  %v10585_v32 = vld [vmem:[#allocation4] sm:$0xff] }
 0x222   :  { %3421 = vmatprep.subr.bf16.mxu0 %v9439_v56  ;;  %6178 = vmatprep.subr.bf16.mxu1 %v9477_v57  ;;  %v9532_v56 = vld [vmem:[#allocation2 + $0xb70] ss:$28 sps:$4 sm:$0xff]   ;;  %v678_v57 = vsub.s32 3, %v10583_v54 }
 0x225   :  { %3422 = vmatpush1.bf16.msra.mxu0 %v9437_v58  ;;  %6179 = vmatpush1.bf16.msra.mxu1 %v9475_v17  ;;  %v9540_v58 = vld [vmem:[#allocation2 + $0xbac] ss:$28 sps:$4 sm:$0xff]  }
 0x226   :  { %3423 = vmatprep.subr.bf16.mxu0 %v9444_v59  ;;  %6180 = vmatprep.subr.bf16.mxu1 %v9483_v60  ;;  %v679_v60 = vrot.slane %v10585_v32, %v678_v57 }
 0x229   :  { %3424 = vmatpush1.bf16.msra.mxu0 %v9442_v61  ;;  %6181 = vmatpush1.bf16.msra.mxu1 %v9481_v63  ;;  %v9538_v61 = vld [vmem:[#allocation2 + $0xba8] ss:$28 sps:$4 sm:$0xff]  }
 0x22a   :  { %3425 = vmatprep.subr.bf16.mxu0 %v9449_v62  ;;  %6182 = vmatprep.subr.bf16.mxu1 %v9489_v0  ;;  %v9546_v62 = vld [vmem:[#allocation2 + $0xbe4] ss:$28 sps:$4 sm:$0xff]  }
 0x22d   :  { %3426 = vmatpush1.bf16.msra.mxu0 %v9447_v1  ;;  %6183 = vmatpush1.bf16.msra.mxu1 %v9487_v3 }
 0x22e   :  { %3427 = vmatprep.subr.bf16.mxu0 %v9456_v2  ;;  %6184 = vmatprep.subr.bf16.mxu1 %v9495_v4 }
 0x231   :  { %3428 = vmatpush1.bf16.msra.mxu0 %v9454_v6  ;;  %6185 = vmatpush1.bf16.msra.mxu1 %v9493_v7 }
 0x232   :  { %3429 = vmatprep.subr.bf16.mxu0 %v9462_v8  ;;  %6186 = vmatprep.subr.bf16.mxu1 %v9501_v9  ;;  %v9544_v9 = vld [vmem:[#allocation2 + $0xbe0] ss:$28 sps:$4 sm:$0xff]  }
 0x235   :  { %3430 = vmatpush1.bf16.msra.mxu0 %v9460_v10  ;;  %6187 = vmatpush1.bf16.msra.mxu1 %v9499_v12  ;;  %v9552_v10 = vld [vmem:[#allocation2 + $0xc1c] ss:$28 sps:$4 sm:$0xff]  }
 0x236   :  { %3431 = vmatprep.subr.bf16.mxu0 %v9468_v11  ;;  %6188 = vmatprep.subr.bf16.mxu1 %v9507_v14 }
 0x239   :  { %3432 = vmatpush1.bf16.msra.mxu0 %v9466_v15  ;;  %6189 = vmatpush1.bf16.msra.mxu1 %v9505_v18  ;;  %v9547_v18 = vld [vmem:[#allocation6 + $0x380] ss:$28 sps:$4 sm:$0xff]  }
 0x23a   :  { %3433 = vmatprep.subr.bf16.mxu0 %v9474_v16  ;;  %6190 = vmatprep.subr.bf16.mxu1 %v9513_v19  ;;  %v9550_v19 = vld [vmem:[#allocation2 + $0xc18] ss:$28 sps:$4 sm:$0xff]  }
 0x23d   :  { %3434 = vmatpush1.bf16.msra.mxu0 %v9472_v20  ;;  %6191 = vmatpush1.bf16.msra.mxu1 %v9511_v23  ;;  %v9558_v23 = vld [vmem:[#allocation2 + $0xc54] ss:$28 sps:$4 sm:$0xff]  }
 0x23e   :  { %3435 = vmatprep.subr.bf16.mxu0 %v9480_v21  ;;  %6192 = vmatprep.subr.bf16.mxu1 %v9519_v24  ;;  %v9555_v21 = vld [vmem:[#allocation6 + $0x3bc] ss:$28 sps:$4 sm:$0xff]  }
 0x241   :  { %3436 = vmatpush1.bf16.msra.mxu0 %v9478_v25  ;;  %6193 = vmatpush1.bf16.msra.mxu1 %v9517_v28  ;;  %v9553_v25 = vld [vmem:[#allocation6 + $0x3b8] ss:$28 sps:$4 sm:$0xff]  }
 0x242   :  { %3437 = vmatprep.subr.bf16.mxu0 %v9486_v26  ;;  %6194 = vmatprep.subr.bf16.mxu1 %v9525_v29  ;;  %v9556_v26 = vld [vmem:[#allocation2 + $0xc50] ss:$28 sps:$4 sm:$0xff]   ;;  %v9561_v29 = vld [vmem:[#allocation6 + $0x3f4] ss:$28 sps:$4 sm:$0xff]  }
 0x245   :  { %3438 = vmatpush1.bf16.msra.mxu0 %v9484_v30  ;;  %6195 = vmatpush1.bf16.msra.mxu1 %v9523_v34  ;;  %v9564_v30 = vld [vmem:[#allocation2 + $0xc8c] ss:$28 sps:$4 sm:$0xff]  }
 0x246   :  { %3439 = vmatprep.subr.bf16.mxu0 %v9492_v31  ;;  %6196 = vmatprep.subr.bf16.mxu1 %v9531_v35  ;;  %v9559_v31 = vld [vmem:[#allocation6 + $0x3f0] ss:$28 sps:$4 sm:$0xff]   ;;  %v9562_v34 = vld [vmem:[#allocation2 + $0xc88] ss:$28 sps:$4 sm:$0xff]  }
 0x247   :  { %v9567_v35 = vld [vmem:[#allocation6 + $0x42c] ss:$28 sps:$4 sm:$0xff]  }
 0x249   :  { %3440 = vmatpush1.bf16.msra.mxu0 %v9490_v36  ;;  %6197 = vmatpush1.bf16.msra.mxu1 %v9529_v38  ;;  %v9570_v36 = vld [vmem:[#allocation2 + $0xcc4] ss:$28 sps:$4 sm:$0xff]  }
 0x24a   :  { %3441 = vmatprep.subr.bf16.mxu0 %v9498_v37  ;;  %6198 = vmatprep.subr.bf16.mxu1 %v9537_v39  ;;  %v9565_v37 = vld [vmem:[#allocation6 + $0x428] ss:$28 sps:$4 sm:$0xff]   ;;  %v9568_v38 = vld [vmem:[#allocation2 + $0xcc0] ss:$28 sps:$4 sm:$0xff]  }
 0x24b   :  { %v9573_v39 = vld [vmem:[#allocation6 + $0x464] ss:$28 sps:$4 sm:$0xff]  }
 0x24d   :  { %3442 = vmatpush1.bf16.msra.mxu0 %v9496_v40  ;;  %6199 = vmatpush1.bf16.msra.mxu1 %v9535_v42  ;;  %v9576_v40 = vld [vmem:[#allocation2 + $0xcfc] ss:$28 sps:$4 sm:$0xff]  }
 0x24e   :  { %3443 = vmatprep.subr.bf16.mxu0 %v9504_v41  ;;  %6200 = vmatprep.subr.bf16.mxu1 %v9543_v43  ;;  %v9571_v41 = vld [vmem:[#allocation6 + $0x460] ss:$28 sps:$4 sm:$0xff]   ;;  %v9574_v42 = vld [vmem:[#allocation2 + $0xcf8] ss:$28 sps:$4 sm:$0xff]  }
 0x24f   :  { %v9579_v43 = vld [vmem:[#allocation6 + $0x49c] ss:$28 sps:$4 sm:$0xff]  }
 0x251   :  { %3444 = vmatpush1.bf16.msra.mxu0 %v9502_v44  ;;  %6201 = vmatpush1.bf16.msra.mxu1 %v9541_v46  ;;  %v9582_v44 = vld [vmem:[#allocation2 + $0xd34] ss:$28 sps:$4 sm:$0xff]  }
 0x252   :  { %3454 = vmatprep.subr.bf16.mxu0 %v9510_v45  ;;  %6211 = vmatprep.subr.bf16.mxu1 %v9549_v47  ;;  %v9577_v45 = vld [vmem:[#allocation6 + $0x498] ss:$28 sps:$4 sm:$0xff]   ;;  %v9580_v46 = vld [vmem:[#allocation2 + $0xd30] ss:$28 sps:$4 sm:$0xff]  }
 0x253   :  { %v9585_v47 = vld [vmem:[#allocation6 + $0x4d4] ss:$28 sps:$4 sm:$0xff]  }
 0x254   :  { %3446 = vmatmul.mubr.bf16.vlgmr.msra.gmra.mrb[4].mxu0 %v10550_v22  ;;  %v666_v22 = vsub.s32 0, %v10583_v54 }
 0x255   :  { %3455 = vmatpush1.bf16.msra.mxu0 %v9508_v49  ;;  %3486 = vmatprep.mubr.bf16.mxu0 %v10555_v27  ;;  %v670_v27 = vsub.s32 1, %v10583_v54  ;;  %v9588_v49 = vld [vmem:[#allocation2 + $0xd6c] ss:$28 sps:$4 sm:$0xff]  }
 0x256   :  { %3456 = vmatprep.subr.bf16.mxu0 %v9516_v50  ;;  %v667_v59 = vrot.slane %v10585_v32, %v666_v22  ;;  %v9583_v50 = vld [vmem:[#allocation6 + $0x4d0] ss:$28 sps:$4 sm:$0xff]  }
 0x257   :  { %v671_v17 = vrot.slane %v10585_v32, %v670_v27 }
 0x259   :  { %3457 = vmatpush1.bf16.msra.mxu0 %v9514_v51  ;;  %v9586_v51 = vld [vmem:[#allocation2 + $0xd68] ss:$28 sps:$4 sm:$0xff]  }
 0x25a   :  { %3458 = vmatprep.subr.bf16.mxu0 %v9522_v5  ;;  %v9591_v5 = vld [vmem:[#allocation6 + $0x50c] ss:$28 sps:$4 sm:$0xff]  }
 0x25d   :  { %3459 = vmatpush1.bf16.msra.mxu0 %v9520_v52  ;;  %v9589_v52 = vld [vmem:[#allocation6 + $0x508] ss:$28 sps:$4 sm:$0xff]  }
 0x25e   :  { %3460 = vmatprep.subr.bf16.mxu0 %v9528_v53  ;;  %v9592_v53 = vld [vmem:[#allocation2 + $0xda0] ss:$28 sps:$4 sm:$0xff]  }
 0x261   :  { %3461 = vmatpush1.bf16.msra.mxu0 %v9526_v55  ;;  %v9597_v55 = vld [vmem:[#allocation6 + $0x544] ss:$28 sps:$4 sm:$0xff]  }
 0x262   :  { %3462 = vmatprep.subr.bf16.mxu0 %v9534_v13  ;;  %v9600_v13 = vld [vmem:[#allocation2 + $0xddc] ss:$28 sps:$4 sm:$0xff]  }
 0x265   :  { %3463 = vmatpush1.bf16.msra.mxu0 %v9532_v56  ;;  %v9595_v56 = vld [vmem:[#allocation6 + $0x540] ss:$28 sps:$4 sm:$0xff]  }
 0x266   :  { %3464 = vmatprep.subr.bf16.mxu0 %v9540_v58  ;;  %v9598_v58 = vld [vmem:[#allocation2 + $0xdd8] ss:$28 sps:$4 sm:$0xff]  }
 0x267   :  { %v3160_v63 = vpop.f32.mrb[0].mxu0  ;;  %v10599_v0 = vpop.f32.mrb[0].mxu1 }
 0x268   :  { %v8787_v1 = vadd.f32 %v3160_v63, %v667_v59  ;;  %v3162_v2 = vpop.f32.mrb[1].mxu0  ;;  %v3326_v3 = vpop.f32.mrb[1].mxu1  ;;  %v9603_v59 = vld [vmem:[#allocation6 + $0x57c] ss:$28 sps:$4 sm:$0xff]   ;;  %v9612_v63 = vld [vmem:[#allocation6 + $0x44] ss:$28 sps:$4 sm:$0xff]  }
 0x269   :  { %v8788_v4 = vadd.f32 %v3162_v2, %v671_v17  ;;  %v8790_v6 = vadd.f32 %v3326_v3, %v679_v60  ;;  %v3164_v7 = vpop.f32.mrb[2].mxu0  ;;  %v3328_v8 = vpop.f32.mrb[2].mxu1  ;;  %3465 = vmatpush1.bf16.msra.mxu0 %v9538_v61  ;;  %v9606_v17 = vld [vmem:[#allocation6 + $0xc] ss:$28 sps:$4 sm:$0xff]   ;;  %v9601_v60 = vld [vmem:[#allocation6 + $0x578] ss:$28 sps:$4 sm:$0xff]  }
 0x26a   :  { %v3655_v11 = vmax.f32 %v8787_v1, 0.0  ;;  %v3165_v12 = vpop.f32.mrb[3].mxu0  ;;  %v3329_v14 = vpop.f32.mrb[3].mxu1  ;;  %3466 = vmatprep.subr.bf16.mxu0 %v9546_v62  ;;  %v9604_v61 = vld [vmem:[#allocation6 + $0x8] ss:$28 sps:$4 sm:$0xff]  }
 0x26b   :  { %v3656_v15 = vmax.f32 %v8788_v4, 0.0  ;;  %v3658_v16 = vmax.f32 %v8790_v6, 0.0  ;;  %v9609_v62 = vld [vmem:[#allocation6 + $0x5b4] ss:$28 sps:$4 sm:$0xff]   ;;  %v9610_v3 = vld [vmem:[#allocation6 + $0x40] ss:$28 sps:$4 sm:$0xff]  }
 0x26c   :  { %v10603_v24 = vpack.c.bf16 %v3655_v11, %v3655_v11  ;;  %v9607_v2 = vld [vmem:[#allocation6 + $0x5b0] ss:$28 sps:$4 sm:$0xff]   ;;  %v9618_v7 = vld [vmem:[#allocation6 + $0x7c] ss:$28 sps:$4 sm:$0xff]   ;;  %v9613_v11 = vld [vmem:[#allocation6 + $0x5e8] ss:$28 sps:$4 sm:$0xff]  }
 0x26d   :  { %v10601_v20 = vpack.c.bf16 %v3656_v15, %v3656_v15  ;;  %3467 = vmatpush1.bf16.msra.mxu0 %v9544_v9  ;;  %v10606_v28 = vpack.c.bf16 %v3658_v16, %v3658_v16  ;;  %v9615_v6 = vld [vmem:[#allocation6 + $0x5ec] ss:$28 sps:$4 sm:$0xff]   ;;  %v9616_v12 = vld [vmem:[#allocation6 + $0x78] ss:$28 sps:$4 sm:$0xff]   ;;  %v674_v15 = vsub.s32 2, %v10583_v54 }
 0x26e   :  { %3468 = vmatprep.subr.bf16.mxu0 %v9552_v10  ;;  %v9624_v14 = vld [vmem:[#allocation6 + $0xb4] ss:$28 sps:$4 sm:$0xff]   ;;  %v9619_v16 = vld [vmem:[#allocation6 + $0x620] ss:$28 sps:$4 sm:$0xff]  }
 0x26f   :  { %6202 = vmatprep.mubr.bf16.mxu1 %v10601_v20 }
 0x270   :  { %6203 = vmatmul.mubr.bf16.vlgmr.msra.gmra.mrb[20].mxu1 %v10603_v24 }
 0x271   :  { %6212 = vmatpush1.bf16.msra.mxu1 %v9547_v18  ;;  %3469 = vmatpush1.bf16.msra.mxu0 %v9550_v19  ;;  %v9622_v18 = vld [vmem:[#allocation6 + $0xb0] ss:$28 sps:$4 sm:$0xff]   ;;  %v9627_v19 = vld [vmem:[#allocation6 + $0x65c] ss:$28 sps:$4 sm:$0xff]  }
 0x272   :  { %6243 = vmatprep.mubr.bf16.mxu1 %v10606_v28  ;;  %6213 = vmatprep.subr.bf16.mxu1 %v9555_v21  ;;  %v9630_v21 = vld [vmem:[#allocation6 + $0xec] ss:$28 sps:$4 sm:$0xff]  }
 0x273   :  { %3470 = vmatprep.subr.bf16.mxu0 %v9558_v23  ;;  %v690_v23 = vsub.s32 6, %v10583_v54 }
 0x275   :  { %6214 = vmatpush1.bf16.msra.mxu1 %v9553_v25  ;;  %3471 = vmatpush1.bf16.msra.mxu0 %v9556_v26  ;;  %v9625_v25 = vld [vmem:[#allocation6 + $0x658] ss:$28 sps:$4 sm:$0xff]   ;;  %v9628_v26 = vld [vmem:[#allocation6 + $0xe8] ss:$28 sps:$4 sm:$0xff]  }
 0x276   :  { %6215 = vmatprep.subr.bf16.mxu1 %v9561_v29  ;;  %3472 = vmatprep.subr.bf16.mxu0 %v9564_v30  ;;  %v9633_v29 = vld [vmem:[#allocation6 + $0x694] ss:$28 sps:$4 sm:$0xff]   ;;  %v675_v30 = vrot.slane %v10585_v32, %v674_v15 }
 0x279   :  { %6216 = vmatpush1.bf16.msra.mxu1 %v9559_v31  ;;  %3473 = vmatpush1.bf16.msra.mxu0 %v9562_v34  ;;  %v9636_v31 = vld [vmem:[#allocation6 + $0x124] ss:$28 sps:$4 sm:$0xff]   ;;  %v691_v34 = vrot.slane %v10585_v32, %v690_v23 }
 0x27a   :  { %6217 = vmatprep.subr.bf16.mxu1 %v9567_v35  ;;  %3474 = vmatprep.subr.bf16.mxu0 %v9570_v36  ;;  %v9631_v35 = vld [vmem:[#allocation6 + $0x690] ss:$28 sps:$4 sm:$0xff]   ;;  %v9634_v36 = vld [vmem:[#allocation6 + $0x120] ss:$28 sps:$4 sm:$0xff]  }
 0x27d   :  { %6218 = vmatpush1.bf16.msra.mxu1 %v9565_v37  ;;  %3475 = vmatpush1.bf16.msra.mxu0 %v9568_v38  ;;  %v9639_v37 = vld [vmem:[#allocation6 + $0x6cc] ss:$28 sps:$4 sm:$0xff]   ;;  %v8789_v38 = vadd.f32 %v10599_v0, %v675_v30 }
 0x27e   :  { %6219 = vmatprep.subr.bf16.mxu1 %v9573_v39  ;;  %3476 = vmatprep.subr.bf16.mxu0 %v9576_v40  ;;  %v9642_v39 = vld [vmem:[#allocation6 + $0x15c] ss:$28 sps:$4 sm:$0xff]   ;;  %v9643_v0 = vld [vmem:[#allocation6 + $0x190] ss:$28 sps:$4 sm:$0xff]  }
 0x27f   :  { %v3657_v32 = vmax.f32 %v8789_v38, 0.0  ;;  %v9672_v38 = vld [vmem:[#allocation6 + $0x38c] ss:$28 sps:$4 sm:$0xff]  }
 0x281   :  { %6220 = vmatpush1.bf16.msra.mxu1 %v9571_v41  ;;  %3477 = vmatpush1.bf16.msra.mxu0 %v9574_v42 }
 0x282   :  { %6221 = vmatprep.subr.bf16.mxu1 %v9579_v43  ;;  %3478 = vmatprep.subr.bf16.mxu0 %v9582_v44  ;;  %v9637_v43 = vld [vmem:[#allocation6 + $0x6c8] ss:$28 sps:$4 sm:$0xff]   ;;  %v9640_v44 = vld [vmem:[#allocation6 + $0x158] ss:$28 sps:$4 sm:$0xff]  }
 0x285   :  { %6222 = vmatpush1.bf16.msra.mxu1 %v9577_v45  ;;  %3479 = vmatpush1.bf16.msra.mxu0 %v9580_v46 }
 0x286   :  { %6223 = vmatprep.subr.bf16.mxu1 %v9585_v47  ;;  %3480 = vmatprep.subr.bf16.mxu0 %v9588_v49  ;;  %v9645_v47 = vld [vmem:[#allocation6 + $0x194] ss:$28 sps:$4 sm:$0xff]  }
 0x287   :  { %v8496_v1 = vpop.f32.mrb[4].mxu1 }
 0x288   :  { %v8497_v4 = vpop.f32.mrb[5].mxu1 }
 0x289   :  { %6224 = vmatpush1.bf16.msra.mxu1 %v9583_v50  ;;  %3481 = vmatpush1.bf16.msra.mxu0 %v9586_v51  ;;  %v8498_v8 = vadd.f32 %v8497_v4, %v8496_v1  ;;  %v8499_v9 = vpop.f32.mrb[6].mxu1  ;;  %v9720_v50 = vld [vmem:[#allocation6 + $0x704] ss:$28 sps:$4 sm:$0xff]   ;;  %v9660_v4 = vld [vmem:[#allocation6 + $0x2ac] ss:$28 sps:$4 sm:$0xff]  }
 0x28a   :  { %6225 = vmatprep.subr.bf16.mxu1 %v9591_v5  ;;  %3482 = vmatprep.subr.bf16.mxu0 %v9594_v48  ;;  %v8500_v10 = vpop.f32.mrb[7].mxu1  ;;  %v9648_v5 = vld [vmem:[#allocation6 + $0x1cc] ss:$28 sps:$4 sm:$0xff]   ;;  %v9718_v48 = vld [vmem:[#allocation6 + $0x700] ss:$28 sps:$4 sm:$0xff]  }
 0x28b   :  { %v3530_v40 = vadd.f32 %v8498_v8, %v691_v34  ;;  %v9736_v1 = vld [vmem:[#allocation6 + $0x7a8] ss:$28 sps:$4 sm:$0xff]   ;;  %v9748_v10 = vld [vmem:[#allocation6 + $0x818] ss:$28 sps:$4 sm:$0xff]  }
 0x28c   :  { %v9658_v8 = vld [vmem:[#allocation6 + $0x2a8] ss:$28 sps:$4 sm:$0xff]  }
 0x28d   :  { %6226 = vmatpush1.bf16.msra.mxu1 %v9589_v52  ;;  %3483 = vmatpush1.bf16.msra.mxu0 %v9592_v53  ;;  %v10623_v52 = vpack.c.bf16 %v3657_v32, %v3657_v32  ;;  %v9726_v53 = vld [vmem:[#allocation6 + $0x73c] ss:$28 sps:$4 sm:$0xff]   ;;  %v9663_v9 = vld [vmem:[#allocation6 + $0x2e4] ss:$28 sps:$4 sm:$0xff]   ;;  %v9786_v32 = vld [vmem:[#allocation6 + $0x96c] ss:$28 sps:$4 sm:$0xff]  }
 0x28e   :  { %6227 = vmatprep.subr.bf16.mxu1 %v9597_v55  ;;  %3484 = vmatprep.subr.bf16.mxu0 %v9600_v13  ;;  %v9646_v55 = vld [vmem:[#allocation6 + $0x1c8] ss:$28 sps:$4 sm:$0xff]  }
 0x28f   :  { %v9651_v13 = vld [vmem:[#allocation6 + $0x204] ss:$28 sps:$4 sm:$0xff]  }
 0x291   :  { %6228 = vmatpush1.bf16.msra.mxu1 %v9595_v56  ;;  %3485 = vmatpush1.bf16.msra.mxu0 %v9598_v58  ;;  %v9724_v56 = vld [vmem:[#allocation6 + $0x738] ss:$28 sps:$4 sm:$0xff]  }
 0x292   :  { %6229 = vmatprep.subr.bf16.mxu1 %v9603_v59  ;;  %6334 = vmatprep.subr.bf16.mxu0 %v9606_v17  ;;  %v9732_v58 = vld [vmem:[#allocation6 + $0x774] ss:$28 sps:$4 sm:$0xff]   ;;  %v9649_v59 = vld [vmem:[#allocation6 + $0x200] ss:$28 sps:$4 sm:$0xff]  }
 0x293   :  { %v9654_v17 = vld [vmem:[#allocation6 + $0x23c] ss:$28 sps:$4 sm:$0xff]  }
 0x294   :  { %3487 = vmatmul.mubr.bf16.vlgmr.msra.gmra.mrb[4].mxu0 %v10564_v33  ;;  %v9621_v33 = vld [vmem:[#allocation6 + $0x624] ss:$28 sps:$4 sm:$0xff]  }
 0x295   :  { %6230 = vmatpush1.bf16.msra.mxu1 %v9601_v60  ;;  %6335 = vmatpush1.bf16.msra.mxu0 %v9604_v61  ;;  %v9730_v60 = vld [vmem:[#allocation6 + $0x770] ss:$28 sps:$4 sm:$0xff]  }
 0x296   :  { %6366 = vmatprep.mubr.bf16.mxu0 %v10601_v20  ;;  %6231 = vmatprep.subr.bf16.mxu1 %v9609_v62  ;;  %v9738_v61 = vld [vmem:[#allocation6 + $0x7ac] ss:$28 sps:$4 sm:$0xff]   ;;  %v9652_v62 = vld [vmem:[#allocation6 + $0x238] ss:$28 sps:$4 sm:$0xff]  }
 0x297   :  { %6336 = vmatprep.subr.bf16.mxu0 %v9612_v63  ;;  %v9657_v63 = vld [vmem:[#allocation6 + $0x274] ss:$28 sps:$4 sm:$0xff]  }
 0x299   :  { %6232 = vmatpush1.bf16.msra.mxu1 %v9607_v2  ;;  %6337 = vmatpush1.bf16.msra.mxu0 %v9610_v3  ;;  %v9744_v2 = vld [vmem:[#allocation6 + $0x7e4] ss:$28 sps:$4 sm:$0xff]   ;;  %v9655_v3 = vld [vmem:[#allocation6 + $0x270] ss:$28 sps:$4 sm:$0xff]  }
 0x29a   :  { %6233 = vmatprep.subr.bf16.mxu1 %v9615_v6  ;;  %6338 = vmatprep.subr.bf16.mxu0 %v9618_v7  ;;  %v9742_v6 = vld [vmem:[#allocation6 + $0x7e0] ss:$28 sps:$4 sm:$0xff]  }
 0x29b   :  { %v9750_v7 = vld [vmem:[#allocation6 + $0x81c] ss:$28 sps:$4 sm:$0xff]  }
 0x29d   :  { %6234 = vmatpush1.bf16.msra.mxu1 %v9613_v11  ;;  %6339 = vmatpush1.bf16.msra.mxu0 %v9616_v12  ;;  %v9756_v11 = vld [vmem:[#allocation6 + $0x854] ss:$28 sps:$4 sm:$0xff]   ;;  %v9661_v12 = vld [vmem:[#allocation6 + $0x2e0] ss:$28 sps:$4 sm:$0xff]  }
 0x29e   :  { %6235 = vmatprep.subr.bf16.mxu1 %v9621_v33  ;;  %6340 = vmatprep.subr.bf16.mxu0 %v9624_v14  ;;  %v9666_v33 = vld [vmem:[#allocation6 + $0x31c] ss:$28 sps:$4 sm:$0xff]   ;;  %v9754_v14 = vld [vmem:[#allocation6 + $0x850] ss:$28 sps:$4 sm:$0xff]  }
 0x2a1   :  { %6236 = vmatpush1.bf16.msra.mxu1 %v9619_v16  ;;  %6341 = vmatpush1.bf16.msra.mxu0 %v9622_v18  ;;  %v9762_v16 = vld [vmem:[#allocation6 + $0x88c] ss:$28 sps:$4 sm:$0xff]   ;;  %v9664_v18 = vld [vmem:[#allocation6 + $0x318] ss:$28 sps:$4 sm:$0xff]  }
 0x2a2   :  { %6237 = vmatprep.subr.bf16.mxu1 %v9627_v19  ;;  %6342 = vmatprep.subr.bf16.mxu0 %v9630_v21  ;;  %v9760_v21 = vld [vmem:[#allocation6 + $0x888] ss:$28 sps:$4 sm:$0xff]  }
 0x2a5   :  { %6238 = vmatpush1.bf16.msra.mxu1 %v9625_v25  ;;  %6343 = vmatpush1.bf16.msra.mxu0 %v9628_v26  ;;  %v9669_v25 = vld [vmem:[#allocation6 + $0x354] ss:$28 sps:$4 sm:$0xff]  }
 0x2a6   :  { %6239 = vmatprep.subr.bf16.mxu1 %v9633_v29  ;;  %6344 = vmatprep.subr.bf16.mxu0 %v9636_v31  ;;  %v9768_v29 = vld [vmem:[#allocation6 + $0x8c4] ss:$28 sps:$4 sm:$0xff]  }
 0x2a7   :  { %v8518_v41 = vpop.f32.mrb[8].mxu1 }
 0x2a8   :  { %v8519_v42 = vpop.f32.mrb[9].mxu1 }
 0x2a9   :  { %6240 = vmatpush1.bf16.msra.mxu1 %v9631_v35  ;;  %6345 = vmatpush1.bf16.msra.mxu0 %v9634_v36  ;;  %v8520_v45 = vadd.f32 %v8519_v42, %v8518_v41  ;;  %v8521_v46 = vpop.f32.mrb[10].mxu1  ;;  %v9667_v35 = vld [vmem:[#allocation6 + $0x350] ss:$28 sps:$4 sm:$0xff]   ;;  %v9675_v41 = vld [vmem:[#allocation6 + $0x3c4] ss:$28 sps:$4 sm:$0xff]  }
 0x2aa   :  { %6241 = vmatprep.subr.bf16.mxu1 %v9639_v37  ;;  %6346 = vmatprep.subr.bf16.mxu0 %v9642_v39  ;;  %v8522_v49 = vpop.f32.mrb[11].mxu1  ;;  %v9766_v37 = vld [vmem:[#allocation6 + $0x8c0] ss:$28 sps:$4 sm:$0xff]   ;;  %v9772_v42 = vld [vmem:[#allocation6 + $0x8f8] ss:$28 sps:$4 sm:$0xff]  }
 0x2ab   :  { %v10621_v51 = vadd.f32 %v8520_v45, %v3530_v40  ;;  %v9774_v39 = vld [vmem:[#allocation6 + $0x8fc] ss:$28 sps:$4 sm:$0xff]   ;;  %v9670_v40 = vld [vmem:[#allocation6 + $0x388] ss:$28 sps:$4 sm:$0xff]   ;;  %v9778_v46 = vld [vmem:[#allocation6 + $0x930] ss:$28 sps:$4 sm:$0xff]  }
 0x2ac   :  { %v9678_v45 = vld [vmem:[#allocation6 + $0x3fc] ss:$28 sps:$4 sm:$0xff]   ;;  %v9681_v49 = vld [vmem:[#allocation6 + $0x434] ss:$28 sps:$4 sm:$0xff]  }
 0x2ad   :  { %6242 = vmatpush1.bf16.msra.mxu1 %v9637_v43  ;;  %6347 = vmatpush1.bf16.msra.mxu0 %v9640_v44  ;;  %v9780_v43 = vld [vmem:[#allocation6 + $0x934] ss:$28 sps:$4 sm:$0xff]   ;;  %v9673_v44 = vld [vmem:[#allocation6 + $0x3c0] ss:$28 sps:$4 sm:$0xff]  }
 0x2ae   :  { %6348 = vmatprep.subr.bf16.mxu0 %v9645_v47  ;;  %6252 = vmatprep.subr.bf16.mxu1 %v9720_v50  ;;  %v9676_v47 = vld [vmem:[#allocation6 + $0x3f8] ss:$28 sps:$4 sm:$0xff]   ;;  %v9784_v50 = vld [vmem:[#allocation6 + $0x968] ss:$28 sps:$4 sm:$0xff]  }
 0x2b0   :  { %6244 = vmatmul.mubr.bf16.vlgmr.msra.gmra.mrb[20].mxu1 %v10623_v52 }
 0x2b1   :  { %6349 = vmatpush1.bf16.msra.mxu0 %v9643_v0  ;;  %6253 = vmatpush1.bf16.msra.mxu1 %v9718_v48  ;;  %v9679_v0 = vld [vmem:[#allocation6 + $0x430] ss:$28 sps:$4 sm:$0xff]   ;;  %v9790_v48 = vld [vmem:[#allocation6 + $0x9a0] ss:$28 sps:$4 sm:$0xff]  }
 0x2b2   :  { %6350 = vmatprep.subr.bf16.mxu0 %v9648_v5  ;;  %6254 = vmatprep.subr.bf16.mxu1 %v9726_v53  ;;  %v9684_v5 = vld [vmem:[#allocation6 + $0x46c] ss:$28 sps:$4 sm:$0xff]   ;;  %v9798_v53 = vld [vmem:[#allocation6 + $0x9dc] ss:$28 sps:$4 sm:$0xff]  }
 0x2b5   :  { %6351 = vmatpush1.bf16.msra.mxu0 %v9646_v55  ;;  %6255 = vmatpush1.bf16.msra.mxu1 %v9724_v56  ;;  %v9682_v55 = vld [vmem:[#allocation6 + $0x468] ss:$28 sps:$4 sm:$0xff]   ;;  %v9796_v56 = vld [vmem:[#allocation6 + $0x9d8] ss:$28 sps:$4 sm:$0xff]  }
 0x2b6   :  { %6352 = vmatprep.subr.bf16.mxu0 %v9651_v13  ;;  %6256 = vmatprep.subr.bf16.mxu1 %v9732_v58  ;;  %v9687_v13 = vld [vmem:[#allocation6 + $0x4a4] ss:$28 sps:$4 sm:$0xff]  }
 0x2b7   :  { %v9685_v58 = vld [vmem:[#allocation6 + $0x4a0] ss:$28 sps:$4 sm:$0xff]  }
 0x2b9   :  { %6353 = vmatpush1.bf16.msra.mxu0 %v9649_v59  ;;  %6257 = vmatpush1.bf16.msra.mxu1 %v9730_v60  ;;  %v9690_v59 = vld [vmem:[#allocation6 + $0x4dc] ss:$28 sps:$4 sm:$0xff]  }
 0x2ba   :  { %6354 = vmatprep.subr.bf16.mxu0 %v9654_v17  ;;  %6258 = vmatprep.subr.bf16.mxu1 %v9738_v61  ;;  %v9804_v17 = vld [vmem:[#allocation6 + $0xa14] ss:$28 sps:$4 sm:$0xff]  }
 0x2bb   :  { %v9802_v61 = vld [vmem:[#allocation6 + $0xa10] ss:$28 sps:$4 sm:$0xff]  }
 0x2bd   :  { %6355 = vmatpush1.bf16.msra.mxu0 %v9652_v62  ;;  %6259 = vmatpush1.bf16.msra.mxu1 %v9736_v1 }
 0x2be   :  { %6356 = vmatprep.subr.bf16.mxu0 %v9657_v63  ;;  %6260 = vmatprep.subr.bf16.mxu1 %v9744_v2  ;;  %v9688_v63 = vld [vmem:[#allocation6 + $0x4d8] ss:$28 sps:$4 sm:$0xff]  }
 0x2c1   :  { %6357 = vmatpush1.bf16.msra.mxu0 %v9655_v3  ;;  %6261 = vmatpush1.bf16.msra.mxu1 %v9742_v6  ;;  %v9693_v3 = vld [vmem:[#allocation6 + $0x514] ss:$28 sps:$4 sm:$0xff]  }
 0x2c2   :  { %6358 = vmatprep.subr.bf16.mxu0 %v9660_v4  ;;  %6262 = vmatprep.subr.bf16.mxu1 %v9750_v7  ;;  %v9810_v4 = vld [vmem:[#allocation6 + $0xa4c] ss:$28 sps:$4 sm:$0xff]  }
 0x2c5   :  { %6359 = vmatpush1.bf16.msra.mxu0 %v9658_v8  ;;  %6263 = vmatpush1.bf16.msra.mxu1 %v9748_v10  ;;  %v9808_v8 = vld [vmem:[#allocation6 + $0xa48] ss:$28 sps:$4 sm:$0xff]  }
 0x2c6   :  { %6360 = vmatprep.subr.bf16.mxu0 %v9663_v9  ;;  %6264 = vmatprep.subr.bf16.mxu1 %v9756_v11  ;;  %v9691_v9 = vld [vmem:[#allocation6 + $0x510] ss:$28 sps:$4 sm:$0xff]   ;;  %v9816_v11 = vld [vmem:[#allocation6 + $0xa84] ss:$28 sps:$4 sm:$0xff]  }
 0x2c7   :  { %v8540_v19 = vpop.f32.mrb[12].mxu1  ;;  %v9696_v10 = vld [vmem:[#allocation6 + $0x54c] ss:$28 sps:$4 sm:$0xff]  }
 0x2c8   :  { %v8541_v26 = vpop.f32.mrb[13].mxu1 }
 0x2c9   :  { %6361 = vmatpush1.bf16.msra.mxu0 %v9661_v12  ;;  %v8542_v30 = vadd.f32 %v8541_v26, %v8540_v19  ;;  %v8543_v31 = vpop.f32.mrb[14].mxu1  ;;  %6265 = vmatpush1.bf16.msra.mxu1 %v9754_v14  ;;  %v9694_v12 = vld [vmem:[#allocation6 + $0x548] ss:$28 sps:$4 sm:$0xff]   ;;  %v9697_v14 = vld [vmem:[#allocation6 + $0x580] ss:$28 sps:$4 sm:$0xff]  }
 0x2ca   :  { %6362 = vmatprep.subr.bf16.mxu0 %v9666_v33  ;;  %v8544_v34 = vpop.f32.mrb[15].mxu1  ;;  %6266 = vmatprep.subr.bf16.mxu1 %v9762_v16  ;;  %v9699_v33 = vld [vmem:[#allocation6 + $0x584] ss:$28 sps:$4 sm:$0xff]   ;;  %v9702_v16 = vld [vmem:[#allocation6 + $0x5bc] ss:$28 sps:$4 sm:$0xff]  }
 0x2cb   :  { %v10627_v36 = vadd.f32 %v8542_v30, %v10621_v51  ;;  %v9792_v51 = vld [vmem:[#allocation6 + $0x9a4] ss:$28 sps:$4 sm:$0xff]   ;;  %v9705_v19 = vld [vmem:[#allocation6 + $0x5f4] ss:$28 sps:$4 sm:$0xff]   ;;  %v9714_v31 = vld [vmem:[#allocation6 + $0x69c] ss:$28 sps:$4 sm:$0xff]  }
 0x2cc   :  { %v9706_v26 = vld [vmem:[#allocation6 + $0x628] ss:$28 sps:$4 sm:$0xff]   ;;  %v9709_v30 = vld [vmem:[#allocation6 + $0x660] ss:$28 sps:$4 sm:$0xff]   ;;  %v9712_v34 = vld [vmem:[#allocation6 + $0x698] ss:$28 sps:$4 sm:$0xff]  }
 0x2cd   :  { %6363 = vmatpush1.bf16.msra.mxu0 %v9664_v18  ;;  %6267 = vmatpush1.bf16.msra.mxu1 %v9760_v21  ;;  %v9700_v18 = vld [vmem:[#allocation6 + $0x5b8] ss:$28 sps:$4 sm:$0xff]   ;;  %v9703_v21 = vld [vmem:[#allocation6 + $0x5f0] ss:$28 sps:$4 sm:$0xff]  }
 0x2ce   :  { %6364 = vmatprep.subr.bf16.mxu0 %v9669_v25  ;;  %6268 = vmatprep.subr.bf16.mxu1 %v9768_v29  ;;  %v9708_v25 = vld [vmem:[#allocation6 + $0x62c] ss:$28 sps:$4 sm:$0xff]   ;;  %v9711_v29 = vld [vmem:[#allocation6 + $0x664] ss:$28 sps:$4 sm:$0xff]  }
 0x2d1   :  { %6365 = vmatpush1.bf16.msra.mxu0 %v9667_v35  ;;  %6269 = vmatpush1.bf16.msra.mxu1 %v9766_v37  ;;  %v9717_v35 = vld [vmem:[#allocation6 + $0x6d4] ss:$28 sps:$4 sm:$0xff]   ;;  %v9723_v37 = vld [vmem:[#allocation6 + $0x70c] ss:$28 sps:$4 sm:$0xff]  }
 0x2d2   :  { %6375 = vmatprep.subr.bf16.mxu0 %v9672_v38  ;;  %6270 = vmatprep.subr.bf16.mxu1 %v9774_v39  ;;  %v9721_v38 = vld [vmem:[#allocation6 + $0x708] ss:$28 sps:$4 sm:$0xff]  }
 0x2d3   :  { %v9729_v39 = vld [vmem:[#allocation6 + $0x744] ss:$28 sps:$4 sm:$0xff]  }
 0x2d4   :  { %6367 = vmatmul.mubr.bf16.vlgmr.msra.gmra.mrb[8].mxu0 %v10603_v24 }
 0x2d5   :  { %6376 = vmatpush1.bf16.msra.mxu0 %v9670_v40  ;;  %6407 = vmatprep.mubr.bf16.mxu0 %v10606_v28  ;;  %v9727_v40 = vld [vmem:[#allocation6 + $0x740] ss:$28 sps:$4 sm:$0xff]  }
 0x2d6   :  { %6377 = vmatprep.subr.bf16.mxu0 %v9675_v41  ;;  %6271 = vmatpush1.bf16.msra.mxu1 %v9772_v42  ;;  %v9735_v41 = vld [vmem:[#allocation6 + $0x77c] ss:$28 sps:$4 sm:$0xff]  }
 0x2d7   :  { %6272 = vmatprep.subr.bf16.mxu1 %v9780_v43  ;;  %v9733_v42 = vld [vmem:[#allocation6 + $0x778] ss:$28 sps:$4 sm:$0xff]  }
 0x2d8   :  { %v9741_v43 = vld [vmem:[#allocation6 + $0x7b4] ss:$28 sps:$4 sm:$0xff]  }
 0x2d9   :  { %6378 = vmatpush1.bf16.msra.mxu0 %v9673_v44  ;;  %v9739_v44 = vld [vmem:[#allocation6 + $0x7b0] ss:$28 sps:$4 sm:$0xff]  }
 0x2da   :  { %6379 = vmatprep.subr.bf16.mxu0 %v9678_v45  ;;  %6273 = vmatpush1.bf16.msra.mxu1 %v9778_v46  ;;  %v9747_v45 = vld [vmem:[#allocation6 + $0x7ec] ss:$28 sps:$4 sm:$0xff]  }
 0x2db   :  { %6274 = vmatprep.subr.bf16.mxu1 %v9786_v32  ;;  %v9745_v46 = vld [vmem:[#allocation6 + $0x7e8] ss:$28 sps:$4 sm:$0xff]  }
 0x2dc   :  { %v9753_v32 = vld [vmem:[#allocation6 + $0x824] ss:$28 sps:$4 sm:$0xff]  }
 0x2dd   :  { %6380 = vmatpush1.bf16.msra.mxu0 %v9676_v47  ;;  %v9751_v47 = vld [vmem:[#allocation6 + $0x820] ss:$28 sps:$4 sm:$0xff]  }
 0x2de   :  { %6381 = vmatprep.subr.bf16.mxu0 %v9681_v49  ;;  %6275 = vmatpush1.bf16.msra.mxu1 %v9784_v50  ;;  %v9759_v49 = vld [vmem:[#allocation6 + $0x85c] ss:$28 sps:$4 sm:$0xff]  }
 0x2df   :  { %6276 = vmatprep.subr.bf16.mxu1 %v9792_v51  ;;  %v9757_v50 = vld [vmem:[#allocation6 + $0x858] ss:$28 sps:$4 sm:$0xff]  }
 0x2e0   :  { %v9765_v51 = vld [vmem:[#allocation6 + $0x894] ss:$28 sps:$4 sm:$0xff]  }
 0x2e1   :  { %6382 = vmatpush1.bf16.msra.mxu0 %v9679_v0  ;;  %v9763_v0 = vld [vmem:[#allocation6 + $0x890] ss:$28 sps:$4 sm:$0xff]  }
 0x2e2   :  { %6383 = vmatprep.subr.bf16.mxu0 %v9684_v5  ;;  %6277 = vmatpush1.bf16.msra.mxu1 %v9790_v48  ;;  %v9771_v5 = vld [vmem:[#allocation6 + $0x8cc] ss:$28 sps:$4 sm:$0xff]  }
 0x2e3   :  { %6278 = vmatprep.subr.bf16.mxu1 %v9798_v53  ;;  %v9769_v48 = vld [vmem:[#allocation6 + $0x8c8] ss:$28 sps:$4 sm:$0xff]  }
 0x2e4   :  { %v9777_v53 = vld [vmem:[#allocation6 + $0x904] ss:$28 sps:$4 sm:$0xff]  }
 0x2e5   :  { %6384 = vmatpush1.bf16.msra.mxu0 %v9682_v55  ;;  %v9775_v55 = vld [vmem:[#allocation6 + $0x900] ss:$28 sps:$4 sm:$0xff]  }
 0x2e6   :  { %6385 = vmatprep.subr.bf16.mxu0 %v9687_v13  ;;  %6279 = vmatpush1.bf16.msra.mxu1 %v9796_v56  ;;  %v9783_v13 = vld [vmem:[#allocation6 + $0x93c] ss:$28 sps:$4 sm:$0xff]  }
 0x2e7   :  { %v8562_v60 = vpop.f32.mrb[16].mxu1  ;;  %6280 = vmatprep.subr.bf16.mxu1 %v9804_v17  ;;  %v9781_v56 = vld [vmem:[#allocation6 + $0x938] ss:$28 sps:$4 sm:$0xff]   ;;  %v9795_v17 = vld [vmem:[#allocation6 + $0x9ac] ss:$28 sps:$4 sm:$0xff]  }
 0x2e8   :  { %v8563_v62 = vpop.f32.mrb[17].mxu1 }
 0x2e9   :  { %6386 = vmatpush1.bf16.msra.mxu0 %v9685_v58  ;;  %v8564_v1 = vadd.f32 %v8563_v62, %v8562_v60  ;;  %v8565_v2 = vpop.f32.mrb[18].mxu1  ;;  %v9789_v58 = vld [vmem:[#allocation6 + $0x974] ss:$28 sps:$4 sm:$0xff]   ;;  %v9793_v60 = vld [vmem:[#allocation6 + $0x9a8] ss:$28 sps:$4 sm:$0xff]  }
 0x2ea   :  { %6387 = vmatprep.subr.bf16.mxu0 %v9690_v59  ;;  %6281 = vmatpush1.bf16.msra.mxu1 %v9802_v61  ;;  %v8566_v6 = vpop.f32.mrb[19].mxu1  ;;  %v9787_v59 = vld [vmem:[#allocation6 + $0x970] ss:$28 sps:$4 sm:$0xff]   ;;  %v9801_v61 = vld [vmem:[#allocation6 + $0x9e4] ss:$28 sps:$4 sm:$0xff]  }
 0x2eb   :  { %v10632_v7 = vadd.f32 %v8564_v1, %v10627_v36  ;;  %6282 = vmatprep.subr.bf16.mxu1 %v9810_v4  ;;  %v9715_v36 = vld [vmem:[#allocation6 + $0x6d0] ss:$28 sps:$4 sm:$0xff]   ;;  %v9799_v62 = vld [vmem:[#allocation6 + $0x9e0] ss:$28 sps:$4 sm:$0xff]   ;;  %v9805_v1 = vld [vmem:[#allocation6 + $0xa18] ss:$28 sps:$4 sm:$0xff]  }
 0x2ec   :  { %v9813_v2 = vld [vmem:[#allocation6 + $0xa54] ss:$28 sps:$4 sm:$0xff]   ;;  %v9819_v4 = vld [vmem:[#allocation6 + $0xa8c] ss:$28 sps:$4 sm:$0xff]   ;;  %v682_v6 = vsub.s32 4, %v10583_v54 }
 0x2ed   :  { %6388 = vmatpush1.bf16.msra.mxu0 %v9688_v63  ;;  %v9807_v63 = vld [vmem:[#allocation6 + $0xa1c] ss:$28 sps:$4 sm:$0xff]  }
 0x2ee   :  { %6389 = vmatprep.subr.bf16.mxu0 %v9693_v3  ;;  %6283 = vmatpush1.bf16.msra.mxu1 %v9808_v8  ;;  %v9811_v3 = vld [vmem:[#allocation6 + $0xa50] ss:$28 sps:$4 sm:$0xff]   ;;  %v686_v8 = vsub.s32 5, %v10583_v54  ;;  %v10144_v54 = vld [vmem:[#allocation12 + $0x10] sm:$0xff]  }
 0x2ef   :  { %6293 = vmatprep.subr.bf16.mxu1 %v9816_v11 }
 0x2f1   :  { %6390 = vmatpush1.bf16.msra.mxu0 %v9691_v9  ;;  %v10150_v9 = vld [vmem:[#allocation4] sm:$0xff] }
 0x2f2   :  { %6391 = vmatprep.subr.bf16.mxu0 %v9696_v10  ;;  %v683_v10 = vrot.slane %v10150_v9, %v682_v6  ;;  %v687_v11 = vrot.slane %v10150_v9, %v686_v8  ;;  %v9870_v9 = vld [vmem:[#allocation6 + $0x210] ss:$28 sps:$4 sm:$0xff]  }
 0x2f5   :  { %6392 = vmatpush1.bf16.msra.mxu0 %v9694_v12 }
 0x2f6   :  { %6393 = vmatprep.subr.bf16.mxu0 %v9699_v33 }
 0x2f9   :  { %6394 = vmatpush1.bf16.msra.mxu0 %v9697_v14 }
 0x2fa   :  { %6395 = vmatprep.subr.bf16.mxu0 %v9702_v16 }
 0x2fd   :  { %6396 = vmatpush1.bf16.msra.mxu0 %v9700_v18 }
 0x2fe   :  { %6397 = vmatprep.subr.bf16.mxu0 %v9705_v19 }
 0x301   :  { %6398 = vmatpush1.bf16.msra.mxu0 %v9703_v21 }
 0x302   :  { %6399 = vmatprep.subr.bf16.mxu0 %v9708_v25 }
 0x305   :  { %6400 = vmatpush1.bf16.msra.mxu0 %v9706_v26 }
 0x306   :  { %6401 = vmatprep.subr.bf16.mxu0 %v9711_v29  ;;  %v9814_v29 = vld [vmem:[#allocation6 + $0xa80] ss:$28 sps:$4 sm:$0xff]  }
 0x309   :  { %6402 = vmatpush1.bf16.msra.mxu0 %v9709_v30  ;;  %v9817_v30 = vld [vmem:[#allocation6 + $0xa88] ss:$28 sps:$4 sm:$0xff]  }
 0x30a   :  { %6403 = vmatprep.subr.bf16.mxu0 %v9714_v31 }
 0x30d   :  { %6404 = vmatpush1.bf16.msra.mxu0 %v9712_v34  ;;  %v9822_v34 = vld [vmem:[#allocation6 + $0xabc] ss:$28 sps:$4 sm:$0xff]  }
 0x30e   :  { %6405 = vmatprep.subr.bf16.mxu0 %v9717_v35  ;;  %v9825_v35 = vld [vmem:[#allocation6 + $0xac4] ss:$28 sps:$4 sm:$0xff]  }
 0x311   :  { %6406 = vmatpush1.bf16.msra.mxu0 %v9715_v36  ;;  %v9820_v36 = vld [vmem:[#allocation6 + $0xab8] ss:$28 sps:$4 sm:$0xff]  }
 0x312   :  { %6416 = vmatprep.subr.bf16.mxu0 %v9723_v37  ;;  %v9823_v37 = vld [vmem:[#allocation6 + $0xac0] ss:$28 sps:$4 sm:$0xff]  }
 0x314   :  { %6408 = vmatmul.mubr.bf16.vlgmr.msra.gmra.mrb[8].mxu0 %v10623_v52 }
 0x315   :  { %6417 = vmatpush1.bf16.msra.mxu0 %v9721_v38  ;;  %v9828_v38 = vld [vmem:[#allocation6 + $0xaf4] ss:$28 sps:$4 sm:$0xff]  }
 0x316   :  { %6418 = vmatprep.subr.bf16.mxu0 %v9729_v39  ;;  %v9831_v39 = vld [vmem:[#allocation6 + $0xafc] ss:$28 sps:$4 sm:$0xff]  }
 0x319   :  { %6419 = vmatpush1.bf16.msra.mxu0 %v9727_v40  ;;  %v10349_v40 = vmov 0  }
 0x31a   :  { %6420 = vmatprep.subr.bf16.mxu0 %v9735_v41  ;;  %v9826_v41 = vld [vmem:[#allocation6 + $0xaf0] ss:$28 sps:$4 sm:$0xff]  }
 0x31d   :  { %6421 = vmatpush1.bf16.msra.mxu0 %v9733_v42  ;;  %v9829_v42 = vld [vmem:[#allocation6 + $0xaf8] ss:$28 sps:$4 sm:$0xff]  }
 0x31e   :  { %6422 = vmatprep.subr.bf16.mxu0 %v9741_v43  ;;  %v9834_v43 = vld [vmem:[#allocation6 + $0xb2c] ss:$28 sps:$4 sm:$0xff]  }
 0x321   :  { %6423 = vmatpush1.bf16.msra.mxu0 %v9739_v44  ;;  %v9837_v44 = vld [vmem:[#allocation6 + $0xb34] ss:$28 sps:$4 sm:$0xff]  }
 0x322   :  { %6424 = vmatprep.subr.bf16.mxu0 %v9747_v45  ;;  %v9832_v45 = vld [vmem:[#allocation6 + $0xb28] ss:$28 sps:$4 sm:$0xff]  }
 0x325   :  { %6425 = vmatpush1.bf16.msra.mxu0 %v9745_v46  ;;  %v9835_v46 = vld [vmem:[#allocation6 + $0xb30] ss:$28 sps:$4 sm:$0xff]  }
 0x326   :  { %6426 = vmatprep.subr.bf16.mxu0 %v9753_v32  ;;  %v9840_v32 = vld [vmem:[#allocation6 + $0xb64] ss:$28 sps:$4 sm:$0xff]  }
 0x329   :  { %6427 = vmatpush1.bf16.msra.mxu0 %v9751_v47  ;;  %v9843_v47 = vld [vmem:[#allocation6 + $0xb6c] ss:$28 sps:$4 sm:$0xff]  }
 0x32a   :  { %6428 = vmatprep.subr.bf16.mxu0 %v9759_v49  ;;  %v9838_v49 = vld [vmem:[#allocation6 + $0xb60] ss:$28 sps:$4 sm:$0xff]  }
 0x32d   :  { %6429 = vmatpush1.bf16.msra.mxu0 %v9757_v50  ;;  %v9841_v50 = vld [vmem:[#allocation6 + $0xb68] ss:$28 sps:$4 sm:$0xff]  }
 0x32e   :  { %6430 = vmatprep.subr.bf16.mxu0 %v9765_v51  ;;  %v9846_v51 = vld [vmem:[#allocation6 + $0xb9c] ss:$28 sps:$4 sm:$0xff]  }
 0x331   :  { %6431 = vmatpush1.bf16.msra.mxu0 %v9763_v0  ;;  %v9849_v0 = vld [vmem:[#allocation6 + $0xba4] ss:$28 sps:$4 sm:$0xff]  }
 0x332   :  { %6432 = vmatprep.subr.bf16.mxu0 %v9771_v5  ;;  %v9844_v5 = vld [vmem:[#allocation6 + $0xb98] ss:$28 sps:$4 sm:$0xff]  }
 0x335   :  { %6433 = vmatpush1.bf16.msra.mxu0 %v9769_v48  ;;  %v9847_v48 = vld [vmem:[#allocation6 + $0xba0] ss:$28 sps:$4 sm:$0xff]  }
 0x336   :  { %6434 = vmatprep.subr.bf16.mxu0 %v9777_v53  ;;  %v9852_v53 = vld [vmem:[#allocation6 + $0xbd4] ss:$28 sps:$4 sm:$0xff]  }
 0x339   :  { %6435 = vmatpush1.bf16.msra.mxu0 %v9775_v55  ;;  %v9855_v55 = vld [vmem:[#allocation6 + $0xbdc] ss:$28 sps:$4 sm:$0xff]  }
 0x33a   :  { %6436 = vmatprep.subr.bf16.mxu0 %v9783_v13  ;;  %v9850_v13 = vld [vmem:[#allocation6 + $0xbd0] ss:$28 sps:$4 sm:$0xff]  }
 0x33d   :  { %6437 = vmatpush1.bf16.msra.mxu0 %v9781_v56  ;;  %v9853_v56 = vld [vmem:[#allocation6 + $0xbd8] ss:$28 sps:$4 sm:$0xff]  }
 0x33e   :  { %6438 = vmatprep.subr.bf16.mxu0 %v9789_v58  ;;  %v9858_v58 = vld [vmem:[#allocation6 + $0xc0c] ss:$28 sps:$4 sm:$0xff]  }
 0x341   :  { %6439 = vmatpush1.bf16.msra.mxu0 %v9787_v59  ;;  %v9861_v59 = vld [vmem:[#allocation6 + $0xc14] ss:$28 sps:$4 sm:$0xff]  }
 0x342   :  { %6440 = vmatprep.subr.bf16.mxu0 %v9795_v17  ;;  %v9856_v17 = vld [vmem:[#allocation6 + $0xc08] ss:$28 sps:$4 sm:$0xff]  }
 0x345   :  { %6441 = vmatpush1.bf16.msra.mxu0 %v9793_v60  ;;  %v9859_v60 = vld [vmem:[#allocation6 + $0xc10] ss:$28 sps:$4 sm:$0xff]  }
 0x346   :  { %6442 = vmatprep.subr.bf16.mxu0 %v9801_v61  ;;  %v3661_v61 = vmax.f32 %v10632_v7, 0.0  ;;  %v9867_v7 = vld [vmem:[#allocation6 + $0x48] ss:$28 sps:$4 sm:$0xff]  }
 0x349   :  { %6443 = vmatpush1.bf16.msra.mxu0 %v9799_v62  ;;  %v9864_v62 = vld [vmem:[#allocation6 + $0x14] ss:$28 sps:$4 sm:$0xff]  }
 0x34a   :  { %6444 = vmatprep.subr.bf16.mxu0 %v9807_v63  ;;  %v9865_v63 = vld [vmem:[#allocation6 + $0x1d8] ss:$28 sps:$4 sm:$0xff]  }
 0x34d   :  { %6445 = vmatpush1.bf16.msra.mxu0 %v9805_v1  ;;  %v9862_v1 = vld [vmem:[#allocation6 + $0x10] ss:$28 sps:$4 sm:$0xff]  }
 0x34e   :  { %6446 = vmatprep.subr.bf16.mxu0 %v9813_v2  ;;  %v10652_v2 = vpack.c.bf16 %v3661_v61, %v3661_v61  ;;  %v9924_v61 = vld [vmem:[#allocation6 + $0x2b4] ss:$28 sps:$4 sm:$0xff]  }
 0x351   :  { %6447 = vmatpush1.bf16.msra.mxu0 %v9811_v3  ;;  %v9866_v3 = vld [vmem:[#allocation6 + $0x18] ss:$28 sps:$4 sm:$0xff]  }
 0x352   :  { %6457 = vmatprep.subr.bf16.mxu0 %v9819_v4  ;;  %v9869_v4 = vld [vmem:[#allocation6 + $0x4c] ss:$28 sps:$4 sm:$0xff]  }
 0x367   :  { %v3488_v12 = vpop.f32.mrb[4].mxu0 }
 0x368   :  { %v8791_v33 = vadd.f32 %v3488_v12, %v683_v10  ;;  %v3490_v14 = vpop.f32.mrb[5].mxu0  ;;  %v9871_v10 = vld [vmem:[#allocation6 + $0x50] ss:$28 sps:$4 sm:$0xff]   ;;  %v9875_v12 = vld [vmem:[#allocation6 + $0x248] ss:$28 sps:$4 sm:$0xff]  }
 0x369   :  { %v8792_v16 = vadd.f32 %v3490_v14, %v687_v11  ;;  %v3492_v18 = vpop.f32.mrb[6].mxu0  ;;  %v9874_v11 = vld [vmem:[#allocation6 + $0x84] ss:$28 sps:$4 sm:$0xff]  }
 0x36a   :  { %v3659_v19 = vmax.f32 %v8791_v33, 0.0  ;;  %v3493_v21 = vpop.f32.mrb[7].mxu0  ;;  %v9872_v33 = vld [vmem:[#allocation6 + $0x80] ss:$28 sps:$4 sm:$0xff]   ;;  %v9876_v14 = vld [vmem:[#allocation6 + $0x88] ss:$28 sps:$4 sm:$0xff]  }
 0x36b   :  { %v3660_v25 = vmax.f32 %v8792_v16, 0.0  ;;  %v9879_v16 = vld [vmem:[#allocation6 + $0xbc] ss:$28 sps:$4 sm:$0xff]  }
 0x36c   :  { %v10643_v31 = vpack.c.bf16 %v3659_v19, %v3659_v19  ;;  %v9880_v18 = vld [vmem:[#allocation6 + $0x280] ss:$28 sps:$4 sm:$0xff]   ;;  %v9877_v19 = vld [vmem:[#allocation6 + $0xb8] ss:$28 sps:$4 sm:$0xff]  }
 0x36d   :  { %v10641_v26 = vpack.c.bf16 %v3660_v25, %v3660_v25  ;;  %v9881_v21 = vld [vmem:[#allocation6 + $0xc0] ss:$28 sps:$4 sm:$0xff]   ;;  %v9884_v25 = vld [vmem:[#allocation6 + $0xf4] ss:$28 sps:$4 sm:$0xff]  }
 0x36f   :  { %6284 = vmatprep.mubr.bf16.mxu1 %v10641_v26  ;;  %6448 = vmatprep.mubr.bf16.mxu0 %v10641_v26 }
 0x370   :  { %6285 = vmatmul.mubr.bf16.vlgmr.msra.gmra.mrb[20].mxu1 %v10643_v31  ;;  %6449 = vmatmul.mubr.bf16.vlgmr.msra.gmra.mrb[8].mxu0 %v10643_v31 }
 0x371   :  { %6294 = vmatpush1.bf16.msra.mxu1 %v9814_v29  ;;  %6458 = vmatpush1.bf16.msra.mxu0 %v9817_v30  ;;  %v9882_v29 = vld [vmem:[#allocation6 + $0xf0] ss:$28 sps:$4 sm:$0xff]   ;;  %v9886_v30 = vld [vmem:[#allocation6 + $0xf8] ss:$28 sps:$4 sm:$0xff]  }
 0x372   :  { %6295 = vmatprep.subr.bf16.mxu1 %v9822_v34  ;;  %6459 = vmatprep.subr.bf16.mxu0 %v9825_v35  ;;  %v9889_v34 = vld [vmem:[#allocation6 + $0x12c] ss:$28 sps:$4 sm:$0xff]  }
 0x373   :  { %6325 = vmatprep.mubr.bf16.mxu1 %v10349_v40  ;;  %6489 = vmatprep.mubr.bf16.mxu0 %v10349_v40  ;;  %v9890_v35 = vld [vmem:[#allocation6 + $0x2f0] ss:$28 sps:$4 sm:$0xff]  }
 0x375   :  { %6296 = vmatpush1.bf16.msra.mxu1 %v9820_v36  ;;  %6460 = vmatpush1.bf16.msra.mxu0 %v9823_v37  ;;  %v9887_v36 = vld [vmem:[#allocation6 + $0x128] ss:$28 sps:$4 sm:$0xff]   ;;  %v9891_v37 = vld [vmem:[#allocation6 + $0x130] ss:$28 sps:$4 sm:$0xff]  }
 0x376   :  { %6297 = vmatprep.subr.bf16.mxu1 %v9828_v38  ;;  %6461 = vmatprep.subr.bf16.mxu0 %v9831_v39  ;;  %v9894_v38 = vld [vmem:[#allocation6 + $0x164] ss:$28 sps:$4 sm:$0xff]  }
 0x377   :  { %v9895_v39 = vld [vmem:[#allocation6 + $0x328] ss:$28 sps:$4 sm:$0xff]  }
 0x379   :  { %6298 = vmatpush1.bf16.msra.mxu1 %v9826_v41  ;;  %6462 = vmatpush1.bf16.msra.mxu0 %v9829_v42  ;;  %v9892_v41 = vld [vmem:[#allocation6 + $0x160] ss:$28 sps:$4 sm:$0xff]   ;;  %v9896_v42 = vld [vmem:[#allocation6 + $0x168] ss:$28 sps:$4 sm:$0xff]  }
 0x37a   :  { %6299 = vmatprep.subr.bf16.mxu1 %v9834_v43  ;;  %6463 = vmatprep.subr.bf16.mxu0 %v9837_v44  ;;  %v9899_v43 = vld [vmem:[#allocation6 + $0x19c] ss:$28 sps:$4 sm:$0xff]  }
 0x37b   :  { %v9900_v44 = vld [vmem:[#allocation6 + $0x360] ss:$28 sps:$4 sm:$0xff]  }
 0x37d   :  { %6300 = vmatpush1.bf16.msra.mxu1 %v9832_v45  ;;  %6464 = vmatpush1.bf16.msra.mxu0 %v9835_v46  ;;  %v9897_v45 = vld [vmem:[#allocation6 + $0x198] ss:$28 sps:$4 sm:$0xff]   ;;  %v9901_v46 = vld [vmem:[#allocation6 + $0x1a0] ss:$28 sps:$4 sm:$0xff]  }
 0x37e   :  { %6301 = vmatprep.subr.bf16.mxu1 %v9840_v32  ;;  %6465 = vmatprep.subr.bf16.mxu0 %v9843_v47  ;;  %v9904_v32 = vld [vmem:[#allocation6 + $0x1d4] ss:$28 sps:$4 sm:$0xff]  }
 0x37f   :  { %v9905_v47 = vld [vmem:[#allocation6 + $0x558] ss:$28 sps:$4 sm:$0xff]  }
 0x381   :  { %6302 = vmatpush1.bf16.msra.mxu1 %v9838_v49  ;;  %6466 = vmatpush1.bf16.msra.mxu0 %v9841_v50  ;;  %v9902_v49 = vld [vmem:[#allocation6 + $0x1d0] ss:$28 sps:$4 sm:$0xff]   ;;  %v9906_v50 = vld [vmem:[#allocation6 + $0x398] ss:$28 sps:$4 sm:$0xff]  }
 0x382   :  { %6303 = vmatprep.subr.bf16.mxu1 %v9846_v51  ;;  %6467 = vmatprep.subr.bf16.mxu0 %v9849_v0  ;;  %v9909_v51 = vld [vmem:[#allocation6 + $0x20c] ss:$28 sps:$4 sm:$0xff]  }
 0x383   :  { %v9910_v0 = vld [vmem:[#allocation6 + $0x590] ss:$28 sps:$4 sm:$0xff]  }
 0x385   :  { %6304 = vmatpush1.bf16.msra.mxu1 %v9844_v5  ;;  %6468 = vmatpush1.bf16.msra.mxu0 %v9847_v48  ;;  %v9907_v5 = vld [vmem:[#allocation6 + $0x208] ss:$28 sps:$4 sm:$0xff]   ;;  %v9911_v48 = vld [vmem:[#allocation6 + $0x3d0] ss:$28 sps:$4 sm:$0xff]  }
 0x386   :  { %6305 = vmatprep.subr.bf16.mxu1 %v9852_v53  ;;  %6469 = vmatprep.subr.bf16.mxu0 %v9855_v55  ;;  %v9914_v53 = vld [vmem:[#allocation6 + $0x244] ss:$28 sps:$4 sm:$0xff]  }
 0x387   :  { %v9915_v55 = vld [vmem:[#allocation6 + $0x5c8] ss:$28 sps:$4 sm:$0xff]  }
 0x389   :  { %6306 = vmatpush1.bf16.msra.mxu1 %v9850_v13  ;;  %6470 = vmatpush1.bf16.msra.mxu0 %v9853_v56  ;;  %v9912_v13 = vld [vmem:[#allocation6 + $0x240] ss:$28 sps:$4 sm:$0xff]   ;;  %v9916_v56 = vld [vmem:[#allocation6 + $0x408] ss:$28 sps:$4 sm:$0xff]  }
 0x38a   :  { %6307 = vmatprep.subr.bf16.mxu1 %v9858_v58  ;;  %6471 = vmatprep.subr.bf16.mxu0 %v9861_v59  ;;  %v9919_v58 = vld [vmem:[#allocation6 + $0x27c] ss:$28 sps:$4 sm:$0xff]  }
 0x38b   :  { %v9920_v59 = vld [vmem:[#allocation6 + $0x600] ss:$28 sps:$4 sm:$0xff]  }
 0x38d   :  { %6308 = vmatpush1.bf16.msra.mxu1 %v9856_v17  ;;  %6472 = vmatpush1.bf16.msra.mxu0 %v9859_v60  ;;  %v9917_v17 = vld [vmem:[#allocation6 + $0x278] ss:$28 sps:$4 sm:$0xff]   ;;  %v9921_v60 = vld [vmem:[#allocation6 + $0x440] ss:$28 sps:$4 sm:$0xff]  }
 0x38e   :  { %6498 = vmatprep.subr.bf16.mxu1 %v9864_v62  ;;  %8568 = vmatprep.subr.bf16.mxu0 %v9865_v63  ;;  %v9925_v62 = vld [vmem:[#allocation6 + $0x638] ss:$28 sps:$4 sm:$0xff]   ;;  %v9922_v63 = vld [vmem:[#allocation6 + $0x2b0] ss:$28 sps:$4 sm:$0xff]  }
 0x390   :  { %6326 = vmatmul.mubr.bf16.vlgmr.msra.gmra.mrb[20].mxu1 %v10652_v2  ;;  %6490 = vmatmul.mubr.bf16.vlgmr.msra.gmra.mrb[8].mxu0 %v10652_v2 }
 0x391   :  { %6499 = vmatpush1.bf16.msra.mxu1 %v9862_v1  ;;  %6530 = vmatprep.mubr.bf16.mxu1 %v10601_v20  ;;  %v9926_v1 = vld [vmem:[#allocation6 + $0x478] ss:$28 sps:$4 sm:$0xff]  }
 0x392   :  { %8569 = vmatpush3.bf16.msra.mxu0 %v9866_v3  ;;  %6694 = vmatprep.mubr.bf16.mxu0 %v10601_v20  ;;  %v9885_v20 = vld [vmem:[#allocation6 + $0x2b8] ss:$28 sps:$4 sm:$0xff]   ;;  %v9929_v3 = vld [vmem:[#allocation6 + $0x2ec] ss:$28 sps:$4 sm:$0xff]  }
 0x393   :  { %6500 = vmatprep.subr.bf16.mxu1 %v9869_v4  ;;  %8570 = vmatprep.subr.bf16.mxu0 %v9870_v9  ;;  %v9930_v4 = vld [vmem:[#allocation6 + $0x670] ss:$28 sps:$4 sm:$0xff]   ;;  %v9927_v9 = vld [vmem:[#allocation6 + $0x2e8] ss:$28 sps:$4 sm:$0xff]  }
 0x395   :  { %6501 = vmatpush1.bf16.msra.mxu1 %v9867_v7  ;;  %v9931_v7 = vld [vmem:[#allocation6 + $0x4b0] ss:$28 sps:$4 sm:$0xff]  }
 0x396   :  { %8571 = vmatpush3.bf16.msra.mxu0 %v9871_v10  ;;  %6502 = vmatprep.subr.bf16.mxu1 %v9874_v11  ;;  %v9934_v10 = vld [vmem:[#allocation6 + $0x324] ss:$28 sps:$4 sm:$0xff]  }
 0x397   :  { %8572 = vmatprep.subr.bf16.mxu0 %v9875_v12  ;;  %v9935_v11 = vld [vmem:[#allocation6 + $0x6a8] ss:$28 sps:$4 sm:$0xff]   ;;  %v9932_v12 = vld [vmem:[#allocation6 + $0x320] ss:$28 sps:$4 sm:$0xff]  }
 0x399   :  { %6503 = vmatpush1.bf16.msra.mxu1 %v9872_v33  ;;  %v9936_v33 = vld [vmem:[#allocation6 + $0x4e8] ss:$28 sps:$4 sm:$0xff]  }
 0x39a   :  { %8573 = vmatpush3.bf16.msra.mxu0 %v9876_v14  ;;  %6504 = vmatprep.subr.bf16.mxu1 %v9879_v16  ;;  %v9939_v14 = vld [vmem:[#allocation6 + $0x35c] ss:$28 sps:$4 sm:$0xff]  }
 0x39b   :  { %8574 = vmatprep.subr.bf16.mxu0 %v9880_v18  ;;  %v9940_v16 = vld [vmem:[#allocation6 + $0x6e0] ss:$28 sps:$4 sm:$0xff]   ;;  %v9937_v18 = vld [vmem:[#allocation6 + $0x358] ss:$28 sps:$4 sm:$0xff]  }
 0x39d   :  { %6505 = vmatpush1.bf16.msra.mxu1 %v9877_v19  ;;  %v9941_v19 = vld [vmem:[#allocation6 + $0x520] ss:$28 sps:$4 sm:$0xff]  }
 0x39e   :  { %8575 = vmatpush3.bf16.msra.mxu0 %v9881_v21  ;;  %6506 = vmatprep.subr.bf16.mxu1 %v9884_v25  ;;  %v9944_v21 = vld [vmem:[#allocation6 + $0x394] ss:$28 sps:$4 sm:$0xff]  }
 0x39f   :  { %8576 = vmatprep.subr.bf16.mxu0 %v9885_v20  ;;  %v9945_v25 = vld [vmem:[#allocation6 + $0x8d8] ss:$28 sps:$4 sm:$0xff]   ;;  %v9942_v20 = vld [vmem:[#allocation6 + $0x390] ss:$28 sps:$4 sm:$0xff]  }
 0x3a1   :  { %6507 = vmatpush1.bf16.msra.mxu1 %v9882_v29  ;;  %v9946_v29 = vld [vmem:[#allocation6 + $0x718] ss:$28 sps:$4 sm:$0xff]  }
 0x3a2   :  { %8577 = vmatpush3.bf16.msra.mxu0 %v9886_v30  ;;  %6508 = vmatprep.subr.bf16.mxu1 %v9889_v34  ;;  %v9949_v30 = vld [vmem:[#allocation6 + $0x3cc] ss:$28 sps:$4 sm:$0xff]  }
 0x3a3   :  { %8578 = vmatprep.subr.bf16.mxu0 %v9890_v35  ;;  %v9950_v34 = vld [vmem:[#allocation6 + $0x910] ss:$28 sps:$4 sm:$0xff]   ;;  %v9947_v35 = vld [vmem:[#allocation6 + $0x3c8] ss:$28 sps:$4 sm:$0xff]  }
 0x3a5   :  { %6509 = vmatpush1.bf16.msra.mxu1 %v9887_v36  ;;  %v9951_v36 = vld [vmem:[#allocation6 + $0x750] ss:$28 sps:$4 sm:$0xff]  }
 0x3a6   :  { %8579 = vmatpush3.bf16.msra.mxu0 %v9891_v37  ;;  %6510 = vmatprep.subr.bf16.mxu1 %v9894_v38  ;;  %v9954_v37 = vld [vmem:[#allocation6 + $0x404] ss:$28 sps:$4 sm:$0xff]  }
 0x3a7   :  { %8580 = vmatprep.subr.bf16.mxu0 %v9895_v39  ;;  %v9955_v38 = vld [vmem:[#allocation6 + $0x948] ss:$28 sps:$4 sm:$0xff]   ;;  %v9952_v39 = vld [vmem:[#allocation6 + $0x400] ss:$28 sps:$4 sm:$0xff]  }
 0x3a9   :  { %6511 = vmatpush1.bf16.msra.mxu1 %v9892_v41  ;;  %v9959_v41 = vld [vmem:[#allocation6 + $0x43c] ss:$28 sps:$4 sm:$0xff]  }
 0x3aa   :  { %8581 = vmatpush3.bf16.msra.mxu0 %v9896_v42  ;;  %6512 = vmatprep.subr.bf16.mxu1 %v9899_v43  ;;  %v9960_v42 = vld [vmem:[#allocation6 + $0x980] ss:$28 sps:$4 sm:$0xff]   ;;  %v9957_v43 = vld [vmem:[#allocation6 + $0x438] ss:$28 sps:$4 sm:$0xff]  }
 0x3ab   :  { %8582 = vmatprep.subr.bf16.mxu0 %v9900_v44  ;;  %v9964_v44 = vld [vmem:[#allocation6 + $0x474] ss:$28 sps:$4 sm:$0xff]  }
 0x3ad   :  { %6513 = vmatpush1.bf16.msra.mxu1 %v9897_v45  ;;  %v9965_v45 = vld [vmem:[#allocation6 + $0x9b8] ss:$28 sps:$4 sm:$0xff]  }
 0x3ae   :  { %8583 = vmatpush3.bf16.msra.mxu0 %v9901_v46  ;;  %6514 = vmatprep.subr.bf16.mxu1 %v9904_v32  ;;  %v9962_v46 = vld [vmem:[#allocation6 + $0x470] ss:$28 sps:$4 sm:$0xff]   ;;  %v9966_v32 = vld [vmem:[#allocation6 + $0x7f8] ss:$28 sps:$4 sm:$0xff]  }
 0x3af   :  { %8590 = vmatprep.subr.bf16.mxu0 %v9905_v47  ;;  %v9969_v47 = vld [vmem:[#allocation6 + $0x4ac] ss:$28 sps:$4 sm:$0xff]  }
 0x3b1   :  { %6695 = vmatmul.mubr.bf16.vlgmr.msra.gmra.mrb[12].mxu0 %v10603_v24  ;;  %6515 = vmatpush1.bf16.msra.mxu1 %v9902_v49  ;;  %v9970_v49 = vld [vmem:[#allocation6 + $0x9f0] ss:$28 sps:$4 sm:$0xff]  }
 0x3b2   :  { %8591 = vmatpush3.bf16.msra.mxu0 %v9906_v50  ;;  %6734 = vmatprep.mubr.bf16.mxu0 %v10606_v28  ;;  %v9967_v50 = vld [vmem:[#allocation6 + $0x4a8] ss:$28 sps:$4 sm:$0xff]  }
 0x3b3   :  { %6516 = vmatprep.subr.bf16.mxu1 %v9909_v51  ;;  %8592 = vmatprep.subr.bf16.mxu0 %v9910_v0  ;;  %v9971_v51 = vld [vmem:[#allocation6 + $0x830] ss:$28 sps:$4 sm:$0xff]   ;;  %v9974_v0 = vld [vmem:[#allocation6 + $0x4e4] ss:$28 sps:$4 sm:$0xff]  }
 0x3b5   :  { %6517 = vmatpush1.bf16.msra.mxu1 %v9907_v5  ;;  %v9975_v5 = vld [vmem:[#allocation6 + $0xa28] ss:$28 sps:$4 sm:$0xff]  }
 0x3b6   :  { %8593 = vmatpush3.bf16.msra.mxu0 %v9911_v48  ;;  %6518 = vmatprep.subr.bf16.mxu1 %v9914_v53  ;;  %v9972_v48 = vld [vmem:[#allocation6 + $0x4e0] ss:$28 sps:$4 sm:$0xff]   ;;  %v9976_v53 = vld [vmem:[#allocation6 + $0x868] ss:$28 sps:$4 sm:$0xff]  }
 0x3b7   :  { %8594 = vmatprep.subr.bf16.mxu0 %v9915_v55  ;;  %v9979_v55 = vld [vmem:[#allocation6 + $0x51c] ss:$28 sps:$4 sm:$0xff]  }
 0x3b9   :  { %6519 = vmatpush1.bf16.msra.mxu1 %v9912_v13  ;;  %v9980_v13 = vld [vmem:[#allocation6 + $0xa60] ss:$28 sps:$4 sm:$0xff]  }
 0x3ba   :  { %8595 = vmatpush3.bf16.msra.mxu0 %v9916_v56  ;;  %6520 = vmatprep.subr.bf16.mxu1 %v9919_v58  ;;  %v9977_v56 = vld [vmem:[#allocation6 + $0x518] ss:$28 sps:$4 sm:$0xff]   ;;  %v9981_v58 = vld [vmem:[#allocation6 + $0x8a0] ss:$28 sps:$4 sm:$0xff]  }
 0x3bb   :  { %8596 = vmatprep.subr.bf16.mxu0 %v9920_v59  ;;  %v9984_v59 = vld [vmem:[#allocation6 + $0x554] ss:$28 sps:$4 sm:$0xff]  }
 0x3bd   :  { %6521 = vmatpush1.bf16.msra.mxu1 %v9917_v17  ;;  %v9982_v17 = vld [vmem:[#allocation6 + $0x550] ss:$28 sps:$4 sm:$0xff]  }
 0x3be   :  { %8597 = vmatpush3.bf16.msra.mxu0 %v9921_v60  ;;  %6522 = vmatprep.subr.bf16.mxu1 %v9924_v61  ;;  %v9985_v60 = vld [vmem:[#allocation6 + $0xa98] ss:$28 sps:$4 sm:$0xff]   ;;  %v9988_v61 = vld [vmem:[#allocation6 + $0x58c] ss:$28 sps:$4 sm:$0xff]  }
 0x3bf   :  { %8598 = vmatprep.subr.bf16.mxu0 %v9925_v62  ;;  %v10350_v62 = vmov 0.0  }
 0x3c1   :  { %6523 = vmatpush1.bf16.msra.mxu1 %v9922_v63  ;;  %v9986_v63 = vld [vmem:[#allocation6 + $0x588] ss:$28 sps:$4 sm:$0xff]  }
 0x3c2   :  { %8599 = vmatpush3.bf16.msra.mxu0 %v9926_v1  ;;  %6524 = vmatprep.subr.bf16.mxu1 %v9929_v3  ;;  %v9989_v1 = vld [vmem:[#allocation6 + $0xad0] ss:$28 sps:$4 sm:$0xff]   ;;  %v9992_v3 = vld [vmem:[#allocation6 + $0x5c4] ss:$28 sps:$4 sm:$0xff]  }
 0x3c3   :  { %8600 = vmatprep.subr.bf16.mxu0 %v9930_v4  ;;  %v9990_v4 = vld [vmem:[#allocation6 + $0x5c0] ss:$28 sps:$4 sm:$0xff]  }
 0x3c5   :  { %6525 = vmatpush1.bf16.msra.mxu1 %v9927_v9  ;;  %v9993_v9 = vld [vmem:[#allocation6 + $0xb08] ss:$28 sps:$4 sm:$0xff]  }
 0x3c6   :  { %8601 = vmatpush3.bf16.msra.mxu0 %v9931_v7  ;;  %6526 = vmatprep.subr.bf16.mxu1 %v9934_v10  ;;  %v9996_v7 = vld [vmem:[#allocation6 + $0x5fc] ss:$28 sps:$4 sm:$0xff]  }
 0x3c7   :  { %8602 = vmatprep.subr.bf16.mxu0 %v9935_v11  ;;  %v9994_v10 = vld [vmem:[#allocation6 + $0x5f8] ss:$28 sps:$4 sm:$0xff]   ;;  %v9997_v11 = vld [vmem:[#allocation6 + $0xb40] ss:$28 sps:$4 sm:$0xff]  }
 0x3c9   :  { %6527 = vmatpush1.bf16.msra.mxu1 %v9932_v12  ;;  %v10000_v12 = vld [vmem:[#allocation6 + $0x634] ss:$28 sps:$4 sm:$0xff]  }
 0x3ca   :  { %8603 = vmatpush3.bf16.msra.mxu0 %v9936_v33  ;;  %6528 = vmatprep.subr.bf16.mxu1 %v9939_v14  ;;  %v9998_v33 = vld [vmem:[#allocation6 + $0x630] ss:$28 sps:$4 sm:$0xff]   ;;  %v10001_v14 = vld [vmem:[#allocation6 + $0xb78] ss:$28 sps:$4 sm:$0xff]  }
 0x3cb   :  { %8604 = vmatprep.subr.bf16.mxu0 %v9940_v16  ;;  %v10004_v16 = vld [vmem:[#allocation6 + $0x66c] ss:$28 sps:$4 sm:$0xff]  }
 0x3cd   :  { %6529 = vmatpush1.bf16.msra.mxu1 %v9937_v18  ;;  %v10002_v18 = vld [vmem:[#allocation6 + $0x668] ss:$28 sps:$4 sm:$0xff]  }
 0x3ce   :  { %8605 = vmatpush3.bf16.msra.mxu0 %v9941_v19  ;;  %6539 = vmatprep.subr.bf16.mxu1 %v9944_v21  ;;  %v10005_v19 = vld [vmem:[#allocation6 + $0xbb0] ss:$28 sps:$4 sm:$0xff]   ;;  %v10008_v21 = vld [vmem:[#allocation6 + $0x6a4] ss:$28 sps:$4 sm:$0xff]  }
 0x3cf   :  { %8612 = vmatprep.subr.bf16.mxu0 %v9945_v25  ;;  %v10006_v25 = vld [vmem:[#allocation6 + $0x6a0] ss:$28 sps:$4 sm:$0xff]  }
 0x3d0   :  { %6531 = vmatmul.mubr.bf16.vlgmr.msra.gmra.mrb[24].mxu1 %v10603_v24  ;;  %v9956_v24 = vld [vmem:[#allocation6 + $0x788] ss:$28 sps:$4 sm:$0xff]  }
 0x3d1   :  { %6735 = vmatmul.mubr.bf16.vlgmr.msra.gmra.mrb[16].mxu0 %v10623_v52  ;;  %6540 = vmatpush1.bf16.msra.mxu1 %v9942_v20  ;;  %v10009_v20 = vld [vmem:[#allocation6 + $0xbe8] ss:$28 sps:$4 sm:$0xff]  }
 0x3d2   :  { %6571 = vmatprep.mubr.bf16.mxu1 %v10606_v28  ;;  %8613 = vmatpush3.bf16.msra.mxu0 %v9946_v29  ;;  %v9961_v28 = vld [vmem:[#allocation6 + $0x7c0] ss:$28 sps:$4 sm:$0xff]  }
 0x3d3   :  { %6774 = vmatprep.mubr.bf16.mxu0 %v10641_v26  ;;  %6541 = vmatprep.subr.bf16.mxu1 %v9949_v30  ;;  %v10012_v29 = vld [vmem:[#allocation6 + $0x6dc] ss:$28 sps:$4 sm:$0xff]  }
 0x3d4   :  { %8614 = vmatprep.subr.bf16.mxu0 %v9950_v34  ;;  %v10010_v30 = vld [vmem:[#allocation6 + $0x6d8] ss:$28 sps:$4 sm:$0xff]   ;;  %v10013_v34 = vld [vmem:[#allocation6 + $0xc20] ss:$28 sps:$4 sm:$0xff]  }
 0x3d5   :  { %6542 = vmatpush1.bf16.msra.mxu1 %v9947_v35  ;;  %v10016_v35 = vld [vmem:[#allocation6 + $0x714] ss:$28 sps:$4 sm:$0xff]  }
 0x3d6   :  { %8615 = vmatpush3.bf16.msra.mxu0 %v9951_v36  ;;  %6543 = vmatprep.subr.bf16.mxu1 %v9954_v37  ;;  %v10062_v36 = vld [vmem:[#allocation9 + $0xc0] sm:$0xff]  }
 0x3d7   :  { %8616 = vmatprep.subr.bf16.mxu0 %v9955_v38  ;;  %v10014_v37 = vld [vmem:[#allocation6 + $0x710] ss:$28 sps:$4 sm:$0xff]  }
 0x3d8   :  { %v10019_v38 = vld [vmem:[#allocation6 + $0x74c] ss:$28 sps:$4 sm:$0xff]  }
 0x3d9   :  { %6544 = vmatpush1.bf16.msra.mxu1 %v9952_v39  ;;  %v10063_v39 = vld [vmem:[#allocation9 + $0x80] sm:$0xff]  }
 0x3da   :  { %8617 = vmatpush3.bf16.msra.mxu0 %v9956_v24  ;;  %6545 = vmatprep.subr.bf16.mxu1 %v9959_v41  ;;  %v10067_v24 = vld [vmem:[#allocation9 + $0xc8] sm:$0xff]   ;;  %v10017_v41 = vld [vmem:[#allocation6 + $0x748] ss:$28 sps:$4 sm:$0xff]  }
 0x3db   :  { %8618 = vmatprep.subr.bf16.mxu0 %v9960_v42  ;;  %v10022_v42 = vld [vmem:[#allocation6 + $0x784] ss:$28 sps:$4 sm:$0xff]  }
 0x3dd   :  { %6546 = vmatpush1.bf16.msra.mxu1 %v9957_v43  ;;  %v10068_v43 = vld [vmem:[#allocation9 + $0x88] sm:$0xff]  }
 0x3de   :  { %8619 = vmatpush3.bf16.msra.mxu0 %v9961_v28  ;;  %6547 = vmatprep.subr.bf16.mxu1 %v9964_v44  ;;  %v10072_v28 = vld [vmem:[#allocation9 + $0xd0] sm:$0xff]  }
 0x3df   :  { %8620 = vmatprep.subr.bf16.mxu0 %v9965_v45  ;;  %v10020_v44 = vld [vmem:[#allocation6 + $0x780] ss:$28 sps:$4 sm:$0xff]  }
 0x3e0   :  { %v10025_v45 = vld [vmem:[#allocation6 + $0x7bc] ss:$28 sps:$4 sm:$0xff]  }
 0x3e1   :  { %6548 = vmatpush1.bf16.msra.mxu1 %v9962_v46  ;;  %v10073_v46 = vld [vmem:[#allocation9 + $0x90] sm:$0xff]  }
 0x3e2   :  { %8621 = vmatpush3.bf16.msra.mxu0 %v9966_v32  ;;  %6549 = vmatprep.subr.bf16.mxu1 %v9969_v47  ;;  %v10023_v32 = vld [vmem:[#allocation6 + $0x7b8] ss:$28 sps:$4 sm:$0xff]  }
 0x3e3   :  { %8622 = vmatprep.subr.bf16.mxu0 %v9970_v49  ;;  %v10028_v47 = vld [vmem:[#allocation6 + $0x7f4] ss:$28 sps:$4 sm:$0xff]   ;;  %v10082_v49 = vld [vmem:[#allocation9 + $0xe0] sm:$0xff]  }
 0x3e5   :  { %6550 = vmatpush1.bf16.msra.mxu1 %v9967_v50  ;;  %v10026_v50 = vld [vmem:[#allocation6 + $0x7f0] ss:$28 sps:$4 sm:$0xff]  }
 0x3e6   :  { %8623 = vmatpush3.bf16.msra.mxu0 %v9971_v51  ;;  %6551 = vmatprep.subr.bf16.mxu1 %v9974_v0  ;;  %v10031_v51 = vld [vmem:[#allocation6 + $0x82c] ss:$28 sps:$4 sm:$0xff]  }
 0x3e7   :  { %8624 = vmatprep.subr.bf16.mxu0 %v9975_v5  ;;  %v10083_v0 = vld [vmem:[#allocation9 + $0xa0] sm:$0xff]   ;;  %v10087_v5 = vld [vmem:[#allocation9 + $0xe8] sm:$0xff]  }
 0x3e9   :  { %6552 = vmatpush1.bf16.msra.mxu1 %v9972_v48  ;;  %v10029_v48 = vld [vmem:[#allocation6 + $0x828] ss:$28 sps:$4 sm:$0xff]  }
 0x3ea   :  { %8625 = vmatpush3.bf16.msra.mxu0 %v9976_v53  ;;  %6553 = vmatprep.subr.bf16.mxu1 %v9979_v55  ;;  %v10034_v53 = vld [vmem:[#allocation6 + $0x864] ss:$28 sps:$4 sm:$0xff]   ;;  %v10088_v55 = vld [vmem:[#allocation9 + $0xa8] sm:$0xff]  }
 0x3eb   :  { %8626 = vmatprep.subr.bf16.mxu0 %v9980_v13  ;;  %v10092_v13 = vld [vmem:[#allocation9 + $0xf0] sm:$0xff]  }
 0x3ed   :  { %6554 = vmatpush1.bf16.msra.mxu1 %v9977_v56  ;;  %v10032_v56 = vld [vmem:[#allocation6 + $0x860] ss:$28 sps:$4 sm:$0xff]  }
 0x3ee   :  { %8627 = vmatpush3.bf16.msra.mxu0 %v9981_v58  ;;  %6555 = vmatprep.subr.bf16.mxu1 %v9984_v59  ;;  %v10037_v58 = vld [vmem:[#allocation6 + $0x89c] ss:$28 sps:$4 sm:$0xff]  }
 0x3ef   :  { %8727 = vmatprep.subr.bf16.mxu0 %v10350_v62  ;;  %v10093_v59 = vld [vmem:[#allocation9 + $0xb0] sm:$0xff]  }
 0x3f1   :  { %6775 = vmatmul.mubr.bf16.vlgmr.msra.gmra.mrb[20].mxu0 %v10643_v31  ;;  %6556 = vmatpush1.bf16.msra.mxu1 %v9982_v17  ;;  %v10097_v17 = vld [vmem:[#allocation9 + $0xf8] sm:$0xff]  }
 0x3f2   :  { %8728 = vmatpush3.bf16.msra.mxu0 %v9985_v60  ;;  %6557 = vmatprep.subr.bf16.mxu1 %v9988_v61  ;;  %v10035_v60 = vld [vmem:[#allocation6 + $0x898] ss:$28 sps:$4 sm:$0xff]  }
 0x3f3   :  { %8729 = vmatprep.subr.bf16.mxu0 %v10350_v62  ;;  %8743 = vmatprep.mubr.msk.bf16.mxu0 %vm10351_vm0, %v10350_v62  ;;  %v10040_v61 = vld [vmem:[#allocation6 + $0x8d4] ss:$28 sps:$4 sm:$0xff]  }
 0x3f5   :  { %6558 = vmatpush1.bf16.msra.mxu1 %v9986_v63  ;;  %v10098_v63 = vld [vmem:[#allocation9 + $0xb8] sm:$0xff]  }
 0x3f6   :  { %8730 = vmatpush3.bf16.msra.mxu0 %v9989_v1  ;;  %6559 = vmatprep.subr.bf16.mxu1 %v9992_v3  ;;  %v10038_v1 = vld [vmem:[#allocation6 + $0x8d0] ss:$28 sps:$4 sm:$0xff]  }
 0x3f7   :  { %8731 = vmatprep.subr.bf16.mxu0 %v10350_v62  ;;  %v10043_v3 = vld [vmem:[#allocation6 + $0x90c] ss:$28 sps:$4 sm:$0xff]  }
 0x3f9   :  { %6560 = vmatpush1.bf16.msra.mxu1 %v9990_v4  ;;  %v10041_v4 = vld [vmem:[#allocation6 + $0x908] ss:$28 sps:$4 sm:$0xff]  }
 0x3fa   :  { %8732 = vmatpush3.bf16.msra.mxu0 %v9993_v9  ;;  %6561 = vmatprep.subr.bf16.mxu1 %v9996_v7  ;;  %v10046_v9 = vld [vmem:[#allocation6 + $0x944] ss:$28 sps:$4 sm:$0xff]  }
 0x3fb   :  { %8733 = vmatprep.subr.bf16.mxu0 %v10350_v62  ;;  %v10044_v7 = vld [vmem:[#allocation6 + $0x940] ss:$28 sps:$4 sm:$0xff]  }
 0x3fd   :  { %6562 = vmatpush1.bf16.msra.mxu1 %v9994_v10  ;;  %v10049_v10 = vld [vmem:[#allocation6 + $0x97c] ss:$28 sps:$4 sm:$0xff]  }
 0x3fe   :  { %8734 = vmatpush3.bf16.msra.mxu0 %v9997_v11  ;;  %6563 = vmatprep.subr.bf16.mxu1 %v10000_v12  ;;  %v10047_v11 = vld [vmem:[#allocation6 + $0x978] ss:$28 sps:$4 sm:$0xff]  }
 0x3ff   :  { %8735 = vmatprep.subr.bf16.mxu0 %v10350_v62  ;;  %v10052_v12 = vld [vmem:[#allocation6 + $0x9b4] ss:$28 sps:$4 sm:$0xff]  }
 0x401   :  { %6564 = vmatpush1.bf16.msra.mxu1 %v9998_v33  ;;  %v10050_v33 = vld [vmem:[#allocation6 + $0x9b0] ss:$28 sps:$4 sm:$0xff]  }
 0x402   :  { %8736 = vmatpush3.bf16.msra.mxu0 %v10001_v14  ;;  %6565 = vmatprep.subr.bf16.mxu1 %v10004_v16  ;;  %v10055_v14 = vld [vmem:[#allocation6 + $0x9ec] ss:$28 sps:$4 sm:$0xff]  }
 0x403   :  { %8737 = vmatprep.subr.bf16.mxu0 %v10350_v62  ;;  %v10053_v16 = vld [vmem:[#allocation6 + $0x9e8] ss:$28 sps:$4 sm:$0xff]  }
 0x405   :  { %6566 = vmatpush1.bf16.msra.mxu1 %v10002_v18  ;;  %v10058_v18 = vld [vmem:[#allocation6 + $0xa24] ss:$28 sps:$4 sm:$0xff]  }
 0x406   :  { %8738 = vmatpush3.bf16.msra.mxu0 %v10005_v19  ;;  %6567 = vmatprep.subr.bf16.mxu1 %v10008_v21  ;;  %v10056_v19 = vld [vmem:[#allocation6 + $0xa20] ss:$28 sps:$4 sm:$0xff]  }
 0x407   :  { %8739 = vmatprep.subr.bf16.mxu0 %v10350_v62  ;;  %v10061_v21 = vld [vmem:[#allocation6 + $0xa5c] ss:$28 sps:$4 sm:$0xff]  }
 0x409   :  { %6568 = vmatpush1.bf16.msra.mxu1 %v10006_v25  ;;  %v10059_v25 = vld [vmem:[#allocation6 + $0xa58] ss:$28 sps:$4 sm:$0xff]  }
 0x40a   :  { %8740 = vmatpush3.bf16.msra.mxu0 %v10009_v20  ;;  %6569 = vmatprep.subr.bf16.mxu1 %v10012_v29  ;;  %v10066_v20 = vld [vmem:[#allocation6 + $0xa94] ss:$28 sps:$4 sm:$0xff]  }
 0x40b   :  { %8741 = vmatprep.subr.bf16.mxu0 %v10350_v62  ;;  %v10064_v29 = vld [vmem:[#allocation6 + $0xa90] ss:$28 sps:$4 sm:$0xff]  }
 0x40d   :  { %6570 = vmatpush1.bf16.msra.mxu1 %v10010_v30  ;;  %v10071_v30 = vld [vmem:[#allocation6 + $0xacc] ss:$28 sps:$4 sm:$0xff]  }
 0x40e   :  { %8742 = vmatpush3.bf16.msra.mxu0 %v10013_v34  ;;  %6580 = vmatprep.subr.bf16.mxu1 %v10016_v35  ;;  %v10069_v34 = vld [vmem:[#allocation6 + $0xac8] ss:$28 sps:$4 sm:$0xff]  }
 0x40f   :  { %8665 = vmatprep.subr.bf16.mxu0 %v10062_v36  ;;  %v10076_v35 = vld [vmem:[#allocation6 + $0xb04] ss:$28 sps:$4 sm:$0xff]  }
 0x410   :  { %6572 = vmatmul.mubr.bf16.vlgmr.msra.gmra.mrb[24].mxu1 %v10623_v52  ;;  %v10077_v52 = vld [vmem:[#allocation9 + $0xd8] sm:$0xff]  }
 0x411   :  { %8744 = vmatmul.mubr.bf16.vlgmr.msra.gmra.mrb[24].mxu0 %v10652_v2  ;;  %6581 = vmatpush1.bf16.msra.mxu1 %v10014_v37  ;;  %v10074_v36 = vld [vmem:[#allocation6 + $0xb00] ss:$28 sps:$4 sm:$0xff]  }
 0x412   :  { %6612 = vmatprep.mubr.bf16.mxu1 %v10641_v26  ;;  %6582 = vmatprep.subr.bf16.mxu1 %v10019_v38  ;;  %v10078_v26 = vld [vmem:[#allocation9 + $0x98] sm:$0xff]   ;;  %v10081_v37 = vld [vmem:[#allocation6 + $0xb3c] ss:$28 sps:$4 sm:$0xff]  }
 0x413   :  { %8666 = vmatpush3.bf16.msra.mxu0 %v10063_v39  ;;  %v10079_v38 = vld [vmem:[#allocation6 + $0xb38] ss:$28 sps:$4 sm:$0xff]  }
 0x414   :  { %8667 = vmatprep.subr.bf16.mxu0 %v10067_v24  ;;  %v10086_v39 = vld [vmem:[#allocation6 + $0xb74] ss:$28 sps:$4 sm:$0xff]  }
 0x415   :  { %6583 = vmatpush1.bf16.msra.mxu1 %v10017_v41  ;;  %v10084_v24 = vld [vmem:[#allocation6 + $0xb70] ss:$28 sps:$4 sm:$0xff]   ;;  %v10681_v41 = vld [vmem:[#allocation7] sm:$0xff] }
 0x416   :  { %6584 = vmatprep.subr.bf16.mxu1 %v10022_v42  ;;  %v4134_v42 = vrot.slane %v10681_v41, %v678_v57 }
 0x417   :  { %8668 = vmatpush3.bf16.msra.mxu0 %v10068_v43  ;;  %v10089_v43 = vld [vmem:[#allocation6 + $0xba8] ss:$28 sps:$4 sm:$0xff]  }
 0x418   :  { %8669 = vmatprep.subr.bf16.mxu0 %v10072_v28  ;;  %v10096_v28 = vld [vmem:[#allocation6 + $0xbe4] ss:$28 sps:$4 sm:$0xff]  }
 0x419   :  { %6585 = vmatpush1.bf16.msra.mxu1 %v10020_v44 }
 0x41a   :  { %6586 = vmatprep.subr.bf16.mxu1 %v10025_v45 }
 0x41b   :  { %8670 = vmatpush3.bf16.msra.mxu0 %v10073_v46  ;;  %v4126_v46 = vrot.slane %v10681_v41, %v670_v27 }
 0x41c   :  { %8671 = vmatprep.subr.bf16.mxu0 %v10077_v52 }
 0x41d   :  { %6587 = vmatpush1.bf16.msra.mxu1 %v10023_v32 }
 0x41e   :  { %6588 = vmatprep.subr.bf16.mxu1 %v10028_v47 }
 0x41f   :  { %8672 = vmatpush3.bf16.msra.mxu0 %v10078_v26 }
 0x420   :  { %8673 = vmatprep.subr.bf16.mxu0 %v10082_v49 }
 0x421   :  { %6589 = vmatpush1.bf16.msra.mxu1 %v10026_v50  ;;  %v10094_v50 = vld [vmem:[#allocation6 + $0xbe0] ss:$28 sps:$4 sm:$0xff]  }
 0x422   :  { %6590 = vmatprep.subr.bf16.mxu1 %v10031_v51 }
 0x423   :  { %8674 = vmatpush3.bf16.msra.mxu0 %v10083_v0 }
 0x424   :  { %8675 = vmatprep.subr.bf16.mxu0 %v10087_v5  ;;  %v10101_v5 = vld [vmem:[#allocation6 + $0xc1c] ss:$28 sps:$4 sm:$0xff]  }
 0x425   :  { %6591 = vmatpush1.bf16.msra.mxu1 %v10029_v48 }
 0x426   :  { %6592 = vmatprep.subr.bf16.mxu1 %v10034_v53 }
 0x427   :  { %8676 = vmatpush3.bf16.msra.mxu0 %v10088_v55 }
 0x428   :  { %8677 = vmatprep.subr.bf16.mxu0 %v10092_v13  ;;  %v10099_v13 = vld [vmem:[#allocation6 + $0xc18] ss:$28 sps:$4 sm:$0xff]  }
 0x429   :  { %6593 = vmatpush1.bf16.msra.mxu1 %v10032_v56  ;;  %v10118_v56 = vld [vmem:[#allocation9 + $0x180] sm:$0xff]  }
 0x42a   :  { %6594 = vmatprep.subr.bf16.mxu1 %v10037_v58  ;;  %v10102_v58 = vld [vmem:[#allocation9 + $0x40] sm:$0xff]  }
 0x42b   :  { %8678 = vmatpush3.bf16.msra.mxu0 %v10093_v59 }
 0x42c   :  { %8679 = vmatprep.subr.bf16.mxu0 %v10097_v17  ;;  %v10103_v17 = vld [vmem:[#allocation9] sm:$0xff]  }
 0x42d   :  { %6595 = vmatpush1.bf16.msra.mxu1 %v10035_v60  ;;  %v10104_v60 = vld [vmem:[#allocation9 + $0x48] sm:$0xff]  }
 0x42e   :  { %6596 = vmatprep.subr.bf16.mxu1 %v10040_v61  ;;  %v10119_v61 = vld [vmem:[#allocation9 + $0x188] sm:$0xff]  }
 0x42f   :  { %8680 = vmatpush3.bf16.msra.mxu0 %v10098_v63 }
 0x430   :  { %8747 = vmatprep.subr.bf16.mxu0 %v10350_v62 }
 0x431   :  { %6597 = vmatpush1.bf16.msra.mxu1 %v10038_v1  ;;  %v10105_v1 = vld [vmem:[#allocation9 + $0x8] sm:$0xff]  }
 0x432   :  { %6598 = vmatprep.subr.bf16.mxu1 %v10043_v3  ;;  %v10106_v3 = vld [vmem:[#allocation9 + $0x50] sm:$0xff]  }
 0x435   :  { %6599 = vmatpush1.bf16.msra.mxu1 %v10041_v4  ;;  %v10120_v4 = vld [vmem:[#allocation9 + $0x190] sm:$0xff]  }
 0x436   :  { %6600 = vmatprep.subr.bf16.mxu1 %v10046_v9  ;;  %v10107_v9 = vld [vmem:[#allocation9 + $0x10] sm:$0xff]  }
 0x439   :  { %6601 = vmatpush1.bf16.msra.mxu1 %v10044_v7  ;;  %v10108_v7 = vld [vmem:[#allocation9 + $0x58] sm:$0xff]  }
 0x43a   :  { %6602 = vmatprep.subr.bf16.mxu1 %v10049_v10  ;;  %v10121_v10 = vld [vmem:[#allocation9 + $0x198] sm:$0xff]  }
 0x43d   :  { %6603 = vmatpush1.bf16.msra.mxu1 %v10047_v11  ;;  %v10109_v11 = vld [vmem:[#allocation9 + $0x18] sm:$0xff]  }
 0x43e   :  { %6604 = vmatprep.subr.bf16.mxu1 %v10052_v12  ;;  %v10122_v12 = vld [vmem:[#allocation9 + $0x1a0] sm:$0xff]  }
 0x441   :  { %6605 = vmatpush1.bf16.msra.mxu1 %v10050_v33  ;;  %v10111_v33 = vld [vmem:[#allocation9 + $0x20] sm:$0xff]  }
 0x442   :  { %6606 = vmatprep.subr.bf16.mxu1 %v10055_v14  ;;  %v10112_v14 = vld [vmem:[#allocation9 + $0x68] sm:$0xff]  }
 0x445   :  { %6607 = vmatpush1.bf16.msra.mxu1 %v10053_v16  ;;  %v10123_v16 = vld [vmem:[#allocation9 + $0x1a8] sm:$0xff]  }
 0x446   :  { %6608 = vmatprep.subr.bf16.mxu1 %v10058_v18  ;;  %v10113_v18 = vld [vmem:[#allocation9 + $0x28] sm:$0xff]  }
 0x449   :  { %6609 = vmatpush1.bf16.msra.mxu1 %v10056_v19  ;;  %v4122_v19 = vrot.slane %v10681_v41, %v666_v22  ;;  %v10117_v22 = vld [vmem:[#allocation9 + $0x38] sm:$0xff]  }
 0x44a   :  { %6610 = vmatprep.subr.bf16.mxu1 %v10061_v21  ;;  %v10114_v21 = vld [vmem:[#allocation9 + $0x70] sm:$0xff]  }
 0x44d   :  { %6611 = vmatpush1.bf16.msra.mxu1 %v10059_v25  ;;  %v10124_v25 = vld [vmem:[#allocation9 + $0x1b0] sm:$0xff]  }
 0x44e   :  { %6621 = vmatprep.subr.bf16.mxu1 %v10066_v20 }
 0x450   :  { %6613 = vmatmul.mubr.bf16.vlgmr.msra.gmra.mrb[24].mxu1 %v10643_v31  ;;  %v10091_v31 = vld [vmem:[#allocation6 + $0xbac] ss:$28 sps:$4 sm:$0xff]  }
 0x451   :  { %6622 = vmatpush1.bf16.msra.mxu1 %v10064_v29  ;;  %6653 = vmatprep.mubr.bf16.mxu1 %v10349_v40  ;;  %v4130_v40 = vrot.slane %v10681_v41, %v674_v15 }
 0x452   :  { %6623 = vmatprep.subr.bf16.mxu1 %v10071_v30  ;;  %v10115_v30 = vld [vmem:[#allocation9 + $0x30] sm:$0xff]  }
 0x455   :  { %6624 = vmatpush1.bf16.msra.mxu1 %v10069_v34 }
 0x456   :  { %6625 = vmatprep.subr.bf16.mxu1 %v10076_v35 }
 0x459   :  { %6626 = vmatpush1.bf16.msra.mxu1 %v10074_v36 }
 0x45a   :  { %6627 = vmatprep.subr.bf16.mxu1 %v10081_v37  ;;  %v10116_v37 = vld [vmem:[#allocation9 + $0x78] sm:$0xff]  }
 0x45d   :  { %6628 = vmatpush1.bf16.msra.mxu1 %v10079_v38  ;;  %v10125_v38 = vld [vmem:[#allocation9 + $0x1b8] sm:$0xff]  }
 0x45e   :  { %6629 = vmatprep.subr.bf16.mxu1 %v10086_v39 }
 0x461   :  { %6630 = vmatpush1.bf16.msra.mxu1 %v10084_v24 }
 0x462   :  { %6631 = vmatprep.subr.bf16.mxu1 %v10091_v31  ;;  %v10126_v31 = vld [vmem:[#allocation9 + $0x140] sm:$0xff]  }
 0x463   :  { %v10689_v44 = vpop.f32.mrb[20].mxu1  ;;  %v6491_v45 = vpop.f32.mrb[8].mxu0 }
 0x464   :  { %v8795_v52 = vadd.f32 %v6491_v45, %v4130_v40  ;;  %v6329_v32 = vpop.f32.mrb[21].mxu1  ;;  %v6493_v47 = vpop.f32.mrb[9].mxu0  ;;  %v8793_v34 = vadd.f32 %v10689_v44, %v4122_v19  ;;  %v10127_v40 = vld [vmem:[#allocation9 + $0x100] sm:$0xff]   ;;  %v10130_v44 = vld [vmem:[#allocation9 + $0x150] sm:$0xff]  }
 0x465   :  { %v8796_v26 = vadd.f32 %v6493_v47, %v4134_v42  ;;  %v6331_v15 = vpop.f32.mrb[22].mxu1  ;;  %v6495_v49 = vpop.f32.mrb[10].mxu0  ;;  %6632 = vmatpush1.bf16.msra.mxu1 %v10089_v43  ;;  %v8794_v48 = vadd.f32 %v6329_v32, %v4126_v46  ;;  %v10128_v43 = vld [vmem:[#allocation9 + $0x148] sm:$0xff]   ;;  %v10131_v45 = vld [vmem:[#allocation9 + $0x110] sm:$0xff]   ;;  %v10132_v46 = vld [vmem:[#allocation9 + $0x158] sm:$0xff]  }
 0x466   :  { %v6824_v51 = vmax.f32 %v8795_v52, 0.0  ;;  %v6332_v57 = vpop.f32.mrb[23].mxu1  ;;  %v6496_v0 = vpop.f32.mrb[11].mxu0  ;;  %6633 = vmatprep.subr.bf16.mxu1 %v10096_v28  ;;  %v6822_v24 = vmax.f32 %v8793_v34, 0.0  ;;  %v10129_v28 = vld [vmem:[#allocation9 + $0x108] sm:$0xff]   ;;  %v10133_v52 = vld [vmem:[#allocation9 + $0x118] sm:$0xff]  }
 0x467   :  { %v6825_v53 = vmax.f32 %v8796_v26, 0.0  ;;  %v6823_v59 = vmax.f32 %v8794_v48, 0.0  ;;  %v10134_v32 = vld [vmem:[#allocation9 + $0x160] sm:$0xff]   ;;  %v4146_v26 = vrot.slane %v10681_v41, %v690_v23  ;;  %v10136_v48 = vld [vmem:[#allocation9 + $0x168] sm:$0xff]  }
 0x468   :  { %v6831_v27 = vpack.c.bf16 %v6824_v51, %v6824_v51  ;;  %v6829_v42 = vpack.c.bf16 %v6822_v24, %v6822_v24  ;;  %v10135_v47 = vld [vmem:[#allocation9 + $0x120] sm:$0xff]  }
 0x469   :  { %v6832_v55 = vpack.c.bf16 %v6825_v53, %v6825_v53  ;;  %6634 = vmatpush1.bf16.msra.mxu1 %v10094_v50  ;;  %v6830_v63 = vpack.c.bf16 %v6823_v59, %v6823_v59  ;;  %v10137_v53 = vld [vmem:[#allocation9 + $0x128] sm:$0xff]  }
 0x46a   :  { %6635 = vmatprep.subr.bf16.mxu1 %v10101_v5 }
 0x46b   :  { %7363 = vmatprep.mubr.bf16.mxu0 %v6832_v55 }
 0x46c   :  { %7364 = vmatmul.mubr.bf16.vlgmr.msra.gmra.mrb[28].mxu0 %v6831_v27  ;;  %v10139_v27 = vld [vmem:[#allocation9 + $0x130] sm:$0xff]  }
 0x46d   :  { %6636 = vmatpush1.bf16.msra.mxu1 %v10099_v13  ;;  %8748 = vmatpush3.bf16.msra.mxu0 %v10118_v56  ;;  %v10138_v13 = vld [vmem:[#allocation9 + $0x170] sm:$0xff]  }
 0x46e   :  { %8643 = vmatprep.subr.bf16.mxu1 %v10102_v58  ;;  %8749 = vmatprep.subr.bf16.mxu0 %v10350_v62 }
 0x46f   :  { %8763 = vmatprep.mubr.msk.bf16.mxu0 %vm10351_vm0, %v10350_v62 }
 0x470   :  { %6654 = vmatmul.mubr.bf16.vlgmr.msra.gmra.mrb[24].mxu1 %v10652_v2  ;;  %v10110_v2 = vld [vmem:[#allocation9 + $0x60] sm:$0xff]  }
 0x471   :  { %8644 = vmatpush3.bf16.msra.mxu1 %v10103_v17  ;;  %7323 = vmatprep.mubr.bf16.mxu1 %v6830_v63 }
 0x472   :  { %8645 = vmatprep.subr.bf16.mxu1 %v10104_v60  ;;  %8750 = vmatpush3.bf16.msra.mxu0 %v10119_v61  ;;  %v10140_v60 = vld [vmem:[#allocation9 + $0x178] sm:$0xff]  }
 0x473   :  { %8751 = vmatprep.subr.bf16.mxu0 %v10350_v62  ;;  %v10141_v61 = vld [vmem:[#allocation9 + $0x138] sm:$0xff]  }
 0x475   :  { %8646 = vmatpush3.bf16.msra.mxu1 %v10105_v1 }
 0x476   :  { %8647 = vmatprep.subr.bf16.mxu1 %v10106_v3  ;;  %8752 = vmatpush3.bf16.msra.mxu0 %v10120_v4 }
 0x477   :  { %8753 = vmatprep.subr.bf16.mxu0 %v10350_v62 }
 0x479   :  { %8648 = vmatpush3.bf16.msra.mxu1 %v10107_v9 }
 0x47a   :  { %8649 = vmatprep.subr.bf16.mxu1 %v10108_v7  ;;  %8754 = vmatpush3.bf16.msra.mxu0 %v10121_v10 }
 0x47b   :  { %8755 = vmatprep.subr.bf16.mxu0 %v10350_v62 }
 0x47d   :  { %8650 = vmatpush3.bf16.msra.mxu1 %v10109_v11 }
 0x47e   :  { %8651 = vmatprep.subr.bf16.mxu1 %v10110_v2  ;;  %8756 = vmatpush3.bf16.msra.mxu0 %v10122_v12  ;;  %v4138_v12 = vrot.slane %v10681_v41, %v682_v6  ;;  %v10143_v6 = vld [vmem:[#allocation12 + $0x8] sm:$0xff]  }
 0x47f   :  { %8757 = vmatprep.subr.bf16.mxu0 %v10350_v62 }
 0x481   :  { %8652 = vmatpush3.bf16.msra.mxu1 %v10111_v33 }
 0x482   :  { %8653 = vmatprep.subr.bf16.mxu1 %v10112_v14  ;;  %8758 = vmatpush3.bf16.msra.mxu0 %v10123_v16  ;;  %v4142_v16 = vrot.slane %v10681_v41, %v686_v8  ;;  %v10145_v8 = vld [vmem:[#allocation12 + $0x18] sm:$0xff]   ;;  %v10146_v41 = vld [vmem:[#allocation12 + $0x20] sm:$0xff]  }
 0x483   :  { %8759 = vmatprep.subr.bf16.mxu0 %v10350_v62 }
 0x484   :  { %v8584_v20 = vpop.f32.mrb[12].mxu0 }
 0x485   :  { %v8585_v29 = vpop.f32.mrb[13].mxu0  ;;  %8654 = vmatpush3.bf16.msra.mxu1 %v10113_v18 }
 0x486   :  { %v8586_v35 = vadd.f32 %v8585_v29, %v8584_v20  ;;  %v8587_v36 = vpop.f32.mrb[14].mxu0  ;;  %8655 = vmatprep.subr.bf16.mxu1 %v10114_v21  ;;  %8760 = vmatpush3.bf16.msra.mxu0 %v10124_v25 }
 0x487   :  { %v8588_v39 = vpop.f32.mrb[15].mxu0  ;;  %8761 = vmatprep.subr.bf16.mxu0 %v10350_v62 }
 0x488   :  { %v6697_v50 = vadd.f32 %v8586_v35, %v4146_v26 }
 0x489   :  { %8656 = vmatpush3.bf16.msra.mxu1 %v10115_v30 }
 0x48a   :  { %8657 = vmatprep.subr.bf16.mxu1 %v10116_v37  ;;  %8762 = vmatpush3.bf16.msra.mxu0 %v10125_v38  ;;  %v10142_v37 = vld [vmem:[#allocation12] sm:$0xff]  }
 0x48d   :  { %8658 = vmatpush3.bf16.msra.mxu1 %v10117_v22  ;;  %v8414_v22 = vld [vmem:[#allocation10] ss:$0 sm:$0xff] }
 0x48e   :  { %8687 = vmatprep.subr.bf16.mxu1 %v10126_v31 }
 0x490   :  { %7324 = vmatmul.mubr.bf16.vlgmr.msra.gmra.mrb[28].mxu1 %v6829_v42 }
 0x491   :  { %8688 = vmatpush3.bf16.msra.mxu1 %v10127_v40 }
 0x492   :  { %8689 = vmatprep.subr.bf16.mxu1 %v10128_v43 }
 0x495   :  { %8690 = vmatpush3.bf16.msra.mxu1 %v10129_v28 }
 0x496   :  { %8691 = vmatprep.subr.bf16.mxu1 %v10130_v44  ;;  %v10147_v44 = vld [vmem:[#allocation12 + $0x28] sm:$0xff]  }
 0x499   :  { %8692 = vmatpush3.bf16.msra.mxu1 %v10131_v45  ;;  %v10148_v45 = vld [vmem:[#allocation12 + $0x30] sm:$0xff]  }
 0x49a   :  { %8693 = vmatprep.subr.bf16.mxu1 %v10132_v46  ;;  %v10149_v46 = vld [vmem:[#allocation12 + $0x38] sm:$0xff]  }
 0x49d   :  { %8694 = vmatpush3.bf16.msra.mxu1 %v10133_v52 }
 0x49e   :  { %8695 = vmatprep.subr.bf16.mxu1 %v10134_v32 }
 0x4a1   :  { %8696 = vmatpush3.bf16.msra.mxu1 %v10135_v47 }
 0x4a2   :  { %8697 = vmatprep.subr.bf16.mxu1 %v10136_v48 }
 0x4a4   :  { %v8606_v15 = vpop.f32.mrb[16].mxu0 }
 0x4a5   :  { %v8607_v49 = vpop.f32.mrb[17].mxu0  ;;  %8698 = vmatpush3.bf16.msra.mxu1 %v10137_v53 }
 0x4a6   :  { %v8608_v51 = vadd.f32 %v8607_v49, %v8606_v15  ;;  %v8609_v57 = vpop.f32.mrb[18].mxu0  ;;  %8699 = vmatprep.subr.bf16.mxu1 %v10138_v13 }
 0x4a7   :  { %v8610_v0 = vpop.f32.mrb[19].mxu0 }
 0x4a8   :  { %v6737_v5 = vadd.f32 %v8608_v51, %v6697_v50 }
 0x4a9   :  { %8700 = vmatpush3.bf16.msra.mxu1 %v10139_v27 }
 0x4aa   :  { %8701 = vmatprep.subr.bf16.mxu1 %v10140_v60 }
 0x4ad   :  { %8702 = vmatpush3.bf16.msra.mxu1 %v10141_v61 }
 0x4ae   :  { %8767 = vmatprep.subr.bf16.mxu1 %v10350_v62 }
 0x4c4   :  { %v8628_v55 = vpop.f32.mrb[20].mxu0 }
 0x4c5   :  { %v8629_v56 = vpop.f32.mrb[21].mxu0 }
 0x4c6   :  { %v8630_v58 = vadd.f32 %v8629_v56, %v8628_v55  ;;  %v8631_v59 = vpop.f32.mrb[22].mxu0  ;;  %v8471_v55 = vld [vmem:[#allocation13] ss:$0 sm:$0xff] }
 0x4c7   :  { %v8632_v17 = vpop.f32.mrb[23].mxu0 }
 0x4c8   :  { %v6777_v23 = vadd.f32 %v8630_v58, %v6737_v5 }
 0x4e4   :  { %v6816_v63 = vpop.f32.mrb[24].mxu0 }
 0x4e5   :  { %v6817_v1 = vadd.f32 %v6816_v63, %v6777_v23  ;;  %v8745_v3 = vpop.f32.mrb[25].mxu0 }
 0x4e6   :  { %v6819_v4 = vpop.f32.mrb[26].mxu0 }
 0x4e7   :  { %v6828_v9 = vmax.f32 %v6817_v1, 0.0  ;;  %v8746_v7 = vpop.f32.mrb[27].mxu0 }
 0x4e9   :  { %v6835_v10 = vpack.c.bf16 %v6828_v9, %v6828_v9 }
 0x4eb   :  { %8764 = vmatmul.mubr.bf16.vlgmr.msra.gmra.mrb[32].mxu0 %v6835_v10 }
 0x53f   :  { %v8681_v11 = vpop.f32.mrb[28].mxu0 }
 0x540   :  { %v8682_v2 = vpop.f32.mrb[29].mxu0 }
 0x541   :  { %v8683_v33 = vadd.f32 %v8682_v2, %v8681_v11  ;;  %v8684_v14 = vpop.f32.mrb[30].mxu0 }
 0x542   :  { %v8685_v18 = vpop.f32.mrb[31].mxu0 }
 0x543   :  { %v6655_v19 = vpop.f32.mrb[24].mxu1 }
 0x544   :  { %v8797_v21 = vadd.f32 %v6655_v19, %v4138_v12  ;;  %v6657_v25 = vpop.f32.mrb[25].mxu1 }
 0x545   :  { %v8798_v20 = vadd.f32 %v6657_v25, %v4142_v16  ;;  %v6659_v29 = vpop.f32.mrb[26].mxu1 }
 0x546   :  { %v6826_v30 = vmax.f32 %v8797_v21, 0.0  ;;  %v6660_v34 = vpop.f32.mrb[27].mxu1 }
 0x547   :  { %v6827_v35 = vmax.f32 %v8798_v20, 0.0 }
 0x548   :  { %v6833_v38 = vpack.c.bf16 %v6826_v30, %v6826_v30 }
 0x549   :  { %v6834_v36 = vpack.c.bf16 %v6827_v35, %v6827_v35 }
 0x54b   :  { %7403 = vmatprep.mubr.bf16.mxu1 %v6834_v36 }
 0x54c   :  { %7404 = vmatmul.mubr.bf16.vlgmr.msra.gmra.mrb[32].mxu1 %v6833_v38 }
 0x54d   :  { %8768 = vmatpush3.bf16.msra.mxu1 %v10142_v37  ;;  %8783 = vmatprep.mubr.msk.bf16.mxu1 %vm10351_vm0, %v10350_v62 }
 0x54e   :  { %8769 = vmatprep.subr.bf16.mxu1 %v10350_v62 }
 0x551   :  { %8770 = vmatpush3.bf16.msra.mxu1 %v10143_v6 }
 0x552   :  { %8771 = vmatprep.subr.bf16.mxu1 %v10350_v62 }
 0x555   :  { %8772 = vmatpush3.bf16.msra.mxu1 %v10144_v54 }
 0x556   :  { %8773 = vmatprep.subr.bf16.mxu1 %v10350_v62 }
 0x559   :  { %8774 = vmatpush3.bf16.msra.mxu1 %v10145_v8 }
 0x55a   :  { %8775 = vmatprep.subr.bf16.mxu1 %v10350_v62 }
 0x55d   :  { %8776 = vmatpush3.bf16.msra.mxu1 %v10146_v41 }
 0x55e   :  { %8777 = vmatprep.subr.bf16.mxu1 %v10350_v62 }
 0x561   :  { %8778 = vmatpush3.bf16.msra.mxu1 %v10147_v44 }
 0x562   :  { %8779 = vmatprep.subr.bf16.mxu1 %v10350_v62 }
 0x563   :  { %v8659_v39 = vpop.f32.mrb[28].mxu1 }
 0x564   :  { %v8660_v24 = vpop.f32.mrb[29].mxu1 }
 0x565   :  { %v8661_v31 = vadd.f32 %v8660_v24, %v8659_v39  ;;  %v8662_v40 = vpop.f32.mrb[30].mxu1  ;;  %8780 = vmatpush3.bf16.msra.mxu1 %v10148_v45 }
 0x566   :  { %v8663_v42 = vpop.f32.mrb[31].mxu1  ;;  %8781 = vmatprep.subr.bf16.mxu1 %v10350_v62 }
 0x567   :  { %v7326_v43 = vadd.f32 %v8661_v31, %v8414_v22 }
 0x569   :  { %v7366_v28 = vadd.f32 %v8683_v33, %v7326_v43  ;;  %8782 = vmatpush3.bf16.msra.mxu1 %v10149_v46 }
 0x5be   :  { %v7445_v52 = vpop.f32.mrb[32].mxu0 }
 0x5bf   :  { %v8765_v32 = vpop.f32.mrb[33].mxu0 }
 0x5c0   :  { %v7448_v47 = vpop.f32.mrb[34].mxu0 }
 0x5c1   :  { %v8766_v26 = vpop.f32.mrb[35].mxu0 }
 0x61f   :  { %v8703_v15 = vpop.f32.mrb[32].mxu1 }
 0x620   :  { %v8704_v49 = vpop.f32.mrb[33].mxu1 }
 0x621   :  { %v8705_v50 = vadd.f32 %v8704_v49, %v8703_v15  ;;  %v8706_v51 = vpop.f32.mrb[34].mxu1 }
 0x622   :  { %v8707_v57 = vpop.f32.mrb[35].mxu1 }
 0x623   :  { %v7406_v0 = vadd.f32 %v8705_v50, %v7366_v28 }
 0x625   :  { %v7446_v5 = vadd.f32 %v7445_v52, %v7406_v0 }
 0x627   :  { %v7451_v48 = vmax.f32 %v7446_v5, 0.0 }
 0x629   :  { %v7452_v53 = vpack.c.bf16 %v7451_v48, %v7451_v48 }
 0x62b   :  { %8784 = vmatmul.mubr.bf16.vlgmr.msra.gmra.mrb[36].mxu1 %v7452_v53 }
 0x6fe   :  { %v7558_v13 = vpop.f32.mrb[36].mxu1 }
 0x6ff   :  { %v7559_v56 = vadd.f32 %v8471_v55, %v7558_v13  ;;  %v8785_v62 = vpop.f32.mrb[37].mxu1 }
 0x700   :  { %v7561_v27 = vpop.f32.mrb[38].mxu1 }
 0x701   :  { %7564 = vst [vmem:[%s10739_s9] sm:$0xff] %v7559_v56  ;;  %v8786_v58 = vpop.f32.mrb[39].mxu1 }
 0x702   :  { %7569 = vsyncpa [#allocation3], 1 }
 0x703   :  { %7570 = vsyncpa [#allocation5], 1 }
 0x704   :  { %7571 = vsyncpa [#allocation8], 1 }
 0x705   :  { %7572 = vsyncpa [#allocation11], 1 }
 0x706   :  { %7573 = vsyncpa [#allocation14], 1 }

</bundles_post_ra>
